<compile_context>
chip_gen: v7x
topology: tpu7x:2x2x1
jax: 0.10.0
libtpu: 0.0.40
codegen_flags: <defaults>
</compile_context>

<pallas_src>
import functools
import math

import jax
import jax.numpy as jnp
import numpy as np
from jax.experimental import pallas as pl
from jax.experimental.pallas import tpu as pltpu

# ---- small synthetic config consistent with the module structure ------------
B = 2
FH = FW = 8
FHW = FH * FW
C_CLIP = 48          # stand-in for CLIP's 1024 channels
C_DINO = 40          # stand-in for DINOv2's 768 channels
D_MODEL = 32
GRID = 4
NQ = GRID * GRID     # num_queries
GA = GRID * GRID     # pooled grid area (keys per encoder)
NUM_HEADS = 4
DH = D_MODEL // NUM_HEADS
NUM_ENC = 2
NUM_CLASSES = 10
NC_PAD = 128         # lane-dense padded classifier / output width
EPS = 1e-5           # GroupNorm default eps

# ---- packed-parameter buffer layouts (all row offsets sublane-aligned) -------
# narrow buffer: (NR_TOTAL, D_MODEL)
NR_WP0 = 0                               # (C_CLIP, D)  clip 1x1-conv weight
NR_WP1 = NR_WP0 + C_CLIP                 # (C_DINO, D)  dino 1x1-conv weight
NR_WV = NR_WP1 + C_DINO                  # (D, D)       attention V weight
NR_A = NR_WV + D_MODEL                   # (NH*NQ, D)   folded per-head q @ Wk_h^T
NR_VEC = NR_A + NUM_HEADS * NQ           # (8, D)       bias / affine vectors
NR_TOTAL = NR_VEC + 8
VR_BP0, VR_GNW0, VR_GNB0, VR_BP1, VR_GNW1, VR_GNB1, VR_BV = range(7)

# wide buffer: (WR_TOTAL, NC_PAD)
WR_HEAD = 0                              # (2D, NC_PAD) folded Wo @ Wf_{a,b} @ Wc
WR_BHEAD = WR_HEAD + 2 * D_MODEL         # (1, NC_PAD)  folded head bias
WR_POOL = WR_BHEAD + 8                   # (GA, FHW)    adaptive-avg-pool matrix
WR_TOTAL = WR_POOL + GA

assert D_MODEL % NUM_HEADS == 0 and FH % GRID == 0 and FW % GRID == 0
assert all(v % 8 == 0 for v in (NR_WP1, NR_WV, NR_A, NR_VEC, NR_TOTAL,
                                WR_BHEAD, WR_POOL, WR_TOTAL))


# ------------------------------ fused kernel ----------------------------------
def _sva_fused_kernel(clip_ref, dino_ref, wn_ref, ww_ref, out_ref, *, nb):
    """nb batch elements: both encoders + attention + head, entirely on-chip."""
    f32 = jnp.float32

    # ---- packed parameters (loaded once per grid step) -----------------------
    wp0 = wn_ref[pl.ds(NR_WP0, C_CLIP), :]          # (C_clip, D)
    wp1 = wn_ref[pl.ds(NR_WP1, C_DINO), :]          # (C_dino, D)
    wv = wn_ref[pl.ds(NR_WV, D_MODEL), :]           # (D, D)
    a_q = wn_ref[pl.ds(NR_A, NUM_HEADS * NQ), :]    # (NH*NQ, D) folded q @ Wk_h^T
    bp0 = wn_ref[pl.ds(NR_VEC + VR_BP0, 1), :]
    gnw0 = wn_ref[pl.ds(NR_VEC + VR_GNW0, 1), :]
    gnb0 = wn_ref[pl.ds(NR_VEC + VR_GNB0, 1), :]
    bp1 = wn_ref[pl.ds(NR_VEC + VR_BP1, 1), :]
    gnw1 = wn_ref[pl.ds(NR_VEC + VR_GNW1, 1), :]
    gnb1 = wn_ref[pl.ds(NR_VEC + VR_GNB1, 1), :]
    bv = wn_ref[pl.ds(NR_VEC + VR_BV, 1), :]
    whead = ww_ref[pl.ds(WR_HEAD, 2 * D_MODEL), :]  # (2D, NC_PAD)
    bhead = ww_ref[pl.ds(WR_BHEAD, 1), :]           # (1, NC_PAD)
    pool = ww_ref[pl.ds(WR_POOL, GA), pl.ds(0, FHW)]  # (GA, FHW)

    def project_norm_pool(x, wp, bp, gnw, gnb):
        # 1x1 conv == per-pixel channel matmul
        y = jnp.dot(x, wp, preferred_element_type=f32) + bp            # (FHW, D)
        # GroupNorm(num_groups=1): two-pass stats over the whole sample
        inv_n = 1.0 / float(FHW * D_MODEL)
        mu = jnp.sum(y) * inv_n
        yc = y - mu
        var = jnp.sum(yc * yc) * inv_n
        inv_std = jax.lax.rsqrt(var + EPS)
        scale = gnw * inv_std                                          # (1, D)
        shift = gnb - mu * scale
        # adaptive_avg_pool2d == row-stochastic (GA, FHW) matmul; the GN affine
        # is deferred to the pooled (GA, D) tensor (valid: pool rows sum to 1).
        pooled = jnp.dot(pool, y, preferred_element_type=f32)          # (GA, D)
        return pooled * scale + shift

    rows = []
    for i in range(nb):
        p0 = project_norm_pool(clip_ref[i], wp0, bp0, gnw0, gnb0)      # (GA, D)
        p1 = project_norm_pool(dino_ref[i], wp1, bp1, gnw1, gnb1)      # (GA, D)
        pooled2 = jnp.concatenate([p0, p1], axis=0)                    # (2*GA, D)

        # shared-weight attention over both encoders at once.
        v = jnp.dot(pooled2, wv, preferred_element_type=f32) + bv      # (2*GA, D)
        # scores for ALL heads in one MXU push:
        #   rows = (head, query) pairs, lanes = keys of both encoders.
        sc = jnp.einsum('qd,kd->qk', a_q, pooled2,
                        preferred_element_type=f32)                    # (NH*NQ, 2*GA)

        m_parts = []
        for e in range(NUM_ENC):
            blk = sc[:, e * GA:(e + 1) * GA]                           # (NH*NQ, GA)
            blk = blk - jnp.max(blk, axis=-1, keepdims=True)
            ex = jnp.exp(blk)
            pr = ex / jnp.sum(ex, axis=-1, keepdims=True)              # exact softmax
            v_e = v[e * GA:(e + 1) * GA, :]                            # (GA, D)
            for h in range(NUM_HEADS):
                # Only the query-mean reaches the classifier and everything
                # after the attention-weighted sum is affine, so average the
                # probabilities over queries first (exact).
                pbar = jnp.mean(pr[h * NQ:(h + 1) * NQ, :],
                                axis=0, keepdims=True)                 # (1, GA)
                m_parts.append(jnp.dot(pbar, v_e[:, h * DH:(h + 1) * DH],
                                       preferred_element_type=f32))    # (1, DH)
        m_cat = jnp.concatenate(m_parts, axis=-1)                      # (1, 2*D)

        # folded out_proj -> final_proj -> classifier (one matmul, 128 lanes).
        rows.append(jnp.dot(m_cat, whead, preferred_element_type=f32) + bhead)

    out_ref[...] = jnp.concatenate(rows, axis=0).reshape(out_ref.shape)


# ------------------------------ host-side helpers -----------------------------
def nchw_to_blc(f):
    b, c, h, w = f.shape
    return jnp.transpose(f, (0, 2, 3, 1)).reshape(b, h * w, c)


def make_pool_matrix(h, w, g):
    """(g*g, h*w) averaging matrix == adaptive_avg_pool2d for h, w % g == 0."""
    # TODO(synk): only exact when H and W are divisible by grid_size.
    kh, kw = h // g, w // g
    P = np.zeros((g * g, h * w), dtype=np.float32)
    for i in range(g):
        for j in range(g):
            for di in range(kh):
                for dj in range(kw):
                    P[i * g + j, (i * kh + di) * w + (j * kw + dj)] = 1.0 / (kh * kw)
    return jnp.asarray(P)


def pack_params(prm, pool_mat):
    """One-time, input-independent host repacking (exact algebraic refactor)."""
    d = D_MODEL
    f32 = jnp.float32

    # learned-query path is input-independent: fold queries @ Wq + bq, pre-scale
    # by 1/sqrt(head_dim) and fold with the per-head K weights into score
    # weights A_h = q_h @ Wk_h^T.  (K bias is constant along the key axis for a
    # given query, so it cancels exactly in softmax and is dropped.)
    q_scaled = (prm["queries"] @ prm["wq"] + prm["bq"]) * (1.0 / math.sqrt(DH))
    a_all = jnp.concatenate(
        [q_scaled[:, h * DH:(h + 1) * DH] @ prm["wk"][:, h * DH:(h + 1) * DH].T
         for h in range(NUM_HEADS)], axis=0)                           # (NH*NQ, D)

    # out_proj -> final_proj -> classifier are affine and applied after the
    # query mean -> fold into one (2D, NC_PAD) matrix + (1, NC_PAD) bias.
    wf_a, wf_b = prm["wf"][:d], prm["wf"][d:]
    wc_pad = jnp.zeros((d, NC_PAD), f32).at[:, :NUM_CLASSES].set(prm["wc"])
    bc_pad = jnp.zeros((1, NC_PAD), f32).at[:, :NUM_CLASSES].set(prm["bc"])
    whead = jnp.concatenate([prm["wo"] @ wf_a @ wc_pad,
                             prm["wo"] @ wf_b @ wc_pad], axis=0)       # (2D, NC_PAD)
    bhead = (prm["bo"] @ (wf_a + wf_b) + prm["bf"]) @ wc_pad + bc_pad  # (1, NC_PAD)

    wn = jnp.zeros((NR_TOTAL, d), f32)
    wn = wn.at[NR_WP0:NR_WP0 + C_CLIP].set(prm["wp0"])
    wn = wn.at[NR_WP1:NR_WP1 + C_DINO].set(prm["wp1"])
    wn = wn.at[NR_WV:NR_WV + d].set(prm["wv"])
    wn = wn.at[NR_A:NR_A + NUM_HEADS * NQ].set(a_all)
    vecs = jnp.concatenate([prm["bp0"], prm["gnw0"], prm["gnb0"],
                            prm["bp1"], prm["gnw1"], prm["gnb1"],
                            prm["bv"]], axis=0)                        # (7, D)
    wn = wn.at[NR_VEC:NR_VEC + 7].set(vecs)

    ww = jnp.zeros((WR_TOTAL, NC_PAD), f32)
    ww = ww.at[WR_HEAD:WR_HEAD + 2 * d].set(whead)
    ww = ww.at[WR_BHEAD:WR_BHEAD + 1].set(bhead)
    ww = ww.at[WR_POOL:WR_POOL + GA, :FHW].set(pool_mat)
    return wn, ww


def pick_batch_per_step(batch):
    """v7x (2 TensorCores/chip): keep a parallel batch grid. v5e/v6e (1 TC):
    fold the whole batch into one grid step to kill per-step overhead."""
    try:
        kind = jax.devices()[0].device_kind.lower()
    except Exception:
        kind = ""
    multi_tc = ("v7" in kind) or ("7x" in kind)
    bps = 1 if multi_tc else batch
    return bps if batch % bps == 0 else 1


# ------------------------------ forward wrapper --------------------------------
@functools.partial(jax.jit, static_argnames=("batch_per_step",))
def sva_model_forward(clip_feat, dino_feat, wn, ww, *, batch_per_step=1):
    clip_blc = nchw_to_blc(clip_feat)                 # (B, FHW, C_clip)
    dino_blc = nchw_to_blc(dino_feat)                 # (B, FHW, C_dino)
    Bn = clip_blc.shape[0]
    nb = batch_per_step
    assert Bn % nb == 0
    nsteps = Bn // nb

    kernel = functools.partial(_sva_fused_kernel, nb=nb)
    out = pl.pallas_call(
        kernel,
        out_shape=jax.ShapeDtypeStruct((nsteps, nb, NC_PAD), jnp.float32),
        grid_spec=pltpu.PrefetchScalarGridSpec(
            num_scalar_prefetch=0,
            grid=(nsteps,),
            in_specs=[
                pl.BlockSpec((nb, FHW, C_CLIP), lambda g: (g, 0, 0)),
                pl.BlockSpec((nb, FHW, C_DINO), lambda g: (g, 0, 0)),
                pl.BlockSpec((NR_TOTAL, D_MODEL), lambda g: (0, 0)),
                pl.BlockSpec((WR_TOTAL, NC_PAD), lambda g: (0, 0)),
            ],
            out_specs=pl.BlockSpec((1, nb, NC_PAD), lambda g: (g, 0, 0)),
        ),
        compiler_params=pltpu.CompilerParams(
            dimension_semantics=("parallel",)),
    )(clip_blc, dino_blc, wn, ww)
    return out.reshape(Bn, NC_PAD)[:, :NUM_CLASSES]   # (B, num_classes)


# ------------------------------ pure-JAX reference -----------------------------
@jax.jit
def reference_forward(clip_feat, dino_feat, prm, pool_mat):
    outs = []
    for i, f in enumerate((clip_feat, dino_feat)):
        x = nchw_to_blc(f)
        y = x @ prm[f"wp{i}"] + prm[f"bp{i}"]
        mu = jnp.mean(y, axis=(1, 2), keepdims=True)
        var = jnp.mean((y - mu) ** 2, axis=(1, 2), keepdims=True)
        y = (y - mu) / jnp.sqrt(var + EPS) * prm[f"gnw{i}"] + prm[f"gnb{i}"]
        pooled = jnp.einsum("gh,bhd->bgd", pool_mat, y)
        q = prm["queries"] @ prm["wq"] + prm["bq"]
        k = pooled @ prm["wk"] + prm["bk"]
        v = pooled @ prm["wv"] + prm["bv"]
        qh = q.reshape(NQ, NUM_HEADS, DH)
        kh = k.reshape(-1, GA, NUM_HEADS, DH)
        vh = v.reshape(-1, GA, NUM_HEADS, DH)
        sc = jnp.einsum("qnd,bknd->bnqk", qh, kh) / math.sqrt(DH)
        p = jax.nn.softmax(sc, axis=-1)
        ctx = jnp.einsum("bnqk,bknd->bqnd", p, vh).reshape(-1, NQ, D_MODEL)
        outs.append(ctx @ prm["wo"] + prm["bo"])
    agg = jnp.concatenate(outs, axis=-1)
    x = agg @ prm["wf"] + prm["bf"]
    return x.mean(axis=1) @ prm["wc"] + prm["bc"]


# ------------------------------ params ------------------------------------------
def init_params(key):
    ks = jax.random.split(key, 20)
    n = lambda k, shape, s=0.05: (s * jax.random.normal(k, shape)).astype(jnp.float32)
    return {
        # 1x1 conv weights stored as (Cin, d) + GroupNorm affine
        "wp0": n(ks[0], (C_CLIP, D_MODEL)), "bp0": n(ks[1], (1, D_MODEL)),
        "gnw0": 1.0 + n(ks[2], (1, D_MODEL)), "gnb0": n(ks[3], (1, D_MODEL)),
        "wp1": n(ks[4], (C_DINO, D_MODEL)), "bp1": n(ks[5], (1, D_MODEL)),
        "gnw1": 1.0 + n(ks[6], (1, D_MODEL)), "gnb1": n(ks[7], (1, D_MODEL)),
        # learned queries + MHA (in-proj split into q/k/v, weights pre-transposed)
        "queries": n(ks[8], (NQ, D_MODEL), 1.0),
        "wq": n(ks[9], (D_MODEL, D_MODEL)), "bq": n(ks[10], (1, D_MODEL)),
        "wk": n(ks[11], (D_MODEL, D_MODEL)), "bk": n(ks[12], (1, D_MODEL)),
        "wv": n(ks[13], (D_MODEL, D_MODEL)), "bv": n(ks[14], (1, D_MODEL)),
        "wo": n(ks[15], (D_MODEL, D_MODEL)), "bo": n(ks[16], (1, D_MODEL)),
        # final_proj (2d -> d) and classifier (d -> num_classes)
        "wf": n(ks[17], (2 * D_MODEL, D_MODEL)), "bf": jnp.zeros((1, D_MODEL), jnp.float32),
        "wc": n(ks[18], (D_MODEL, NUM_CLASSES)), "bc": n(ks[19], (1, NUM_CLASSES)),
    }


# ------------------------------ main ---------------------------------------------
if __name__ == "__main__":
    key = jax.random.PRNGKey(0)
    k1, k2, kp = jax.random.split(key, 3)
    clip_feat = jax.random.normal(k1, (B, C_CLIP, FH, FW), dtype=jnp.float32)
    dino_feat = jax.random.normal(k2, (B, C_DINO, FH, FW), dtype=jnp.float32)
    prm = init_params(kp)
    pool_mat = make_pool_matrix(FH, FW, GRID)
    wn, ww = pack_params(prm, pool_mat)            # one-time param repack (not per-call)

    bps = pick_batch_per_step(B)
    logits = sva_model_forward(clip_feat, dino_feat, wn, ww, batch_per_step=bps)
    logits = jax.block_until_ready(logits)

    ref = jax.block_until_ready(reference_forward(clip_feat, dino_feat, prm, pool_mat))
    np.testing.assert_allclose(np.asarray(logits), np.asarray(ref), rtol=2e-3, atol=2e-3)
    assert logits.shape == (B, NUM_CLASSES)
    print("KERNEL_OK")
</pallas_src>

<mosaic_0001>
module attributes {stable_mosaic.version = 11 : i64} {
  func.func @_sva_fused_kernel(%arg0: i32, %arg1: memref<2x64x48xf32, #tpu.memory_space<vmem>>, %arg2: memref<2x64x40xf32, #tpu.memory_space<vmem>>, %arg3: memref<192x32xf32, #tpu.memory_space<vmem>>, %arg4: memref<88x128xf32, #tpu.memory_space<vmem>>, %arg5: memref<1x2x128xf32, #tpu.memory_space<vmem>>) attributes {dimension_semantics = [#tpu.dimension_semantics<parallel>], iteration_bounds = array<i64: 1>, scalar_prefetch = 0 : i64, scratch_operands = 0 : i64, tpu.core_type = #tpu.core_type<tc>, window_params = [{transform_indices = @transform_0, window_bounds = array<i64: 2, 64, 48>}, {transform_indices = @transform_1, window_bounds = array<i64: 2, 64, 40>}, {pipeline_mode = #tpu.pipeline_mode<synchronous>, transform_indices = @transform_2, window_bounds = array<i64: 192, 32>}, {pipeline_mode = #tpu.pipeline_mode<synchronous>, transform_indices = @transform_3, window_bounds = array<i64: 88, 128>}, {transform_indices = @transform_4, window_bounds = array<i64: 1, 2, 128>}]} {
    %c0 = arith.constant 0 : index
    %c0_0 = arith.constant 0 : index
    %0 = vector.load %arg3[%c0, %c0_0] : memref<192x32xf32, #tpu.memory_space<vmem>>, vector<48x32xf32>
    %c48 = arith.constant 48 : index
    %c0_1 = arith.constant 0 : index
    %1 = vector.load %arg3[%c48, %c0_1] : memref<192x32xf32, #tpu.memory_space<vmem>>, vector<40x32xf32>
    %c88 = arith.constant 88 : index
    %c0_2 = arith.constant 0 : index
    %2 = vector.load %arg3[%c88, %c0_2] : memref<192x32xf32, #tpu.memory_space<vmem>>, vector<32x32xf32>
    %c120 = arith.constant 120 : index
    %c0_3 = arith.constant 0 : index
    %3 = vector.load %arg3[%c120, %c0_3] : memref<192x32xf32, #tpu.memory_space<vmem>>, vector<64x32xf32>
    %c184 = arith.constant 184 : index
    %c0_4 = arith.constant 0 : index
    %4 = vector.load %arg3[%c184, %c0_4] : memref<192x32xf32, #tpu.memory_space<vmem>>, vector<1x32xf32>
    %c185 = arith.constant 185 : index
    %c0_5 = arith.constant 0 : index
    %5 = vector.load %arg3[%c185, %c0_5] : memref<192x32xf32, #tpu.memory_space<vmem>>, vector<1x32xf32>
    %c186 = arith.constant 186 : index
    %c0_6 = arith.constant 0 : index
    %6 = vector.load %arg3[%c186, %c0_6] : memref<192x32xf32, #tpu.memory_space<vmem>>, vector<1x32xf32>
    %c187 = arith.constant 187 : index
    %c0_7 = arith.constant 0 : index
    %7 = vector.load %arg3[%c187, %c0_7] : memref<192x32xf32, #tpu.memory_space<vmem>>, vector<1x32xf32>
    %c188 = arith.constant 188 : index
    %c0_8 = arith.constant 0 : index
    %8 = vector.load %arg3[%c188, %c0_8] : memref<192x32xf32, #tpu.memory_space<vmem>>, vector<1x32xf32>
    %c189 = arith.constant 189 : index
    %c0_9 = arith.constant 0 : index
    %9 = vector.load %arg3[%c189, %c0_9] : memref<192x32xf32, #tpu.memory_space<vmem>>, vector<1x32xf32>
    %c190 = arith.constant 190 : index
    %c0_10 = arith.constant 0 : index
    %10 = vector.load %arg3[%c190, %c0_10] : memref<192x32xf32, #tpu.memory_space<vmem>>, vector<1x32xf32>
    %c0_11 = arith.constant 0 : index
    %c0_12 = arith.constant 0 : index
    %11 = vector.load %arg4[%c0_11, %c0_12] : memref<88x128xf32, #tpu.memory_space<vmem>>, vector<64x128xf32>
    %c64 = arith.constant 64 : index
    %c0_13 = arith.constant 0 : index
    %12 = vector.load %arg4[%c64, %c0_13] : memref<88x128xf32, #tpu.memory_space<vmem>>, vector<1x128xf32>
    %c72 = arith.constant 72 : index
    %c0_14 = arith.constant 0 : index
    %13 = vector.load %arg4[%c72, %c0_14] : memref<88x128xf32, #tpu.memory_space<vmem>>, vector<16x64xf32>
    %c0_15 = arith.constant 0 : index
    %c0_16 = arith.constant 0 : index
    %c0_17 = arith.constant 0 : index
    %14 = vector.load %arg1[%c0_15, %c0_16, %c0_17] : memref<2x64x48xf32, #tpu.memory_space<vmem>>, vector<1x64x48xf32>
    %15 = vector.shape_cast %14 : vector<1x64x48xf32> to vector<64x48xf32>
    %cst = arith.constant dense<0.000000e+00> : vector<64x32xf32>
    %16 = tpu.matmul %15, %0, %cst {dimension_numbers = #tpu.dot_dimension_numbers<[1], [0], [0], [1], [0, 0, 1, 1], [], []>} : vector<64x48xf32>, vector<48x32xf32>, vector<64x32xf32> -> vector<64x32xf32>
    %17 = vector.broadcast %4 : vector<1x32xf32> to vector<64x32xf32>
    %18 = arith.addf %16, %17 : vector<64x32xf32>
    %19 = vector.shape_cast %18 : vector<64x32xf32> to vector<1x64x32xf32>
    %cst_18 = arith.constant dense<0.000000e+00> : vector<1xf32>
    %20 = vector.multi_reduction <add>, %19, %cst_18 [1, 2] : vector<1x64x32xf32> to vector<1xf32>
    %21 = vector.shape_cast %20 : vector<1xf32> to vector<1x1x1xf32>
    %22 = vector.extract %21[0, 0, 0] : f32 from vector<1x1x1xf32>
    %cst_19 = arith.constant 4.8828125E-4 : f32
    %23 = arith.mulf %22, %cst_19 : f32
    %24 = vector.broadcast %23 : f32 to vector<64x32xf32>
    %25 = arith.subf %18, %24 : vector<64x32xf32>
    %26 = arith.mulf %25, %25 : vector<64x32xf32>
    %27 = vector.shape_cast %26 : vector<64x32xf32> to vector<1x64x32xf32>
    %cst_20 = arith.constant dense<0.000000e+00> : vector<1xf32>
    %28 = vector.multi_reduction <add>, %27, %cst_20 [1, 2] : vector<1x64x32xf32> to vector<1xf32>
    %29 = vector.shape_cast %28 : vector<1xf32> to vector<1x1x1xf32>
    %30 = vector.extract %29[0, 0, 0] : f32 from vector<1x1x1xf32>
    %cst_21 = arith.constant 4.8828125E-4 : f32
    %31 = arith.mulf %30, %cst_21 : f32
    %cst_22 = arith.constant 9.99999974E-6 : f32
    %32 = arith.addf %31, %cst_22 : f32
    %33 = math.rsqrt %32 : f32
    %34 = vector.broadcast %33 : f32 to vector<1x32xf32>
    %35 = arith.mulf %5, %34 : vector<1x32xf32>
    %36 = vector.broadcast %23 : f32 to vector<1x32xf32>
    %37 = arith.mulf %36, %35 : vector<1x32xf32>
    %38 = arith.subf %6, %37 : vector<1x32xf32>
    %cst_23 = arith.constant dense<0.000000e+00> : vector<16x32xf32>
    %39 = tpu.matmul %13, %18, %cst_23 {dimension_numbers = #tpu.dot_dimension_numbers<[1], [0], [0], [1], [0, 0, 1, 1], [], []>} : vector<16x64xf32>, vector<64x32xf32>, vector<16x32xf32> -> vector<16x32xf32>
    %40 = vector.broadcast %35 : vector<1x32xf32> to vector<16x32xf32>
    %41 = arith.mulf %39, %40 : vector<16x32xf32>
    %42 = vector.broadcast %38 : vector<1x32xf32> to vector<16x32xf32>
    %43 = arith.addf %41, %42 : vector<16x32xf32>
    %c0_24 = arith.constant 0 : index
    %c0_25 = arith.constant 0 : index
    %c0_26 = arith.constant 0 : index
    %44 = vector.load %arg2[%c0_24, %c0_25, %c0_26] : memref<2x64x40xf32, #tpu.memory_space<vmem>>, vector<1x64x40xf32>
    %45 = vector.shape_cast %44 : vector<1x64x40xf32> to vector<64x40xf32>
    %cst_27 = arith.constant dense<0.000000e+00> : vector<64x32xf32>
    %46 = tpu.matmul %45, %1, %cst_27 {dimension_numbers = #tpu.dot_dimension_numbers<[1], [0], [0], [1], [0, 0, 1, 1], [], []>} : vector<64x40xf32>, vector<40x32xf32>, vector<64x32xf32> -> vector<64x32xf32>
    %47 = vector.broadcast %7 : vector<1x32xf32> to vector<64x32xf32>
    %48 = arith.addf %46, %47 : vector<64x32xf32>
    %49 = vector.shape_cast %48 : vector<64x32xf32> to vector<1x64x32xf32>
    %cst_28 = arith.constant dense<0.000000e+00> : vector<1xf32>
    %50 = vector.multi_reduction <add>, %49, %cst_28 [1, 2] : vector<1x64x32xf32> to vector<1xf32>
    %51 = vector.shape_cast %50 : vector<1xf32> to vector<1x1x1xf32>
    %52 = vector.extract %51[0, 0, 0] : f32 from vector<1x1x1xf32>
    %cst_29 = arith.constant 4.8828125E-4 : f32
    %53 = arith.mulf %52, %cst_29 : f32
    %54 = vector.broadcast %53 : f32 to vector<64x32xf32>
    %55 = arith.subf %48, %54 : vector<64x32xf32>
    %56 = arith.mulf %55, %55 : vector<64x32xf32>
    %57 = vector.shape_cast %56 : vector<64x32xf32> to vector<1x64x32xf32>
    %cst_30 = arith.constant dense<0.000000e+00> : vector<1xf32>
    %58 = vector.multi_reduction <add>, %57, %cst_30 [1, 2] : vector<1x64x32xf32> to vector<1xf32>
    %59 = vector.shape_cast %58 : vector<1xf32> to vector<1x1x1xf32>
    %60 = vector.extract %59[0, 0, 0] : f32 from vector<1x1x1xf32>
    %cst_31 = arith.constant 4.8828125E-4 : f32
    %61 = arith.mulf %60, %cst_31 : f32
    %cst_32 = arith.constant 9.99999974E-6 : f32
    %62 = arith.addf %61, %cst_32 : f32
    %63 = math.rsqrt %62 : f32
    %64 = vector.broadcast %63 : f32 to vector<1x32xf32>
    %65 = arith.mulf %8, %64 : vector<1x32xf32>
    %66 = vector.broadcast %53 : f32 to vector<1x32xf32>
    %67 = arith.mulf %66, %65 : vector<1x32xf32>
    %68 = arith.subf %9, %67 : vector<1x32xf32>
    %cst_33 = arith.constant dense<0.000000e+00> : vector<16x32xf32>
    %69 = tpu.matmul %13, %48, %cst_33 {dimension_numbers = #tpu.dot_dimension_numbers<[1], [0], [0], [1], [0, 0, 1, 1], [], []>} : vector<16x64xf32>, vector<64x32xf32>, vector<16x32xf32> -> vector<16x32xf32>
    %70 = vector.broadcast %65 : vector<1x32xf32> to vector<16x32xf32>
    %71 = arith.mulf %69, %70 : vector<16x32xf32>
    %72 = vector.broadcast %68 : vector<1x32xf32> to vector<16x32xf32>
    %73 = arith.addf %71, %72 : vector<16x32xf32>
    %74 = tpu.concatenate %43, %73 in 0 : vector<16x32xf32>, vector<16x32xf32> -> vector<32x32xf32>
    %cst_34 = arith.constant dense<0.000000e+00> : vector<32x32xf32>
    %75 = tpu.matmul %74, %2, %cst_34 {dimension_numbers = #tpu.dot_dimension_numbers<[1], [0], [0], [1], [0, 0, 1, 1], [], []>} : vector<32x32xf32>, vector<32x32xf32>, vector<32x32xf32> -> vector<32x32xf32>
    %76 = vector.broadcast %10 : vector<1x32xf32> to vector<32x32xf32>
    %77 = arith.addf %75, %76 : vector<32x32xf32>
    "tpu.trace_start"() <{level = 10 : i32, message = "qd,kd->qk"}> : () -> ()
    %cst_35 = arith.constant dense<0.000000e+00> : vector<64x32xf32>
    %78 = tpu.matmul %3, %74, %cst_35 {dimension_numbers = #tpu.dot_dimension_numbers<[1], [1], [0], [0], [0, 0, 1, 0], [], []>} : vector<64x32xf32>, vector<32x32xf32>, vector<64x32xf32> -> vector<64x32xf32>
    "tpu.trace_stop"() : () -> ()
    %79 = vector.extract_strided_slice %78 {offsets = [0, 0], sizes = [64, 16], strides = [1, 1]} : vector<64x32xf32> to vector<64x16xf32>
    %cst_36 = arith.constant dense<0xFF800000> : vector<64xf32>
    %80 = vector.multi_reduction <maximumf>, %79, %cst_36 [1] : vector<64x16xf32> to vector<64xf32>
    %81 = vector.shape_cast %80 : vector<64xf32> to vector<64x1xf32>
    %82 = vector.broadcast %81 : vector<64x1xf32> to vector<64x16xf32>
    %83 = arith.subf %79, %82 : vector<64x16xf32>
    %84 = math.exp %83 : vector<64x16xf32>
    %cst_37 = arith.constant dense<0.000000e+00> : vector<64xf32>
    %85 = vector.multi_reduction <add>, %84, %cst_37 [1] : vector<64x16xf32> to vector<64xf32>
    %86 = vector.shape_cast %85 : vector<64xf32> to vector<64x1xf32>
    %87 = vector.broadcast %86 : vector<64x1xf32> to vector<64x16xf32>
    %88 = arith.divf %84, %87 : vector<64x16xf32>
    %89 = vector.extract_strided_slice %77 {offsets = [0, 0], sizes = [16, 32], strides = [1, 1]} : vector<32x32xf32> to vector<16x32xf32>
    %90 = vector.extract_strided_slice %88 {offsets = [0, 0], sizes = [16, 16], strides = [1, 1]} : vector<64x16xf32> to vector<16x16xf32>
    %cst_38 = arith.constant dense<0.000000e+00> : vector<16xf32>
    %91 = vector.multi_reduction <add>, %90, %cst_38 [0] : vector<16x16xf32> to vector<16xf32>
    %92 = vector.shape_cast %91 : vector<16xf32> to vector<1x16xf32>
    %cst_39 = arith.constant 1.600000e+01 : f32
    %93 = vector.broadcast %cst_39 : f32 to vector<1x16xf32>
    %94 = arith.divf %92, %93 : vector<1x16xf32>
    %95 = vector.extract_strided_slice %89 {offsets = [0, 0], sizes = [16, 8], strides = [1, 1]} : vector<16x32xf32> to vector<16x8xf32>
    %cst_40 = arith.constant dense<0.000000e+00> : vector<1x8xf32>
    %96 = tpu.matmul %94, %95, %cst_40 {dimension_numbers = #tpu.dot_dimension_numbers<[1], [0], [0], [1], [0, 0, 1, 1], [], []>} : vector<1x16xf32>, vector<16x8xf32>, vector<1x8xf32> -> vector<1x8xf32>
    %97 = vector.extract_strided_slice %88 {offsets = [16, 0], sizes = [16, 16], strides = [1, 1]} : vector<64x16xf32> to vector<16x16xf32>
    %cst_41 = arith.constant dense<0.000000e+00> : vector<16xf32>
    %98 = vector.multi_reduction <add>, %97, %cst_41 [0] : vector<16x16xf32> to vector<16xf32>
    %99 = vector.shape_cast %98 : vector<16xf32> to vector<1x16xf32>
    %cst_42 = arith.constant 1.600000e+01 : f32
    %100 = vector.broadcast %cst_42 : f32 to vector<1x16xf32>
    %101 = arith.divf %99, %100 : vector<1x16xf32>
    %102 = vector.extract_strided_slice %89 {offsets = [0, 8], sizes = [16, 8], strides = [1, 1]} : vector<16x32xf32> to vector<16x8xf32>
    %cst_43 = arith.constant dense<0.000000e+00> : vector<1x8xf32>
    %103 = tpu.matmul %101, %102, %cst_43 {dimension_numbers = #tpu.dot_dimension_numbers<[1], [0], [0], [1], [0, 0, 1, 1], [], []>} : vector<1x16xf32>, vector<16x8xf32>, vector<1x8xf32> -> vector<1x8xf32>
    %104 = vector.extract_strided_slice %88 {offsets = [32, 0], sizes = [16, 16], strides = [1, 1]} : vector<64x16xf32> to vector<16x16xf32>
    %cst_44 = arith.constant dense<0.000000e+00> : vector<16xf32>
    %105 = vector.multi_reduction <add>, %104, %cst_44 [0] : vector<16x16xf32> to vector<16xf32>
    %106 = vector.shape_cast %105 : vector<16xf32> to vector<1x16xf32>
    %cst_45 = arith.constant 1.600000e+01 : f32
    %107 = vector.broadcast %cst_45 : f32 to vector<1x16xf32>
    %108 = arith.divf %106, %107 : vector<1x16xf32>
    %109 = vector.extract_strided_slice %89 {offsets = [0, 16], sizes = [16, 8], strides = [1, 1]} : vector<16x32xf32> to vector<16x8xf32>
    %cst_46 = arith.constant dense<0.000000e+00> : vector<1x8xf32>
    %110 = tpu.matmul %108, %109, %cst_46 {dimension_numbers = #tpu.dot_dimension_numbers<[1], [0], [0], [1], [0, 0, 1, 1], [], []>} : vector<1x16xf32>, vector<16x8xf32>, vector<1x8xf32> -> vector<1x8xf32>
    %111 = vector.extract_strided_slice %88 {offsets = [48, 0], sizes = [16, 16], strides = [1, 1]} : vector<64x16xf32> to vector<16x16xf32>
    %cst_47 = arith.constant dense<0.000000e+00> : vector<16xf32>
    %112 = vector.multi_reduction <add>, %111, %cst_47 [0] : vector<16x16xf32> to vector<16xf32>
    %113 = vector.shape_cast %112 : vector<16xf32> to vector<1x16xf32>
    %cst_48 = arith.constant 1.600000e+01 : f32
    %114 = vector.broadcast %cst_48 : f32 to vector<1x16xf32>
    %115 = arith.divf %113, %114 : vector<1x16xf32>
    %116 = vector.extract_strided_slice %89 {offsets = [0, 24], sizes = [16, 8], strides = [1, 1]} : vector<16x32xf32> to vector<16x8xf32>
    %cst_49 = arith.constant dense<0.000000e+00> : vector<1x8xf32>
    %117 = tpu.matmul %115, %116, %cst_49 {dimension_numbers = #tpu.dot_dimension_numbers<[1], [0], [0], [1], [0, 0, 1, 1], [], []>} : vector<1x16xf32>, vector<16x8xf32>, vector<1x8xf32> -> vector<1x8xf32>
    %118 = vector.extract_strided_slice %78 {offsets = [0, 16], sizes = [64, 16], strides = [1, 1]} : vector<64x32xf32> to vector<64x16xf32>
    %cst_50 = arith.constant dense<0xFF800000> : vector<64xf32>
    %119 = vector.multi_reduction <maximumf>, %118, %cst_50 [1] : vector<64x16xf32> to vector<64xf32>
    %120 = vector.shape_cast %119 : vector<64xf32> to vector<64x1xf32>
    %121 = vector.broadcast %120 : vector<64x1xf32> to vector<64x16xf32>
    %122 = arith.subf %118, %121 : vector<64x16xf32>
    %123 = math.exp %122 : vector<64x16xf32>
    %cst_51 = arith.constant dense<0.000000e+00> : vector<64xf32>
    %124 = vector.multi_reduction <add>, %123, %cst_51 [1] : vector<64x16xf32> to vector<64xf32>
    %125 = vector.shape_cast %124 : vector<64xf32> to vector<64x1xf32>
    %126 = vector.broadcast %125 : vector<64x1xf32> to vector<64x16xf32>
    %127 = arith.divf %123, %126 : vector<64x16xf32>
    %128 = vector.extract_strided_slice %77 {offsets = [16, 0], sizes = [16, 32], strides = [1, 1]} : vector<32x32xf32> to vector<16x32xf32>
    %129 = vector.extract_strided_slice %127 {offsets = [0, 0], sizes = [16, 16], strides = [1, 1]} : vector<64x16xf32> to vector<16x16xf32>
    %cst_52 = arith.constant dense<0.000000e+00> : vector<16xf32>
    %130 = vector.multi_reduction <add>, %129, %cst_52 [0] : vector<16x16xf32> to vector<16xf32>
    %131 = vector.shape_cast %130 : vector<16xf32> to vector<1x16xf32>
    %cst_53 = arith.constant 1.600000e+01 : f32
    %132 = vector.broadcast %cst_53 : f32 to vector<1x16xf32>
    %133 = arith.divf %131, %132 : vector<1x16xf32>
    %134 = vector.extract_strided_slice %128 {offsets = [0, 0], sizes = [16, 8], strides = [1, 1]} : vector<16x32xf32> to vector<16x8xf32>
    %cst_54 = arith.constant dense<0.000000e+00> : vector<1x8xf32>
    %135 = tpu.matmul %133, %134, %cst_54 {dimension_numbers = #tpu.dot_dimension_numbers<[1], [0], [0], [1], [0, 0, 1, 1], [], []>} : vector<1x16xf32>, vector<16x8xf32>, vector<1x8xf32> -> vector<1x8xf32>
    %136 = vector.extract_strided_slice %127 {offsets = [16, 0], sizes = [16, 16], strides = [1, 1]} : vector<64x16xf32> to vector<16x16xf32>
    %cst_55 = arith.constant dense<0.000000e+00> : vector<16xf32>
    %137 = vector.multi_reduction <add>, %136, %cst_55 [0] : vector<16x16xf32> to vector<16xf32>
    %138 = vector.shape_cast %137 : vector<16xf32> to vector<1x16xf32>
    %cst_56 = arith.constant 1.600000e+01 : f32
    %139 = vector.broadcast %cst_56 : f32 to vector<1x16xf32>
    %140 = arith.divf %138, %139 : vector<1x16xf32>
    %141 = vector.extract_strided_slice %128 {offsets = [0, 8], sizes = [16, 8], strides = [1, 1]} : vector<16x32xf32> to vector<16x8xf32>
    %cst_57 = arith.constant dense<0.000000e+00> : vector<1x8xf32>
    %142 = tpu.matmul %140, %141, %cst_57 {dimension_numbers = #tpu.dot_dimension_numbers<[1], [0], [0], [1], [0, 0, 1, 1], [], []>} : vector<1x16xf32>, vector<16x8xf32>, vector<1x8xf32> -> vector<1x8xf32>
    %143 = vector.extract_strided_slice %127 {offsets = [32, 0], sizes = [16, 16], strides = [1, 1]} : vector<64x16xf32> to vector<16x16xf32>
    %cst_58 = arith.constant dense<0.000000e+00> : vector<16xf32>
    %144 = vector.multi_reduction <add>, %143, %cst_58 [0] : vector<16x16xf32> to vector<16xf32>
    %145 = vector.shape_cast %144 : vector<16xf32> to vector<1x16xf32>
    %cst_59 = arith.constant 1.600000e+01 : f32
    %146 = vector.broadcast %cst_59 : f32 to vector<1x16xf32>
    %147 = arith.divf %145, %146 : vector<1x16xf32>
    %148 = vector.extract_strided_slice %128 {offsets = [0, 16], sizes = [16, 8], strides = [1, 1]} : vector<16x32xf32> to vector<16x8xf32>
    %cst_60 = arith.constant dense<0.000000e+00> : vector<1x8xf32>
    %149 = tpu.matmul %147, %148, %cst_60 {dimension_numbers = #tpu.dot_dimension_numbers<[1], [0], [0], [1], [0, 0, 1, 1], [], []>} : vector<1x16xf32>, vector<16x8xf32>, vector<1x8xf32> -> vector<1x8xf32>
    %150 = vector.extract_strided_slice %127 {offsets = [48, 0], sizes = [16, 16], strides = [1, 1]} : vector<64x16xf32> to vector<16x16xf32>
    %cst_61 = arith.constant dense<0.000000e+00> : vector<16xf32>
    %151 = vector.multi_reduction <add>, %150, %cst_61 [0] : vector<16x16xf32> to vector<16xf32>
    %152 = vector.shape_cast %151 : vector<16xf32> to vector<1x16xf32>
    %cst_62 = arith.constant 1.600000e+01 : f32
    %153 = vector.broadcast %cst_62 : f32 to vector<1x16xf32>
    %154 = arith.divf %152, %153 : vector<1x16xf32>
    %155 = vector.extract_strided_slice %128 {offsets = [0, 24], sizes = [16, 8], strides = [1, 1]} : vector<16x32xf32> to vector<16x8xf32>
    %cst_63 = arith.constant dense<0.000000e+00> : vector<1x8xf32>
    %156 = tpu.matmul %154, %155, %cst_63 {dimension_numbers = #tpu.dot_dimension_numbers<[1], [0], [0], [1], [0, 0, 1, 1], [], []>} : vector<1x16xf32>, vector<16x8xf32>, vector<1x8xf32> -> vector<1x8xf32>
    %157 = tpu.concatenate %96, %103, %110, %117, %135, %142, %149, %156 in 1 : vector<1x8xf32>, vector<1x8xf32>, vector<1x8xf32>, vector<1x8xf32>, vector<1x8xf32>, vector<1x8xf32>, vector<1x8xf32>, vector<1x8xf32> -> vector<1x64xf32>
    %cst_64 = arith.constant dense<0.000000e+00> : vector<1x128xf32>
    %158 = tpu.matmul %157, %11, %cst_64 {dimension_numbers = #tpu.dot_dimension_numbers<[1], [0], [0], [1], [0, 0, 1, 1], [], []>} : vector<1x64xf32>, vector<64x128xf32>, vector<1x128xf32> -> vector<1x128xf32>
    %159 = arith.addf %158, %12 : vector<1x128xf32>
    %c1 = arith.constant 1 : index
    %c0_65 = arith.constant 0 : index
    %c0_66 = arith.constant 0 : index
    %160 = vector.load %arg1[%c1, %c0_65, %c0_66] : memref<2x64x48xf32, #tpu.memory_space<vmem>>, vector<1x64x48xf32>
    %161 = vector.shape_cast %160 : vector<1x64x48xf32> to vector<64x48xf32>
    %cst_67 = arith.constant dense<0.000000e+00> : vector<64x32xf32>
    %162 = tpu.matmul %161, %0, %cst_67 {dimension_numbers = #tpu.dot_dimension_numbers<[1], [0], [0], [1], [0, 0, 1, 1], [], []>} : vector<64x48xf32>, vector<48x32xf32>, vector<64x32xf32> -> vector<64x32xf32>
    %163 = vector.broadcast %4 : vector<1x32xf32> to vector<64x32xf32>
    %164 = arith.addf %162, %163 : vector<64x32xf32>
    %165 = vector.shape_cast %164 : vector<64x32xf32> to vector<1x64x32xf32>
    %cst_68 = arith.constant dense<0.000000e+00> : vector<1xf32>
    %166 = vector.multi_reduction <add>, %165, %cst_68 [1, 2] : vector<1x64x32xf32> to vector<1xf32>
    %167 = vector.shape_cast %166 : vector<1xf32> to vector<1x1x1xf32>
    %168 = vector.extract %167[0, 0, 0] : f32 from vector<1x1x1xf32>
    %cst_69 = arith.constant 4.8828125E-4 : f32
    %169 = arith.mulf %168, %cst_69 : f32
    %170 = vector.broadcast %169 : f32 to vector<64x32xf32>
    %171 = arith.subf %164, %170 : vector<64x32xf32>
    %172 = arith.mulf %171, %171 : vector<64x32xf32>
    %173 = vector.shape_cast %172 : vector<64x32xf32> to vector<1x64x32xf32>
    %cst_70 = arith.constant dense<0.000000e+00> : vector<1xf32>
    %174 = vector.multi_reduction <add>, %173, %cst_70 [1, 2] : vector<1x64x32xf32> to vector<1xf32>
    %175 = vector.shape_cast %174 : vector<1xf32> to vector<1x1x1xf32>
    %176 = vector.extract %175[0, 0, 0] : f32 from vector<1x1x1xf32>
    %cst_71 = arith.constant 4.8828125E-4 : f32
    %177 = arith.mulf %176, %cst_71 : f32
    %cst_72 = arith.constant 9.99999974E-6 : f32
    %178 = arith.addf %177, %cst_72 : f32
    %179 = math.rsqrt %178 : f32
    %180 = vector.broadcast %179 : f32 to vector<1x32xf32>
    %181 = arith.mulf %5, %180 : vector<1x32xf32>
    %182 = vector.broadcast %169 : f32 to vector<1x32xf32>
    %183 = arith.mulf %182, %181 : vector<1x32xf32>
    %184 = arith.subf %6, %183 : vector<1x32xf32>
    %cst_73 = arith.constant dense<0.000000e+00> : vector<16x32xf32>
    %185 = tpu.matmul %13, %164, %cst_73 {dimension_numbers = #tpu.dot_dimension_numbers<[1], [0], [0], [1], [0, 0, 1, 1], [], []>} : vector<16x64xf32>, vector<64x32xf32>, vector<16x32xf32> -> vector<16x32xf32>
    %186 = vector.broadcast %181 : vector<1x32xf32> to vector<16x32xf32>
    %187 = arith.mulf %185, %186 : vector<16x32xf32>
    %188 = vector.broadcast %184 : vector<1x32xf32> to vector<16x32xf32>
    %189 = arith.addf %187, %188 : vector<16x32xf32>
    %c1_74 = arith.constant 1 : index
    %c0_75 = arith.constant 0 : index
    %c0_76 = arith.constant 0 : index
    %190 = vector.load %arg2[%c1_74, %c0_75, %c0_76] : memref<2x64x40xf32, #tpu.memory_space<vmem>>, vector<1x64x40xf32>
    %191 = vector.shape_cast %190 : vector<1x64x40xf32> to vector<64x40xf32>
    %cst_77 = arith.constant dense<0.000000e+00> : vector<64x32xf32>
    %192 = tpu.matmul %191, %1, %cst_77 {dimension_numbers = #tpu.dot_dimension_numbers<[1], [0], [0], [1], [0, 0, 1, 1], [], []>} : vector<64x40xf32>, vector<40x32xf32>, vector<64x32xf32> -> vector<64x32xf32>
    %193 = vector.broadcast %7 : vector<1x32xf32> to vector<64x32xf32>
    %194 = arith.addf %192, %193 : vector<64x32xf32>
    %195 = vector.shape_cast %194 : vector<64x32xf32> to vector<1x64x32xf32>
    %cst_78 = arith.constant dense<0.000000e+00> : vector<1xf32>
    %196 = vector.multi_reduction <add>, %195, %cst_78 [1, 2] : vector<1x64x32xf32> to vector<1xf32>
    %197 = vector.shape_cast %196 : vector<1xf32> to vector<1x1x1xf32>
    %198 = vector.extract %197[0, 0, 0] : f32 from vector<1x1x1xf32>
    %cst_79 = arith.constant 4.8828125E-4 : f32
    %199 = arith.mulf %198, %cst_79 : f32
    %200 = vector.broadcast %199 : f32 to vector<64x32xf32>
    %201 = arith.subf %194, %200 : vector<64x32xf32>
    %202 = arith.mulf %201, %201 : vector<64x32xf32>
    %203 = vector.shape_cast %202 : vector<64x32xf32> to vector<1x64x32xf32>
    %cst_80 = arith.constant dense<0.000000e+00> : vector<1xf32>
    %204 = vector.multi_reduction <add>, %203, %cst_80 [1, 2] : vector<1x64x32xf32> to vector<1xf32>
    %205 = vector.shape_cast %204 : vector<1xf32> to vector<1x1x1xf32>
    %206 = vector.extract %205[0, 0, 0] : f32 from vector<1x1x1xf32>
    %cst_81 = arith.constant 4.8828125E-4 : f32
    %207 = arith.mulf %206, %cst_81 : f32
    %cst_82 = arith.constant 9.99999974E-6 : f32
    %208 = arith.addf %207, %cst_82 : f32
    %209 = math.rsqrt %208 : f32
    %210 = vector.broadcast %209 : f32 to vector<1x32xf32>
    %211 = arith.mulf %8, %210 : vector<1x32xf32>
    %212 = vector.broadcast %199 : f32 to vector<1x32xf32>
    %213 = arith.mulf %212, %211 : vector<1x32xf32>
    %214 = arith.subf %9, %213 : vector<1x32xf32>
    %cst_83 = arith.constant dense<0.000000e+00> : vector<16x32xf32>
    %215 = tpu.matmul %13, %194, %cst_83 {dimension_numbers = #tpu.dot_dimension_numbers<[1], [0], [0], [1], [0, 0, 1, 1], [], []>} : vector<16x64xf32>, vector<64x32xf32>, vector<16x32xf32> -> vector<16x32xf32>
    %216 = vector.broadcast %211 : vector<1x32xf32> to vector<16x32xf32>
    %217 = arith.mulf %215, %216 : vector<16x32xf32>
    %218 = vector.broadcast %214 : vector<1x32xf32> to vector<16x32xf32>
    %219 = arith.addf %217, %218 : vector<16x32xf32>
    %220 = tpu.concatenate %189, %219 in 0 : vector<16x32xf32>, vector<16x32xf32> -> vector<32x32xf32>
    %cst_84 = arith.constant dense<0.000000e+00> : vector<32x32xf32>
    %221 = tpu.matmul %220, %2, %cst_84 {dimension_numbers = #tpu.dot_dimension_numbers<[1], [0], [0], [1], [0, 0, 1, 1], [], []>} : vector<32x32xf32>, vector<32x32xf32>, vector<32x32xf32> -> vector<32x32xf32>
    %222 = vector.broadcast %10 : vector<1x32xf32> to vector<32x32xf32>
    %223 = arith.addf %221, %222 : vector<32x32xf32>
    "tpu.trace_start"() <{level = 10 : i32, message = "qd,kd->qk"}> : () -> ()
    %cst_85 = arith.constant dense<0.000000e+00> : vector<64x32xf32>
    %224 = tpu.matmul %3, %220, %cst_85 {dimension_numbers = #tpu.dot_dimension_numbers<[1], [1], [0], [0], [0, 0, 1, 0], [], []>} : vector<64x32xf32>, vector<32x32xf32>, vector<64x32xf32> -> vector<64x32xf32>
    "tpu.trace_stop"() : () -> ()
    %225 = vector.extract_strided_slice %224 {offsets = [0, 0], sizes = [64, 16], strides = [1, 1]} : vector<64x32xf32> to vector<64x16xf32>
    %cst_86 = arith.constant dense<0xFF800000> : vector<64xf32>
    %226 = vector.multi_reduction <maximumf>, %225, %cst_86 [1] : vector<64x16xf32> to vector<64xf32>
    %227 = vector.shape_cast %226 : vector<64xf32> to vector<64x1xf32>
    %228 = vector.broadcast %227 : vector<64x1xf32> to vector<64x16xf32>
    %229 = arith.subf %225, %228 : vector<64x16xf32>
    %230 = math.exp %229 : vector<64x16xf32>
    %cst_87 = arith.constant dense<0.000000e+00> : vector<64xf32>
    %231 = vector.multi_reduction <add>, %230, %cst_87 [1] : vector<64x16xf32> to vector<64xf32>
    %232 = vector.shape_cast %231 : vector<64xf32> to vector<64x1xf32>
    %233 = vector.broadcast %232 : vector<64x1xf32> to vector<64x16xf32>
    %234 = arith.divf %230, %233 : vector<64x16xf32>
    %235 = vector.extract_strided_slice %223 {offsets = [0, 0], sizes = [16, 32], strides = [1, 1]} : vector<32x32xf32> to vector<16x32xf32>
    %236 = vector.extract_strided_slice %234 {offsets = [0, 0], sizes = [16, 16], strides = [1, 1]} : vector<64x16xf32> to vector<16x16xf32>
    %cst_88 = arith.constant dense<0.000000e+00> : vector<16xf32>
    %237 = vector.multi_reduction <add>, %236, %cst_88 [0] : vector<16x16xf32> to vector<16xf32>
    %238 = vector.shape_cast %237 : vector<16xf32> to vector<1x16xf32>
    %cst_89 = arith.constant 1.600000e+01 : f32
    %239 = vector.broadcast %cst_89 : f32 to vector<1x16xf32>
    %240 = arith.divf %238, %239 : vector<1x16xf32>
    %241 = vector.extract_strided_slice %235 {offsets = [0, 0], sizes = [16, 8], strides = [1, 1]} : vector<16x32xf32> to vector<16x8xf32>
    %cst_90 = arith.constant dense<0.000000e+00> : vector<1x8xf32>
    %242 = tpu.matmul %240, %241, %cst_90 {dimension_numbers = #tpu.dot_dimension_numbers<[1], [0], [0], [1], [0, 0, 1, 1], [], []>} : vector<1x16xf32>, vector<16x8xf32>, vector<1x8xf32> -> vector<1x8xf32>
    %243 = vector.extract_strided_slice %234 {offsets = [16, 0], sizes = [16, 16], strides = [1, 1]} : vector<64x16xf32> to vector<16x16xf32>
    %cst_91 = arith.constant dense<0.000000e+00> : vector<16xf32>
    %244 = vector.multi_reduction <add>, %243, %cst_91 [0] : vector<16x16xf32> to vector<16xf32>
    %245 = vector.shape_cast %244 : vector<16xf32> to vector<1x16xf32>
    %cst_92 = arith.constant 1.600000e+01 : f32
    %246 = vector.broadcast %cst_92 : f32 to vector<1x16xf32>
    %247 = arith.divf %245, %246 : vector<1x16xf32>
    %248 = vector.extract_strided_slice %235 {offsets = [0, 8], sizes = [16, 8], strides = [1, 1]} : vector<16x32xf32> to vector<16x8xf32>
    %cst_93 = arith.constant dense<0.000000e+00> : vector<1x8xf32>
    %249 = tpu.matmul %247, %248, %cst_93 {dimension_numbers = #tpu.dot_dimension_numbers<[1], [0], [0], [1], [0, 0, 1, 1], [], []>} : vector<1x16xf32>, vector<16x8xf32>, vector<1x8xf32> -> vector<1x8xf32>
    %250 = vector.extract_strided_slice %234 {offsets = [32, 0], sizes = [16, 16], strides = [1, 1]} : vector<64x16xf32> to vector<16x16xf32>
    %cst_94 = arith.constant dense<0.000000e+00> : vector<16xf32>
    %251 = vector.multi_reduction <add>, %250, %cst_94 [0] : vector<16x16xf32> to vector<16xf32>
    %252 = vector.shape_cast %251 : vector<16xf32> to vector<1x16xf32>
    %cst_95 = arith.constant 1.600000e+01 : f32
    %253 = vector.broadcast %cst_95 : f32 to vector<1x16xf32>
    %254 = arith.divf %252, %253 : vector<1x16xf32>
    %255 = vector.extract_strided_slice %235 {offsets = [0, 16], sizes = [16, 8], strides = [1, 1]} : vector<16x32xf32> to vector<16x8xf32>
    %cst_96 = arith.constant dense<0.000000e+00> : vector<1x8xf32>
    %256 = tpu.matmul %254, %255, %cst_96 {dimension_numbers = #tpu.dot_dimension_numbers<[1], [0], [0], [1], [0, 0, 1, 1], [], []>} : vector<1x16xf32>, vector<16x8xf32>, vector<1x8xf32> -> vector<1x8xf32>
    %257 = vector.extract_strided_slice %234 {offsets = [48, 0], sizes = [16, 16], strides = [1, 1]} : vector<64x16xf32> to vector<16x16xf32>
    %cst_97 = arith.constant dense<0.000000e+00> : vector<16xf32>
    %258 = vector.multi_reduction <add>, %257, %cst_97 [0] : vector<16x16xf32> to vector<16xf32>
    %259 = vector.shape_cast %258 : vector<16xf32> to vector<1x16xf32>
    %cst_98 = arith.constant 1.600000e+01 : f32
    %260 = vector.broadcast %cst_98 : f32 to vector<1x16xf32>
    %261 = arith.divf %259, %260 : vector<1x16xf32>
    %262 = vector.extract_strided_slice %235 {offsets = [0, 24], sizes = [16, 8], strides = [1, 1]} : vector<16x32xf32> to vector<16x8xf32>
    %cst_99 = arith.constant dense<0.000000e+00> : vector<1x8xf32>
    %263 = tpu.matmul %261, %262, %cst_99 {dimension_numbers = #tpu.dot_dimension_numbers<[1], [0], [0], [1], [0, 0, 1, 1], [], []>} : vector<1x16xf32>, vector<16x8xf32>, vector<1x8xf32> -> vector<1x8xf32>
    %264 = vector.extract_strided_slice %224 {offsets = [0, 16], sizes = [64, 16], strides = [1, 1]} : vector<64x32xf32> to vector<64x16xf32>
    %cst_100 = arith.constant dense<0xFF800000> : vector<64xf32>
    %265 = vector.multi_reduction <maximumf>, %264, %cst_100 [1] : vector<64x16xf32> to vector<64xf32>
    %266 = vector.shape_cast %265 : vector<64xf32> to vector<64x1xf32>
    %267 = vector.broadcast %266 : vector<64x1xf32> to vector<64x16xf32>
    %268 = arith.subf %264, %267 : vector<64x16xf32>
    %269 = math.exp %268 : vector<64x16xf32>
    %cst_101 = arith.constant dense<0.000000e+00> : vector<64xf32>
    %270 = vector.multi_reduction <add>, %269, %cst_101 [1] : vector<64x16xf32> to vector<64xf32>
    %271 = vector.shape_cast %270 : vector<64xf32> to vector<64x1xf32>
    %272 = vector.broadcast %271 : vector<64x1xf32> to vector<64x16xf32>
    %273 = arith.divf %269, %272 : vector<64x16xf32>
    %274 = vector.extract_strided_slice %223 {offsets = [16, 0], sizes = [16, 32], strides = [1, 1]} : vector<32x32xf32> to vector<16x32xf32>
    %275 = vector.extract_strided_slice %273 {offsets = [0, 0], sizes = [16, 16], strides = [1, 1]} : vector<64x16xf32> to vector<16x16xf32>
    %cst_102 = arith.constant dense<0.000000e+00> : vector<16xf32>
    %276 = vector.multi_reduction <add>, %275, %cst_102 [0] : vector<16x16xf32> to vector<16xf32>
    %277 = vector.shape_cast %276 : vector<16xf32> to vector<1x16xf32>
    %cst_103 = arith.constant 1.600000e+01 : f32
    %278 = vector.broadcast %cst_103 : f32 to vector<1x16xf32>
    %279 = arith.divf %277, %278 : vector<1x16xf32>
    %280 = vector.extract_strided_slice %274 {offsets = [0, 0], sizes = [16, 8], strides = [1, 1]} : vector<16x32xf32> to vector<16x8xf32>
    %cst_104 = arith.constant dense<0.000000e+00> : vector<1x8xf32>
    %281 = tpu.matmul %279, %280, %cst_104 {dimension_numbers = #tpu.dot_dimension_numbers<[1], [0], [0], [1], [0, 0, 1, 1], [], []>} : vector<1x16xf32>, vector<16x8xf32>, vector<1x8xf32> -> vector<1x8xf32>
    %282 = vector.extract_strided_slice %273 {offsets = [16, 0], sizes = [16, 16], strides = [1, 1]} : vector<64x16xf32> to vector<16x16xf32>
    %cst_105 = arith.constant dense<0.000000e+00> : vector<16xf32>
    %283 = vector.multi_reduction <add>, %282, %cst_105 [0] : vector<16x16xf32> to vector<16xf32>
    %284 = vector.shape_cast %283 : vector<16xf32> to vector<1x16xf32>
    %cst_106 = arith.constant 1.600000e+01 : f32
    %285 = vector.broadcast %cst_106 : f32 to vector<1x16xf32>
    %286 = arith.divf %284, %285 : vector<1x16xf32>
    %287 = vector.extract_strided_slice %274 {offsets = [0, 8], sizes = [16, 8], strides = [1, 1]} : vector<16x32xf32> to vector<16x8xf32>
    %cst_107 = arith.constant dense<0.000000e+00> : vector<1x8xf32>
    %288 = tpu.matmul %286, %287, %cst_107 {dimension_numbers = #tpu.dot_dimension_numbers<[1], [0], [0], [1], [0, 0, 1, 1], [], []>} : vector<1x16xf32>, vector<16x8xf32>, vector<1x8xf32> -> vector<1x8xf32>
    %289 = vector.extract_strided_slice %273 {offsets = [32, 0], sizes = [16, 16], strides = [1, 1]} : vector<64x16xf32> to vector<16x16xf32>
    %cst_108 = arith.constant dense<0.000000e+00> : vector<16xf32>
    %290 = vector.multi_reduction <add>, %289, %cst_108 [0] : vector<16x16xf32> to vector<16xf32>
    %291 = vector.shape_cast %290 : vector<16xf32> to vector<1x16xf32>
    %cst_109 = arith.constant 1.600000e+01 : f32
    %292 = vector.broadcast %cst_109 : f32 to vector<1x16xf32>
    %293 = arith.divf %291, %292 : vector<1x16xf32>
    %294 = vector.extract_strided_slice %274 {offsets = [0, 16], sizes = [16, 8], strides = [1, 1]} : vector<16x32xf32> to vector<16x8xf32>
    %cst_110 = arith.constant dense<0.000000e+00> : vector<1x8xf32>
    %295 = tpu.matmul %293, %294, %cst_110 {dimension_numbers = #tpu.dot_dimension_numbers<[1], [0], [0], [1], [0, 0, 1, 1], [], []>} : vector<1x16xf32>, vector<16x8xf32>, vector<1x8xf32> -> vector<1x8xf32>
    %296 = vector.extract_strided_slice %273 {offsets = [48, 0], sizes = [16, 16], strides = [1, 1]} : vector<64x16xf32> to vector<16x16xf32>
    %cst_111 = arith.constant dense<0.000000e+00> : vector<16xf32>
    %297 = vector.multi_reduction <add>, %296, %cst_111 [0] : vector<16x16xf32> to vector<16xf32>
    %298 = vector.shape_cast %297 : vector<16xf32> to vector<1x16xf32>
    %cst_112 = arith.constant 1.600000e+01 : f32
    %299 = vector.broadcast %cst_112 : f32 to vector<1x16xf32>
    %300 = arith.divf %298, %299 : vector<1x16xf32>
    %301 = vector.extract_strided_slice %274 {offsets = [0, 24], sizes = [16, 8], strides = [1, 1]} : vector<16x32xf32> to vector<16x8xf32>
    %cst_113 = arith.constant dense<0.000000e+00> : vector<1x8xf32>
    %302 = tpu.matmul %300, %301, %cst_113 {dimension_numbers = #tpu.dot_dimension_numbers<[1], [0], [0], [1], [0, 0, 1, 1], [], []>} : vector<1x16xf32>, vector<16x8xf32>, vector<1x8xf32> -> vector<1x8xf32>
    %303 = tpu.concatenate %242, %249, %256, %263, %281, %288, %295, %302 in 1 : vector<1x8xf32>, vector<1x8xf32>, vector<1x8xf32>, vector<1x8xf32>, vector<1x8xf32>, vector<1x8xf32>, vector<1x8xf32>, vector<1x8xf32> -> vector<1x64xf32>
    %cst_114 = arith.constant dense<0.000000e+00> : vector<1x128xf32>
    %304 = tpu.matmul %303, %11, %cst_114 {dimension_numbers = #tpu.dot_dimension_numbers<[1], [0], [0], [1], [0, 0, 1, 1], [], []>} : vector<1x64xf32>, vector<64x128xf32>, vector<1x128xf32> -> vector<1x128xf32>
    %305 = arith.addf %304, %12 : vector<1x128xf32>
    %306 = tpu.concatenate %159, %305 in 0 : vector<1x128xf32>, vector<1x128xf32> -> vector<2x128xf32>
    %307 = vector.shape_cast %306 : vector<2x128xf32> to vector<1x2x128xf32>
    %c0_115 = arith.constant 0 : index
    %c0_116 = arith.constant 0 : index
    %c0_117 = arith.constant 0 : index
    %308 = vector.load %arg5[%c0_115, %c0_116, %c0_117] : memref<1x2x128xf32, #tpu.memory_space<vmem>>, vector<1x2x128xf32>
    tpu.vector_store %arg5[%c0_115, %c0_116, %c0_117], %307 {strides = array<i32>} : memref<1x2x128xf32, #tpu.memory_space<vmem>>, vector<1x2x128xf32>,
    return
  }
  func.func @transform_0(%arg0: i32) -> (i32, i32, i32) {
    %c0_i32 = arith.constant 0 : i32
    %c0_i32_0 = arith.constant 0 : i32
    %c0_i32_1 = arith.constant 0 : i32
    return %arg0, %c0_i32, %c0_i32_0 : i32, i32, i32
  }
  func.func @transform_1(%arg0: i32) -> (i32, i32, i32) {
    %c0_i32 = arith.constant 0 : i32
    %c0_i32_0 = arith.constant 0 : i32
    %c0_i32_1 = arith.constant 0 : i32
    return %arg0, %c0_i32, %c0_i32_0 : i32, i32, i32
  }
  func.func @transform_2(%arg0: i32) -> (i32, i32) {
    %c0_i32 = arith.constant 0 : i32
    %c0_i32_0 = arith.constant 0 : i32
    %c0_i32_1 = arith.constant 0 : i32
    return %c0_i32, %c0_i32_0 : i32, i32
  }
  func.func @transform_3(%arg0: i32) -> (i32, i32) {
    %c0_i32 = arith.constant 0 : i32
    %c0_i32_0 = arith.constant 0 : i32
    %c0_i32_1 = arith.constant 0 : i32
    return %c0_i32, %c0_i32_0 : i32, i32
  }
  func.func @transform_4(%arg0: i32) -> (i32, i32, i32) {
    %c0_i32 = arith.constant 0 : i32
    %c0_i32_0 = arith.constant 0 : i32
    %c0_i32_1 = arith.constant 0 : i32
    return %arg0, %c0_i32, %c0_i32_0 : i32, i32, i32
  }
}

</mosaic_0001>

<bundles_post_ra>
// kernel: sva_model_forward.1
= control target key start
LH: loop header
LB: loop body
LE: loop exit
PB: predicated region body
PF: predicated region fallthrough
CT: control target
= control target key end

     0   :  { %9 = vsyncpa [#allocation3], 0  ;;  %s6256_s0 = inlined_call_operand.vmem [shape: f32[2,64,48], index: 0, kind: input, shape index: {}]   ;;  %s6257_s1 = inlined_call_operand.vmem [shape: f32[2,64,40], index: 1, kind: input, shape index: {}]   ;;  %s6258_s2 = inlined_call_operand.vmem [shape: f32[192,32], index: 2, kind: input, shape index: {}]   ;;  %s6259_s3 = inlined_call_operand.hbm [shape: f32[88,128], index: 3, kind: input, shape index: {}]   ;;  %s6260_s4 = inlined_call_operand.hbm [shape: f32[1,2,128], index: 4, kind: output, shape index: {}]  }
   0x1   :  { %10 = vsyncpa [#allocation4], 0  ;;  %s5017_s15 = smov [#allocation2]   ;;  %s4969_s19 = scalar_lea.hbm %s6259_s3, 1408 }
   0x2   :  { %s22_s16 = sshll.u32 %s5017_s15, 4  ;;  %p4970_p0 = scmp.ne.s32.totalorder %s6259_s3, %s4969_s19  ;;  %s23_s16 = int_to_ptr.vmem [resolvable:$true] %s22_s16 }
   0x3   :  { %p4973_p1 = scmp.lt.u32.totalorder %s4969_s19, %s6259_s3 }
   0x5   :  { %p4975_p2 = pnand %p4973_p1, %p4970_p0 }
   0x7   :  { %4978 = shalt.err (!%p4975_p2)
}
   0x8   :  { %s4979_s24 = scalar_lea.vmem %s23_s16, 1408  ;;  %p4984_p4 = scmp.lt.s32.totalorder %s23_s16, %s23_s16 }
   0x9   :  { %p4980_p3 = scmp.ne.s32.totalorder %s23_s16, %s4979_s24  ;;  %p4985_p5 = scmp.lt.s32.totalorder %s4979_s24, %s4979_s24 }
   0xb   :  { %p4986_p6 = por %p4985_p5, %p4984_p4 }
   0xd   :  { %p4987_p7 = pnand %p4986_p6, %p4980_p3 }
   0xf   :  { %4990 = shalt.err (!%p4987_p7)
}
  0x10   :  { %s5018_s25 = smov 128   ;;  %s5019_s26 = smov 8  }
  0x11   :  { %28 = dma.hbm_to_vmem [thread:$0]  %s6259_s3, 1408, %s23_s16, [#allocation3], %s5018_s25, %s5018_s25, %s5019_s26  }
  0x12   :  { %5013 = dma.done.wait [#allocation3], 1408  }
  0x13   :  { %5014 = vsyncadd [#allocation3], 4294965888  ;;  %v32_v0 = vld [vmem:[%s6258_s2] sm:$0xff]  ;;  %v33_v1 = vld [vmem:[%s6258_s2 + $0x8] sm:$0xff]  ;;  %vm85_vm0 = vcmask 392192   ;;  %vm291_vm1 = vcmask 523264  }
  0x14   :  { %v34_v2 = vld [vmem:[%s6258_s2 + $0x10] sm:$0xff]  ;;  %v5080_v3 = vpack.c.bf16 %v33_v1, %v32_v0  ;;  %v35_v4 = vld [vmem:[%s6258_s2 + $0x18] sm:$0xff]  ;;  %v36_v6 = vld [vmem:[%s6258_s2 + $0x20] sm:$0xff]  ;;  %vm215_vm2 = vcmask 261120   ;;  %vm397_vm3 = vcmask 326656   ;;  %vm1361_vm5 = vcmask 261248  }
  0x15   :  { %v5085_v5 = vpack.c.bf16 %v35_v4, %v34_v2  ;;  %v37_v7 = vld [vmem:[%s6258_s2 + $0x28] sm:$0xff]  ;;  %v73_v8 = vld [vmem:[%s6256_s0] sm:$0xff]  ;;  %v75_v11 = vld [vmem:[%s6256_s0 + $0x10] sm:$0xff]  ;;  %vm919_vm6 = vcmask 130048   ;;  %s5021_s29 = smov 112   ;;  %vm5022_vm7 = vmmov 0  }
  0x16   :  { %4500 = vmatprep.subr.bf16.mxu0 %v5080_v3  ;;  %4125 = vmatprep.mubr.msk.f32.mxu0 %vm85_vm0, %v73_v8  ;;  %v5100_v9 = vpack.c.bf16 %v37_v7, %v36_v6  ;;  %v74_v10 = vld [vmem:[%s6256_s0 + $0x8] sm:$0xff]  ;;  %v76_v12 = vld [vmem:[%s6256_s0 + $0x18] sm:$0xff]  ;;  %v77_v13 = vld [vmem:[%s6256_s0 + $0x20] sm:$0xff]  ;;  %s5024_s30 = smov 120   ;;  %s5025_s5 = smov 104   ;;  %vm1870_vm8 = vcmask 64512  }
  0x17   :  { %4502 = vmatpush3.bf16.msra.mxu0 %v5080_v3  ;;  %v78_v14 = vld [vmem:[%s6256_s0 + $0x28] sm:$0xff]  ;;  %v79_v15 = vld [vmem:[%s6256_s0 + $0x30] sm:$0xff]  ;;  %v80_v16 = vld [vmem:[%s6256_s0 + $0x38] sm:$0xff]  ;;  %s5026_s21 = smov 16   ;;  %s5028_s22 = smov 32   ;;  %vm1873_vm9 = vcmask 195584  }
  0x18   :  { %4504 = vmatprep.subr.bf16.mxu0 %v5085_v5  ;;  %v71_v17 = vld [vmem:[#allocation2 + $0x48] sm:$0xff]  ;;  %v3804_v18 = vld [vmem:[%s6258_s2 + $0xb8] ss:$0 sm:$0xff]  ;;  %v38_v46 = vld [vmem:[%s6258_s2 + $0x30] sm:$0xff]  ;;  %vm1878_vm10 = vcmask 457728   ;;  %vm3786_vm11 = vcmask 1040384  }
  0x19   :  { %4153 = vmatprep.mubr.msk.f32.mxu1 %vm291_vm1, %v71_v17  ;;  %v39_v47 = vld [vmem:[%s6258_s2 + $0x38] sm:$0xff]  ;;  %v40_v55 = vld [vmem:[%s6258_s2 + $0x40] sm:$0xff]  ;;  %v41_v56 = vld [vmem:[%s6258_s2 + $0x48] sm:$0xff] }
  0x1a   :  { %v5182_v53 = vpack.c.bf16 %v39_v47, %v38_v46  ;;  %v5192_v59 = vld [vmem:[#allocation2 + $0x50] sm:$0xff]  ;;  %v5195_v60 = vpack.c.bf16 %v41_v56, %v40_v55  ;;  %v385_v61 = vld [vmem:[%s6257_s1] sm:$0xff]  ;;  %v386_v63 = vld [vmem:[%s6257_s1 + $0x8] sm:$0xff] }
  0x1b   :  { %4506 = vmatpush3.bf16.msra.mxu0 %v5085_v5  ;;  %v42_v62 = vld [vmem:[%s6258_s2 + $0x50] sm:$0xff]  ;;  %v388_v1 = vld [vmem:[%s6257_s1 + $0x18] sm:$0xff]  ;;  %v389_v2 = vld [vmem:[%s6257_s1 + $0x20] sm:$0xff] }
  0x1c   :  { %4508 = vmatprep.subr.bf16.mxu0 %v5100_v9  ;;  %v387_v0 = vld [vmem:[%s6257_s1 + $0x10] sm:$0xff]  ;;  %v390_v4 = vld [vmem:[%s6257_s1 + $0x28] sm:$0xff]  ;;  %v392_v7 = vld [vmem:[%s6257_s1 + $0x38] sm:$0xff] }
  0x1d   :  { %v391_v6 = vld [vmem:[%s6257_s1 + $0x30] sm:$0xff]  ;;  %v3815_v47 = vld [vmem:[%s6258_s2 + $0xbb] ss:$0 sm:$0xff]  ;;  %vm5363_vm4 = vmpackc.low %vm215_vm2, %vm215_vm2 }
  0x1f   :  { %4510 = vmatpush3.bf16.msra.mxu0 %v5100_v9 }
  0x22   :  { %4126 = vmatmul.mubr.msk.f32.vlgmr.msra.gmra.mrb[0].mxu0 %vm85_vm0, %v74_v10 }
  0x23   :  { %4128 = vmatprep.mubr.msk.f32.mxu0 %vm85_vm0, %v75_v11 }
  0x26   :  { %4129 = vmatmul.mubr.msk.f32.gmra.mrb[2].mxu0 %vm85_vm0, %v76_v12 }
  0x27   :  { %4131 = vmatprep.mubr.msk.f32.mxu0 %vm85_vm0, %v77_v13 }
  0x2a   :  { %4132 = vmatmul.mubr.msk.f32.gmra.mrb[4].mxu0 %vm85_vm0, %v78_v14 }
  0x2b   :  { %4134 = vmatprep.mubr.msk.f32.mxu0 %vm85_vm0, %v79_v15 }
  0x2e   :  { %4135 = vmatmul.mubr.msk.f32.gmra.mrb[6].mxu0 %vm85_vm0, %v80_v16 }
  0x2f   :  { %4194 = vmatprep.mubr.msk.f32.mxu0 %vm291_vm1, %v71_v17 }
  0xf5   :  { %v4127_v19 = vpop.f32.mrb[0].mxu0 }
  0xf6   :  { %v5138_v20 = vadd.f32 %v4127_v19, %v3804_v18  ;;  %v176_v21 = vpop.f32.mrb[1].mxu0 }
  0xf7   :  { %v5140_v22 = vadd.f32 %v3804_v18, %v176_v21 }
  0xf8   :  { %v217_v23 = vsel %vm215_vm2, %v5138_v20, 0.0 }
  0xf9   :  { %v216_v24 = vsel %vm215_vm2, %v5140_v22, 0.0  ;;  %v4130_v25 = vpop.f32.mrb[2].mxu0  ;;  %v4511_v26 = vpack.c.bf16 %v5138_v20, %v5140_v22 }
  0xfa   :  { %v5148_v27 = vadd.f32 %v4130_v25, %v3804_v18  ;;  %v186_v28 = vpop.f32.mrb[3].mxu0  ;;  %v218_v30 = vadd.f32 %v217_v23, %v216_v24 }
  0xfb   :  { %v5150_v29 = vadd.f32 %v3804_v18, %v186_v28  ;;  %4512 = vmatprep.subr.bf16.mxu1 %v4511_v26 }
  0xfc   :  { %4514 = vmatpush3.bf16.msra.mxu1 %v4511_v26  ;;  %v221_v37 = vsel %vm215_vm2, %v5148_v27, 0.0 }
  0xfd   :  { %v219_v31 = vsel %vm215_vm2, %v5150_v29, 0.0  ;;  %v4133_v32 = vpop.f32.mrb[4].mxu0  ;;  %v4515_v33 = vpack.c.bf16 %v5148_v27, %v5150_v29 }
  0xfe   :  { %v220_v34 = vadd.f32 %v219_v31, %v218_v30  ;;  %v5156_v35 = vadd.f32 %v4133_v32, %v3804_v18  ;;  %v196_v36 = vpop.f32.mrb[5].mxu0 }
  0xff   :  { %v5160_v38 = vadd.f32 %v3804_v18, %v196_v36  ;;  %4516 = vmatprep.subr.bf16.mxu1 %v4515_v33 }
 0x100   :  { %4518 = vmatpush3.bf16.msra.mxu1 %v4515_v33  ;;  %v222_v39 = vadd.f32 %v221_v37, %v220_v34  ;;  %v225_v49 = vsel %vm215_vm2, %v5156_v35, 0.0 }
 0x101   :  { %v223_v40 = vsel %vm215_vm2, %v5160_v38, 0.0  ;;  %v4136_v41 = vpop.f32.mrb[6].mxu0  ;;  %v4519_v42 = vpack.c.bf16 %v5156_v35, %v5160_v38 }
 0x102   :  { %v5166_v43 = vadd.f32 %v4136_v41, %v3804_v18  ;;  %v206_v44 = vpop.f32.mrb[7].mxu0  ;;  %v224_v45 = vadd.f32 %v223_v40, %v222_v39 }
 0x103   :  { %v5174_v48 = vadd.f32 %v3804_v18, %v206_v44  ;;  %4520 = vmatprep.subr.bf16.mxu1 %v4519_v42 }
 0x104   :  { %4522 = vmatpush3.bf16.msra.mxu1 %v4519_v42  ;;  %v226_v50 = vadd.f32 %v225_v49, %v224_v45  ;;  %v229_v57 = vsel %vm215_vm2, %v5166_v43, 0.0 }
 0x105   :  { %v4523_v51 = vpack.c.bf16 %v5166_v43, %v5174_v48  ;;  %v227_v52 = vsel %vm215_vm2, %v5174_v48, 0.0 }
 0x106   :  { %v228_v54 = vadd.f32 %v227_v52, %v226_v50 }
 0x107   :  { %4524 = vmatprep.subr.bf16.mxu1 %v4523_v51 }
 0x108   :  { %4526 = vmatpush3.bf16.msra.mxu1 %v4523_v51  ;;  %v230_v58 = vadd.f32 %v229_v57, %v228_v54 }
 0x109   :  { %4528 = vmatprep.subr.bf16.mxu1 %v5182_v53 }
 0x10a   :  { %231 = vadd.xlane.f32.xlu0 %v230_v58 }
 0x10b   :  { %4154 = vmatmul.mubr.msk.f32.vlgmr.msra.gmra.mrb[0].mxu1 %vm291_vm1, %v5192_v59 }
 0x10c   :  { %4530 = vmatpush3.bf16.msra.mxu1 %v5182_v53  ;;  %4166 = vmatprep.mubr.msk.f32.mxu1 %vm397_vm3, %v385_v61 }
 0x10d   :  { %4532 = vmatprep.subr.bf16.mxu1 %v5195_v60 }
 0x110   :  { %4534 = vmatpush3.bf16.msra.mxu1 %v5195_v60 }
 0x111   :  { %4164 = vmatprep.subr.mxu1 %v42_v62 }
 0x114   :  { %4165 = vmatpush3.msra.mxu1 %v42_v62 }
 0x115   :  { %4167 = vmatmul.mubr.msk.f32.vlgmr.msra.gmra.mrb[2].mxu1 %vm397_vm3, %v386_v63 }
 0x116   :  { %4169 = vmatprep.mubr.msk.f32.mxu1 %vm397_vm3, %v387_v0 }
 0x119   :  { %4170 = vmatmul.mubr.msk.f32.gmra.mrb[4].mxu1 %vm397_vm3, %v388_v1 }
 0x11a   :  { %4172 = vmatprep.mubr.msk.f32.mxu1 %vm397_vm3, %v389_v2 }
 0x11d   :  { %4173 = vmatmul.mubr.msk.f32.gmra.mrb[6].mxu1 %vm397_vm3, %v390_v4 }
 0x11e   :  { %4175 = vmatprep.mubr.msk.f32.mxu1 %vm397_vm3, %v391_v6 }
 0x121   :  { %4176 = vmatmul.mubr.msk.f32.gmra.mrb[8].mxu1 %vm397_vm3, %v392_v7 }
 0x197   :  { %v232_v8 = vpop.xlane.xlu0 %231 }
 0x198   :  { %v233_v10 = vrot.slane %v232_v8, 4 }
 0x19a   :  { %v234_v11 = vadd.f32 %v233_v10, %v232_v8 }
 0x19c   :  { %v235_v12 = vrot.slane %v234_v11, 2 }
 0x19e   :  { %v236_v13 = vadd.f32 %v235_v12, %v234_v11 }
 0x1a0   :  { %v237_v14 = vrot.slane %v236_v13, 1 }
 0x1a2   :  { %v238_v15 = vadd.f32 %v237_v14, %v236_v13 }
 0x1a4   :  { %4715 = vpush %v238_v15 }
 0x1d5   :  { %s4716_s7 = spop %4715 }
 0x1d6   :  { %s240_s8 = smul.f32 0.00048828125, %s4716_s7 }
 0x1d8   :  { %v5237_v16 = vstv %s240_s8 }
 0x1d9   :  { %v242_v17 = vsub.f32 %v5140_v22, %v5237_v16  ;;  %v243_v18 = vsub.f32 %v5138_v20, %v5237_v16  ;;  %v244_v19 = vsub.f32 %v5150_v29, %v5237_v16  ;;  %v245_v21 = vsub.f32 %v5148_v27, %v5237_v16 }
 0x1da   :  { %v246_v23 = vsub.f32 %v5160_v38, %v5237_v16  ;;  %v247_v28 = vsub.f32 %v5156_v35, %v5237_v16  ;;  %v248_v27 = vsub.f32 %v5174_v48, %v5237_v16  ;;  %v249_v35 = vsub.f32 %v5166_v43, %v5237_v16 }
 0x1db   :  { %v250_v24 = vmul.f32 %v242_v17, %v242_v17  ;;  %v251_v25 = vmul.f32 %v243_v18, %v243_v18  ;;  %v252_v26 = vmul.f32 %v244_v19, %v244_v19  ;;  %v253_v30 = vmul.f32 %v245_v21, %v245_v21 }
 0x1dc   :  { %v254_v29 = vmul.f32 %v246_v23, %v246_v23  ;;  %v255_v37 = vmul.f32 %v247_v28, %v247_v28  ;;  %v256_v40 = vmul.f32 %v248_v27, %v248_v27  ;;  %v257_v44 = vmul.f32 %v249_v35, %v249_v35 }
 0x1dd   :  { %v258_v22 = vsel %vm215_vm2, %v250_v24, 0.0  ;;  %v259_v20 = vsel %vm215_vm2, %v251_v25, 0.0  ;;  %v261_v33 = vsel %vm215_vm2, %v252_v26, 0.0  ;;  %v263_v38 = vsel %vm215_vm2, %v253_v30, 0.0 }
 0x1de   :  { %v260_v31 = vadd.f32 %v259_v20, %v258_v22  ;;  %v5253_v32 = vpop.f32.mrb[0].mxu1  ;;  %v265_v41 = vsel %vm215_vm2, %v254_v29, 0.0  ;;  %v267_v45 = vsel %vm215_vm2, %v255_v37, 0.0  ;;  %v269_v48 = vsel %vm215_vm2, %v256_v40, 0.0 }
 0x1df   :  { %v5258_v34 = vpop.f32.mrb[1].mxu1  ;;  %v271_v50 = vsel %vm215_vm2, %v257_v44, 0.0 }
 0x1e0   :  { %v262_v36 = vadd.f32 %v261_v33, %v260_v31  ;;  %v43_v33 = vld [vmem:[%s6258_s2 + $0x58] sm:$0xff] }
 0x1e2   :  { %v264_v39 = vadd.f32 %v263_v38, %v262_v36  ;;  %v44_v36 = vld [vmem:[%s6258_s2 + $0x60] sm:$0xff] }
 0x1e3   :  { %v5318_v37 = vpack.c.bf16 %v44_v36, %v43_v33 }
 0x1e4   :  { %v266_v42 = vadd.f32 %v265_v41, %v264_v39  ;;  %v46_v39 = vld [vmem:[%s6258_s2 + $0x70] sm:$0xff] }
 0x1e6   :  { %v268_v46 = vadd.f32 %v267_v45, %v266_v42 }
 0x1e8   :  { %v270_v49 = vadd.f32 %v269_v48, %v268_v46  ;;  %v4168_v43 = vpop.f32.mrb[2].mxu1 }
 0x1e9   :  { %v5270_v51 = vadd.f32 %v4168_v43, %v3815_v47  ;;  %v488_v52 = vpop.f32.mrb[3].mxu1 }
 0x1ea   :  { %v272_v54 = vadd.f32 %v271_v50, %v270_v49  ;;  %v5272_v55 = vadd.f32 %v3815_v47, %v488_v52 }
 0x1eb   :  { %v528_v56 = vsel %vm215_vm2, %v5270_v51, 0.0 }
 0x1ec   :  { %273 = vadd.xlane.f32.xlu0 %v272_v54  ;;  %v527_v57 = vsel %vm215_vm2, %v5272_v55, 0.0  ;;  %v4171_v58 = vpop.f32.mrb[4].mxu1  ;;  %v4535_v61 = vpack.c.bf16 %v5270_v51, %v5272_v55  ;;  %v373_v54 = vlaneseq }
 0x1ed   :  { %v529_v62 = vadd.f32 %v528_v56, %v527_v57  ;;  %v5280_v63 = vadd.f32 %v4171_v58, %v3815_v47  ;;  %v498_v0 = vpop.f32.mrb[5].mxu1  ;;  %v56_v57 = vld [vmem:[%s6258_s2 + $0xb9] sm:$0x1] }
 0x1ee   :  { %v5282_v1 = vadd.f32 %v3815_v47, %v498_v0  ;;  %4536 = vmatprep.subr.bf16.mxu0 %v4535_v61  ;;  %v374_v56 = vshrl.u32 %v373_v54, 7  ;;  %v57_v0 = vld [vmem:[%s6258_s2 + $0xba] sm:$0x1] }
 0x1ef   :  { %4538 = vmatpush3.bf16.msra.mxu0 %v4535_v61  ;;  %v532_v2 = vsel %vm215_vm2, %v5280_v63, 0.0 }
 0x1f0   :  { %v530_v4 = vsel %vm215_vm2, %v5282_v1, 0.0  ;;  %v4174_v6 = vpop.f32.mrb[6].mxu1  ;;  %v4539_v7 = vpack.c.bf16 %v5280_v63, %v5282_v1  ;;  %v5335_v58 = vsub.s32 0, %v374_v56 }
 0x1f1   :  { %v531_v8 = vadd.f32 %v530_v4, %v529_v62  ;;  %v5290_v10 = vadd.f32 %v4174_v6, %v3815_v47  ;;  %v508_v11 = vpop.f32.mrb[7].mxu1 }
 0x1f2   :  { %v5292_v12 = vadd.f32 %v3815_v47, %v508_v11  ;;  %4540 = vmatprep.subr.bf16.mxu0 %v4539_v7 }
 0x1f3   :  { %4542 = vmatpush3.bf16.msra.mxu0 %v4539_v7  ;;  %v533_v13 = vadd.f32 %v532_v2, %v531_v8  ;;  %v536_v18 = vsel %vm215_vm2, %v5290_v10, 0.0 }
 0x1f4   :  { %v534_v14 = vsel %vm215_vm2, %v5292_v12, 0.0  ;;  %v4177_v15 = vpop.f32.mrb[8].mxu1  ;;  %v4543_v17 = vpack.c.bf16 %v5290_v10, %v5292_v12 }
 0x1f5   :  { %v5300_v19 = vadd.f32 %v4177_v15, %v3815_v47  ;;  %v518_v21 = vpop.f32.mrb[9].mxu1  ;;  %v535_v23 = vadd.f32 %v534_v14, %v533_v13 }
 0x1f6   :  { %v5302_v24 = vadd.f32 %v3815_v47, %v518_v21  ;;  %4544 = vmatprep.subr.bf16.mxu0 %v4543_v17 }
 0x1f7   :  { %v537_v25 = vadd.f32 %v536_v18, %v535_v23  ;;  %4546 = vmatpush3.bf16.msra.mxu0 %v4543_v17  ;;  %v540_v28 = vsel %vm215_vm2, %v5300_v19, 0.0 }
 0x1f8   :  { %v538_v26 = vsel %vm215_vm2, %v5302_v24, 0.0  ;;  %v4547_v30 = vpack.c.bf16 %v5300_v19, %v5302_v24 }
 0x1f9   :  { %v539_v22 = vadd.f32 %v538_v26, %v537_v25 }
 0x1fa   :  { %4548 = vmatprep.subr.bf16.mxu0 %v4547_v30 }
 0x1fb   :  { %v541_v20 = vadd.f32 %v540_v28, %v539_v22  ;;  %4550 = vmatpush3.bf16.msra.mxu0 %v4547_v30 }
 0x1fc   :  { %4552 = vmatprep.subr.bf16.mxu0 %v5318_v37 }
 0x1fd   :  { %542 = vadd.xlane.f32.xlu1 %v541_v20 }
 0x1fe   :  { %4195 = vmatmul.mubr.msk.f32.vlgmr.msra.gmra.mrb[8].mxu0 %vm291_vm1, %v5192_v59  ;;  %v45_v59 = vld [vmem:[%s6258_s2 + $0x68] sm:$0xff] }
 0x1ff   :  { %4554 = vmatpush3.bf16.msra.mxu0 %v5318_v37  ;;  %v5328_v41 = vpack.c.bf16 %v46_v39, %v45_v59 }
 0x201   :  { %4556 = vmatprep.subr.bf16.mxu0 %v5328_v41 }
 0x203   :  { %4558 = vmatpush3.bf16.msra.mxu0 %v5328_v41 }
 0x279   :  { %v274_v31 = vpop.xlane.xlu0 %273 }
 0x27a   :  { %v275_v27 = vrot.slane %v274_v31, 4 }
 0x27c   :  { %v276_v29 = vadd.f32 %v275_v27, %v274_v31 }
 0x27e   :  { %v277_v35 = vrot.slane %v276_v29, 2 }
 0x280   :  { %v278_v38 = vadd.f32 %v277_v35, %v276_v29 }
 0x282   :  { %v279_v40 = vrot.slane %v278_v38, 1 }
 0x284   :  { %v280_v42 = vadd.f32 %v279_v40, %v278_v38 }
 0x286   :  { %4717 = vpush %v280_v42 }
 0x28a   :  { %v543_v44 = vpop.xlane.xlu1 %542 }
 0x28b   :  { %v544_v45 = vrot.slane %v543_v44, 4 }
 0x28d   :  { %v545_v46 = vadd.f32 %v544_v45, %v543_v44 }
 0x28f   :  { %v546_v47 = vrot.slane %v545_v46, 2 }
 0x291   :  { %v547_v49 = vadd.f32 %v546_v47, %v545_v46  ;;  %v5020_v47 = vmov 0.0|0.0  }
 0x292   :  { %4571 = vmatprep.subr.bf16.mxu0 %v5020_v47 }
 0x293   :  { %v548_v43 = vrot.slane %v547_v49, 1 }
 0x295   :  { %v549_v52 = vadd.f32 %v548_v43, %v547_v49 }
 0x2b7   :  { %s4718_s18 = spop %4717 }
 0x2b8   :  { %s282_s19 = smul.f32 0.00048828125, %s4718_s18 }
 0x2ba   :  { %s283_s20 = sadd.f32 1e-05, %s282_s19 }
 0x2bc   :  { %v284_v48 = vstv %s283_s20 }
 0x2bd   :  { %4815 = vrsqrt.f32 %v284_v48 }
 0x2c7   :  { %v4816_v50 = vpop.eup %4815 }
 0x2c8   :  { %4719 = vpush %v4816_v50 }
 0x2c9   :  { %4721 = vpush %v549_v52 }
 0x2d1   :  { %v4196_v45 = vpop.f32.mrb[8].mxu0 }
 0x2d2   :  { %v668_v46 = vpop.f32.mrb[9].mxu0 }
 0x2f9   :  { %s4720_s23 = spop %4719 }
 0x2fa   :  { %v287_v61 = vstv %s4720_s23  ;;  %s4722_s24 = spop %4721  ;;  %s5029_s23 = smov 40  }
 0x2fb   :  { %v288_v62 = vmul.f32 %v287_v61, %v56_v57  ;;  %s551_s25 = smul.f32 0.00048828125, %s4722_s24  ;;  %v47_v57 = vld [vmem:[%s6258_s2 + $0x78] sm:$0xff]  ;;  %s5030_s24 = smov 48  }
 0x2fc   :  { %4219 = vmatprep.mubr.msk.f32.mxu1 %vm215_vm2, %v47_v57  ;;  %v3826_v61 = vld [vmem:[%s6258_s2 + $0xbe] ss:$0 sm:$0xff] }
 0x2fd   :  { %v289_v2 = vmul.f32 %v288_v62, %v5237_v16  ;;  %v376_v4 = vrot.slane %v288_v62, %v5335_v58  ;;  %v5342_v6 = vstv %s551_s25  ;;  %s5031_s25 = smov 56  }
 0x2fe   :  { %v553_v7 = vsub.f32 %v5272_v55, %v5342_v6  ;;  %v554_v8 = vsub.f32 %v5270_v51, %v5342_v6  ;;  %v555_v11 = vsub.f32 %v5282_v1, %v5342_v6  ;;  %v556_v13 = vsub.f32 %v5280_v63, %v5342_v6 }
 0x2ff   :  { %v290_v14 = vsub.f32 %v57_v0, %v289_v2  ;;  %v377_v15 = vmul.f32 %v376_v4, %v5258_v34  ;;  %v378_v16 = vmul.f32 %v5253_v32, %v376_v4  ;;  %v557_v55 = vsub.f32 %v5292_v12, %v5342_v6  ;;  %v4964_v32 = vld [vmem:[%s6258_s2 + $0x90] sm:$0xff] }
 0x300   :  { %v561_v17 = vmul.f32 %v553_v7, %v553_v7  ;;  %v562_v21 = vmul.f32 %v554_v8, %v554_v8  ;;  %v563_v23 = vmul.f32 %v555_v11, %v555_v11  ;;  %v558_v51 = vsub.f32 %v5290_v10, %v5342_v6 }
 0x301   :  { %v382_v18 = vrot.slane %v290_v14, %v5335_v58  ;;  %v564_v1 = vmul.f32 %v556_v13, %v556_v13  ;;  %v559_v10 = vsub.f32 %v5302_v24, %v5342_v6  ;;  %v565_v30 = vmul.f32 %v557_v55, %v557_v55  ;;  %v59_v14 = vld [vmem:[%s6258_s2 + $0xbc] sm:$0x1] }
 0x302   :  { %v569_v63 = vsel %vm215_vm2, %v561_v17, 0.0  ;;  %v570_v34 = vsel %vm215_vm2, %v562_v21, 0.0  ;;  %v572_v22 = vsel %vm215_vm2, %v563_v23, 0.0  ;;  %v560_v31 = vsub.f32 %v5300_v19, %v5342_v6  ;;  %v60_v17 = vld [vmem:[%s6258_s2 + $0xbd] sm:$0x1] }
 0x303   :  { %v384_v25 = vadd.f32 %v382_v18, %v378_v16  ;;  %v383_v26 = vadd.f32 %v382_v18, %v377_v15  ;;  %v571_v28 = vadd.f32 %v570_v34, %v569_v63  ;;  %v566_v27 = vmul.f32 %v558_v51, %v558_v51  ;;  %v49_v34 = vld [vmem:[%s6258_s2 + $0x88] sm:$0xff] }
 0x304   :  { %v574_v29 = vsel %vm215_vm2, %v564_v1, 0.0  ;;  %v567_v24 = vmul.f32 %v559_v10, %v559_v10  ;;  %v576_v36 = vsel %vm215_vm2, %v565_v30, 0.0  ;;  %v568_v38 = vmul.f32 %v560_v31, %v560_v31  ;;  %v52_v10 = vld [vmem:[%s6258_s2 + $0xa0] sm:$0xff]  ;;  %v53_v30 = vld [vmem:[%s6258_s2 + $0xa8] sm:$0xff] }
 0x305   :  { %4205 = vmatprep.mubr.msk.f32.mxu0 %vm215_vm2, %v383_v26  ;;  %v4559_v12 = vpack.c.bf16 %v384_v25, %v383_v26  ;;  %v573_v20 = vadd.f32 %v572_v22, %v571_v28  ;;  %v578_v59 = vsel %vm215_vm2, %v566_v27, 0.0  ;;  %v50_v28 = vld [vmem:[%s6258_s2 + $0x90] sm:$0xff] }
 0x306   :  { %4206 = vmatmul.mubr.msk.f32.vlgmr.msra.gmra.mrb[10].mxu0 %vm215_vm2, %v384_v25  ;;  %v580_v40 = vsel %vm215_vm2, %v567_v24, 0.0  ;;  %v582_v19 = vsel %vm215_vm2, %v568_v38, 0.0  ;;  %v54_v22 = vld [vmem:[%s6258_s2 + $0xb0] sm:$0xff] }
 0x307   :  { %4561 = vmatprep.subr.msk.bf16.mxu1 %vm5363_vm4, %v4559_v12  ;;  %v575_v33 = vadd.f32 %v574_v29, %v573_v20 }
 0x308   :  { %4564 = vmatpush3.bf16.xpose.msk.msra.mxu1 %vm5363_vm4, %v4559_v12  ;;  %v51_v12 = vld [vmem:[%s6258_s2 + $0x98] sm:$0xff] }
 0x309   :  { %v577_v35 = vadd.f32 %v576_v36, %v575_v33 }
 0x30b   :  { %v579_v39 = vadd.f32 %v578_v59, %v577_v35 }
 0x30d   :  { %v581_v42 = vadd.f32 %v580_v40, %v579_v39 }
 0x30f   :  { %v583_v44 = vadd.f32 %v582_v19, %v581_v42 }
 0x311   :  { %584 = vadd.xlane.f32.xlu1 %v583_v44 }
 0x39e   :  { %v585_v48 = vpop.xlane.xlu1 %584 }
 0x39f   :  { %v586_v49 = vrot.slane %v585_v48, 4 }
 0x3a1   :  { %v587_v43 = vadd.f32 %v586_v49, %v585_v48 }
 0x3a3   :  { %v588_v50 = vrot.slane %v587_v43, 2 }
 0x3a5   :  { %v589_v52 = vadd.f32 %v588_v50, %v587_v43 }
 0x3a7   :  { %v590_v54 = vrot.slane %v589_v52, 1 }
 0x3a9   :  { %v591_v56 = vadd.f32 %v590_v54, %v589_v52 }
 0x3ab   :  { %4723 = vpush %v591_v56 }
 0x3d9   :  { %v4207_v62 = vpop.f32.mrb[10].mxu0 }
 0x3da   :  { %v777_v0 = vadd.f32 %v4207_v62, %v3826_v61  ;;  %v771_v2 = vpop.f32.mrb[11].mxu0 }
 0x3db   :  { %v772_v4 = vadd.f32 %v3826_v61, %v771_v2 }
 0x3dc   :  { %s4724_s7 = spop %4723 }
 0x3dd   :  { %v4572_v7 = vpack.c.bf16 %v777_v0, %v772_v4  ;;  %v5391_v8 = vpack.i.bf16 %v777_v0, %v772_v4  ;;  %s593_s8 = smul.f32 0.00048828125, %s4724_s7 }
 0x3df   :  { %4573 = vmatpush3.bf16.msra.mxu0 %v4572_v7  ;;  %s594_s9 = sadd.f32 1e-05, %s593_s8 }
 0x3e0   :  { %4574 = vmatprep.subr.bf16.mxu0 %v5020_v47 }
 0x3e1   :  { %v595_v11 = vstv %s594_s9 }
 0x3e2   :  { %4817 = vrsqrt.f32 %v595_v11 }
 0x3ec   :  { %v4818_v13 = vpop.eup %4817 }
 0x3ed   :  { %4725 = vpush %v4818_v13 }
 0x41e   :  { %s4726_s11 = spop %4725 }
 0x41f   :  { %v598_v15 = vstv %s4726_s11 }
 0x420   :  { %v599_v16 = vmul.f32 %v598_v15, %v59_v14 }
 0x422   :  { %v600_v18 = vmul.f32 %v599_v16, %v5342_v6  ;;  %v680_v55 = vrot.slane %v599_v16, %v5335_v58  ;;  %v48_v6 = vld [vmem:[%s6258_s2 + $0x80] sm:$0xff] }
 0x424   :  { %v601_v21 = vsub.f32 %v60_v17, %v600_v18  ;;  %v681_v23 = vmul.f32 %v680_v55, %v668_v46  ;;  %v682_v51 = vmul.f32 %v4196_v45, %v680_v55 }
 0x426   :  { %v686_v1 = vrot.slane %v601_v21, %v5335_v58 }
 0x428   :  { %v687_v25 = vadd.f32 %v686_v1, %v681_v23  ;;  %v688_v26 = vadd.f32 %v686_v1, %v682_v51 }
 0x42a   :  { %4208 = vmatprep.mubr.msk.f32.mxu0 %vm215_vm2, %v687_v25  ;;  %v4565_v63 = vpack.c.bf16 %v688_v26, %v687_v25 }
 0x42b   :  { %4209 = vmatmul.mubr.msk.f32.gmra.mrb[12].mxu0 %vm215_vm2, %v688_v26 }
 0x42c   :  { %4567 = vmatprep.subr.msk.bf16.mxu1 %vm5363_vm4, %v4565_v63 }
 0x42d   :  { %4570 = vmatpush3.bf16.xpose.msk.msra.mxu1 %vm5363_vm4, %v4565_v63 }
 0x42e   :  { %4583 = vmatprep.subr.bf16.mxu1 %v5020_v47 }
 0x434   :  { %4220 = vmatmul.mubr.msk.f32.vlgmr.msra.gmra.mrb[10].mxu1 %vm215_vm2, %v48_v6 }
 0x435   :  { %4222 = vmatprep.mubr.msk.f32.mxu1 %vm215_vm2, %v49_v34 }
 0x438   :  { %4223 = vmatmul.mubr.msk.f32.gmra.mrb[12].mxu1 %vm215_vm2, %v50_v28 }
 0x439   :  { %4225 = vmatprep.mubr.msk.f32.mxu1 %vm215_vm2, %v51_v12 }
 0x43c   :  { %4226 = vmatmul.mubr.msk.f32.gmra.mrb[14].mxu1 %vm215_vm2, %v52_v10 }
 0x43d   :  { %4228 = vmatprep.mubr.msk.f32.mxu1 %vm215_vm2, %v53_v30 }
 0x440   :  { %4229 = vmatmul.mubr.msk.f32.gmra.mrb[16].mxu1 %vm215_vm2, %v54_v22 }
 0x4fe   :  { %v4210_v20 = vpop.f32.mrb[12].mxu0 }
 0x4ff   :  { %v787_v31 = vadd.f32 %v4210_v20, %v3826_v61  ;;  %v781_v27 = vpop.f32.mrb[13].mxu0 }
 0x500   :  { %v782_v29 = vadd.f32 %v3826_v61, %v781_v27 }
 0x502   :  { %v4584_v33 = vpack.c.bf16 %v787_v31, %v782_v29  ;;  %v5438_v24 = vpack.i.bf16 %v787_v31, %v782_v29 }
 0x504   :  { %4585 = vmatpush3.bf16.msra.mxu1 %v4584_v33 }
 0x505   :  { %4589 = vmatprep.subr.bf16.mxu1 %v5020_v47 }
 0x507   :  { %v5441_v36 = vpop.f32.mrb[10].mxu1 }
 0x508   :  { %v5443_v35 = vpop.f32.mrb[11].mxu1  ;;  %v1365_v38 = vsel %vm1361_vm5, %v5441_v36, -inf  ;;  %v923_v54 = vsel %vm919_vm6, %v5441_v36, -inf }
 0x509   :  { %1366 = vmax.xlane.f32.xlu1 %v1365_v38  ;;  %v1362_v59 = vsel %vm1361_vm5, %v5443_v35, -inf  ;;  %v920_v56 = vsel %vm919_vm6, %v5443_v35, -inf }
 0x50a   :  { %1363 = vmax.xlane.f32.xlu0 %v1362_v59 }
 0x50b   :  { %v5449_v39 = vpop.f32.mrb[12].mxu1 }
 0x50c   :  { %v5451_v40 = vpop.f32.mrb[13].mxu1  ;;  %v1371_v42 = vsel %vm1361_vm5, %v5449_v39, -inf  ;;  %v929_v61 = vsel %vm919_vm6, %v5449_v39, -inf }
 0x50d   :  { %1372 = vmax.xlane.f32.xlu1 %v1371_v42  ;;  %v1368_v19 = vsel %vm1361_vm5, %v5451_v40, -inf  ;;  %v926_v57 = vsel %vm919_vm6, %v5451_v40, -inf }
 0x50e   :  { %1369 = vmax.xlane.f32.xlu0 %v1368_v19 }
 0x50f   :  { %v5457_v44 = vpop.f32.mrb[14].mxu1 }
 0x510   :  { %v5459_v45 = vpop.f32.mrb[15].mxu1  ;;  %v1377_v46 = vsel %vm1361_vm5, %v5457_v44, -inf  ;;  %v935_v42 = vsel %vm919_vm6, %v5457_v44, -inf }
 0x511   :  { %1378 = vmax.xlane.f32.xlu1 %v1377_v46  ;;  %v1374_v48 = vsel %vm1361_vm5, %v5459_v45, -inf  ;;  %v932_v62 = vsel %vm919_vm6, %v5459_v45, -inf }
 0x512   :  { %1375 = vmax.xlane.f32.xlu0 %v1374_v48 }
 0x513   :  { %v5465_v49 = vpop.f32.mrb[16].mxu1 }
 0x514   :  { %v5467_v43 = vpop.f32.mrb[17].mxu1  ;;  %v1383_v50 = vsel %vm1361_vm5, %v5465_v49, -inf  ;;  %v941_v19 = vsel %vm919_vm6, %v5465_v49, -inf }
 0x515   :  { %1384 = vmax.xlane.f32.xlu1 %v1383_v50  ;;  %v1380_v52 = vsel %vm1361_vm5, %v5467_v43, -inf  ;;  %v938_v59 = vsel %vm919_vm6, %v5467_v43, -inf }
 0x516   :  { %1381 = vmax.xlane.f32.xlu0 %v1380_v52 }
 0x519   :  { %924 = vmax.xlane.f32.xlu1 %v923_v54 }
 0x51a   :  { %921 = vmax.xlane.f32.xlu0 %v920_v56 }
 0x51e   :  { %927 = vmax.xlane.f32.xlu0 %v926_v57 }
 0x522   :  { %930 = vmax.xlane.f32.xlu0 %v929_v61 }
 0x526   :  { %933 = vmax.xlane.f32.xlu0 %v932_v62 }
 0x596   :  { %v1367_v0 = vpop.xlane.xlu1 %1366 }
 0x597   :  { %v1387_v2 = vsub.f32 %v5441_v36, %v1367_v0  ;;  %v1364_v4 = vpop.xlane.xlu0 %1363 }
 0x598   :  { %v1386_v7 = vsub.f32 %v5443_v35, %v1364_v4 }
 0x599   :  { %v1396_v11 = vmul.f32 1.442695, %v1387_v2 }
 0x59a   :  { %v1394_v13 = vmul.f32 1.442695, %v1386_v7  ;;  %v1373_v14 = vpop.xlane.xlu1 %1372 }
 0x59b   :  { %4819 = vpow2.f32 %v1396_v11  ;;  %v1389_v15 = vsub.f32 %v5449_v39, %v1373_v14  ;;  %v1370_v16 = vpop.xlane.xlu0 %1369 }
 0x59c   :  { %4821 = vpow2.f32 %v1394_v13  ;;  %v1388_v17 = vsub.f32 %v5451_v40, %v1370_v16 }
 0x59d   :  { %v1400_v18 = vmul.f32 1.442695, %v1389_v15 }
 0x59e   :  { %v1379_v55 = vpop.xlane.xlu1 %1378  ;;  %v1398_v21 = vmul.f32 1.442695, %v1388_v17 }
 0x59f   :  { %4823 = vpow2.f32 %v1400_v18  ;;  %v1391_v23 = vsub.f32 %v5457_v44, %v1379_v55  ;;  %v1376_v51 = vpop.xlane.xlu0 %1375 }
 0x5a0   :  { %v1390_v1 = vsub.f32 %v5459_v45, %v1376_v51  ;;  %4825 = vpow2.f32 %v1398_v21 }
 0x5a1   :  { %v1404_v63 = vmul.f32 1.442695, %v1391_v23 }
 0x5a2   :  { %v1402_v25 = vmul.f32 1.442695, %v1390_v1  ;;  %v1385_v26 = vpop.xlane.xlu1 %1384 }
 0x5a3   :  { %v1393_v6 = vsub.f32 %v5465_v49, %v1385_v26  ;;  %v1382_v34 = vpop.xlane.xlu0 %1381 }
 0x5a4   :  { %4827 = vpow2.f32 %v1402_v25  ;;  %v1392_v28 = vsub.f32 %v5467_v43, %v1382_v34 }
 0x5a5   :  { %v5491_v12 = vpop.eup %4819  ;;  %4829 = vpow2.f32 %v1404_v63  ;;  %v1408_v22 = vmul.f32 1.442695, %v1393_v6 }
 0x5a6   :  { %v5493_v10 = vpop.eup %4821  ;;  %v1406_v30 = vmul.f32 1.442695, %v1392_v28  ;;  %1420 = vrot.lane.b32.xlu1 %v5491_v12, %s5021_s29  ;;  %v925_v52 = vpop.xlane.xlu1 %924 }
 0x5a7   :  { %1418 = vrot.lane.b32.xlu0 %v5493_v10, %s5021_s29  ;;  %v922_v46 = vpop.xlane.xlu0 %921  ;;  %v945_v56 = vsub.f32 %v5441_v36, %v925_v52 }
 0x5a8   :  { %4831 = vpow2.f32 %v1406_v30  ;;  %v944_v57 = vsub.f32 %v5443_v35, %v922_v46  ;;  %v5023_v46 = vmov 0.0  }
 0x5a9   :  { %v5499_v20 = vpop.eup %4823  ;;  %4833 = vpow2.f32 %v1408_v22  ;;  %v954_v4 = vmul.f32 1.442695, %v945_v56  ;;  %4235 = vmatprep.mubr.msk.f32.mxu0 %vm5022_vm7, %v5023_v46  ;;  %4263 = vmatprep.mubr.msk.f32.mxu1 %vm5022_vm7, %v5023_v46 }
 0x5aa   :  { %1424 = vrot.lane.b32.xlu1 %v5499_v20, %s5021_s29  ;;  %v5503_v31 = vpop.eup %4825  ;;  %v952_v11 = vmul.f32 1.442695, %v944_v57 }
 0x5ab   :  { %v928_v48 = vpop.xlane.xlu0 %927  ;;  %4835 = vpow2.f32 %v954_v4 }
 0x5ac   :  { %v946_v7 = vsub.f32 %v5451_v40, %v928_v48  ;;  %4837 = vpow2.f32 %v952_v11 }
 0x5ae   :  { %v5505_v27 = vpop.eup %4827  ;;  %1422 = vrot.lane.b32.xlu1 %v5503_v31, %s5021_s29  ;;  %v956_v36 = vmul.f32 1.442695, %v946_v7 }
 0x5af   :  { %1426 = vrot.lane.b32.xlu0 %v5505_v27, %s5021_s29  ;;  %v5511_v29 = vpop.eup %4829  ;;  %v931_v50 = vpop.xlane.xlu0 %930 }
 0x5b0   :  { %v947_v13 = vsub.f32 %v5449_v39, %v931_v50  ;;  %4839 = vpow2.f32 %v956_v36 }
 0x5b2   :  { %v5513_v33 = vpop.eup %4831  ;;  %1428 = vrot.lane.b32.xlu1 %v5511_v29, %s5021_s29  ;;  %v958_v35 = vmul.f32 1.442695, %v947_v13 }
 0x5b3   :  { %1430 = vrot.lane.b32.xlu0 %v5513_v33, %s5021_s29  ;;  %v5519_v38 = vpop.eup %4833  ;;  %v934_v54 = vpop.xlane.xlu0 %933 }
 0x5b4   :  { %v948_v16 = vsub.f32 %v5459_v45, %v934_v54  ;;  %4841 = vpow2.f32 %v958_v35 }
 0x5b5   :  { %v5540_v25 = vpop.eup %4835 }
 0x5b6   :  { %1432 = vrot.lane.b32.xlu1 %v5519_v38, %s5021_s29  ;;  %v960_v40 = vmul.f32 1.442695, %v948_v16  ;;  %v5544_v63 = vpop.eup %4837  ;;  %v971_v34 = vsel %vm919_vm6, %v5540_v25, 0.0 }
 0x5b7   :  { %v968_v28 = vsel %vm919_vm6, %v5544_v63, 0.0 }
 0x5b8   :  { %4843 = vpow2.f32 %v960_v40 }
 0x5ba   :  { %v5546_v6 = vpop.eup %4839 }
 0x5be   :  { %v5552_v30 = vpop.eup %4841 }
 0x5bf   :  { %v977_v22 = vsel %vm919_vm6, %v5552_v30, 0.0 }
 0x5d2   :  { %939 = vmax.xlane.f32.xlu0 %v938_v59  ;;  %v974_v59 = vsel %vm919_vm6, %v5546_v6, 0.0 }
 0x5da   :  { %936 = vmax.xlane.f32.xlu1 %v935_v42  ;;  %v5558_v42 = vpop.eup %4843 }
 0x5de   :  { %942 = vmax.xlane.f32.xlu1 %v941_v19  ;;  %v980_v19 = vsel %vm919_vm6, %v5558_v42, 0.0 }
 0x618   :  { %v1421_v61 = vpop.permute.xlu1 %1420 }
 0x619   :  { %v1419_v62 = vpop.permute.xlu0 %1418  ;;  %v1445_v0 = vsel %vm919_vm6, %v1421_v61, 0.0 }
 0x61a   :  { %1446 = vadd.xlane.f32.xlu1 %v1445_v0  ;;  %v1442_v2 = vsel %vm919_vm6, %v1419_v62, 0.0 }
 0x61b   :  { %1443 = vadd.xlane.f32.xlu0 %v1442_v2 }
 0x61c   :  { %v1425_v14 = vpop.permute.xlu1 %1424 }
 0x61d   :  { %v1451_v15 = vsel %vm919_vm6, %v1425_v14, 0.0 }
 0x61e   :  { %1452 = vadd.xlane.f32.xlu1 %v1451_v15 }
 0x620   :  { %v1423_v17 = vpop.permute.xlu1 %1422 }
 0x621   :  { %v1427_v18 = vpop.permute.xlu0 %1426  ;;  %v1448_v55 = vsel %vm919_vm6, %v1423_v17, 0.0 }
 0x622   :  { %1449 = vadd.xlane.f32.xlu0 %v1448_v55  ;;  %v1454_v23 = vsel %vm919_vm6, %v1427_v18, 0.0 }
 0x624   :  { %v1429_v21 = vpop.permute.xlu1 %1428 }
 0x625   :  { %v1457_v39 = vsel %vm919_vm6, %v1429_v21, 0.0  ;;  %v1431_v51 = vpop.permute.xlu0 %1430 }
 0x626   :  { %1458 = vadd.xlane.f32.xlu1 %v1457_v39  ;;  %1455 = vadd.xlane.f32.xlu0 %v1454_v23  ;;  %v1460_v26 = vsel %vm919_vm6, %v1431_v51, 0.0 }
 0x628   :  { %v1433_v1 = vpop.permute.xlu1 %1432 }
 0x629   :  { %v1463_v45 = vsel %vm919_vm6, %v1433_v1, 0.0 }
 0x62a   :  { %1464 = vadd.xlane.f32.xlu1 %v1463_v45  ;;  %1461 = vadd.xlane.f32.xlu0 %v1460_v26 }
 0x62e   :  { %972 = vadd.xlane.f32.xlu1 %v971_v34  ;;  %969 = vadd.xlane.f32.xlu0 %v968_v28 }
 0x632   :  { %978 = vadd.xlane.f32.xlu1 %v977_v22  ;;  %975 = vadd.xlane.f32.xlu0 %v974_v59 }
 0x636   :  { %981 = vadd.xlane.f32.xlu0 %v980_v19 }
 0x65f   :  { %v940_v48 = vpop.xlane.xlu0 %939 }
 0x660   :  { %v950_v50 = vsub.f32 %v5467_v43, %v940_v48 }
 0x662   :  { %v964_v52 = vmul.f32 1.442695, %v950_v50 }
 0x664   :  { %4845 = vpow2.f32 %v964_v52 }
 0x667   :  { %v937_v54 = vpop.xlane.xlu1 %936 }
 0x668   :  { %v949_v56 = vsub.f32 %v5457_v44, %v937_v54 }
 0x66a   :  { %v962_v57 = vmul.f32 1.442695, %v949_v56 }
 0x66b   :  { %v943_v61 = vpop.xlane.xlu1 %942 }
 0x66c   :  { %4847 = vpow2.f32 %v962_v57  ;;  %v951_v62 = vsub.f32 %v5465_v49, %v943_v61 }
 0x66e   :  { %v5569_v0 = vpop.eup %4845  ;;  %v966_v2 = vmul.f32 1.442695, %v951_v62 }
 0x66f   :  { %v986_v4 = vsel %vm919_vm6, %v5569_v0, 0.0 }
 0x670   :  { %4849 = vpow2.f32 %v966_v2  ;;  %987 = vadd.xlane.f32.xlu0 %v986_v4 }
 0x676   :  { %v5573_v7 = vpop.eup %4847 }
 0x677   :  { %v983_v43 = vsel %vm919_vm6, %v5573_v7, 0.0 }
 0x678   :  { %984 = vadd.xlane.f32.xlu1 %v983_v43 }
 0x67a   :  { %v5577_v44 = vpop.eup %4849 }
 0x67b   :  { %v989_v11 = vsel %vm919_vm6, %v5577_v44, 0.0 }
 0x67c   :  { %990 = vadd.xlane.f32.xlu1 %v989_v11 }
 0x686   :  { %4756 = vrot.lane.b32.xlu0 %v5391_v8, %s5024_s30 }
 0x68a   :  { %4776 = vrot.lane.b32.xlu0 %v5438_v24, %s5021_s29 }
 0x68d   :  { %4761 = vrot.lane.b32.xlu1 %v5391_v8, %s5021_s29 }
 0x68e   :  { %4781 = vrot.lane.b32.xlu0 %v5438_v24, %s5025_s5 }
 0x691   :  { %4766 = vrot.lane.b32.xlu1 %v5391_v8, %s5025_s5 }
 0x695   :  { %4771 = vrot.lane.b32.xlu1 %v5438_v24, %s5024_s30 }
 0x6a7   :  { %v1447_v49 = vpop.xlane.xlu1 %1446 }
 0x6a8   :  { %4851 = vrcp.f32 %v1447_v49  ;;  %v1444_v13 = vpop.xlane.xlu0 %1443 }
 0x6a9   :  { %4853 = vrcp.f32 %v1444_v13 }
 0x6ab   :  { %v1453_v14 = vpop.xlane.xlu1 %1452 }
 0x6ac   :  { %4855 = vrcp.f32 %v1453_v14 }
 0x6af   :  { %v1450_v15 = vpop.xlane.xlu0 %1449 }
 0x6b0   :  { %4857 = vrcp.f32 %v1450_v15 }
 0x6b2   :  { %v4852_v36 = vpop.eup %4851 }
 0x6b3   :  { %v4854_v35 = vpop.eup %4853  ;;  %v1469_v16 = vmul.f32 %v4852_v36, %v5491_v12  ;;  %v1459_v17 = vpop.xlane.xlu1 %1458 }
 0x6b4   :  { %v1456_v18 = vpop.xlane.xlu0 %1455  ;;  %v1467_v55 = vmul.f32 %v4854_v35, %v5493_v10  ;;  %4859 = vrcp.f32 %v1459_v17 }
 0x6b5   :  { %4861 = vrcp.f32 %v1456_v18  ;;  %v1483_v8 = vsel %vm1361_vm5, %v1469_v16, 0.0 }
 0x6b6   :  { %v4856_v24 = vpop.eup %4855  ;;  %v1482_v40 = vsel %vm1361_vm5, %v1467_v55, 0.0 }
 0x6b7   :  { %v1465_v21 = vpop.xlane.xlu1 %1464  ;;  %v1484_v23 = vadd.f32 %v1483_v8, %v1482_v40  ;;  %v1473_v51 = vmul.f32 %v4856_v24, %v5499_v20 }
 0x6b8   :  { %v1462_v39 = vpop.xlane.xlu0 %1461  ;;  %4863 = vrcp.f32 %v1465_v21 }
 0x6b9   :  { %4865 = vrcp.f32 %v1462_v39  ;;  %v1485_v1 = vrot.slane %v1484_v23, 4  ;;  %v1568_v59 = vsel %vm1361_vm5, %v1473_v51, 0.0 }
 0x6ba   :  { %v4858_v12 = vpop.eup %4857 }
 0x6bb   :  { %v1471_v45 = vmul.f32 %v4858_v12, %v5503_v31  ;;  %v973_v26 = vpop.xlane.xlu1 %972  ;;  %v1486_v34 = vadd.f32 %v1485_v1, %v1484_v23 }
 0x6bc   :  { %v970_v10 = vpop.xlane.xlu0 %969  ;;  %4867 = vrcp.f32 %v973_v26 }
 0x6bd   :  { %4869 = vrcp.f32 %v970_v10  ;;  %v1487_v28 = vrot.slane %v1486_v34, 2  ;;  %v1567_v22 = vsel %vm1361_vm5, %v1471_v45, 0.0 }
 0x6be   :  { %v4860_v19 = vpop.eup %4859  ;;  %v1569_v48 = vadd.f32 %v1568_v59, %v1567_v22 }
 0x6bf   :  { %v4862_v50 = vpop.eup %4861  ;;  %v1477_v20 = vmul.f32 %v4860_v19, %v5511_v29  ;;  %v1488_v52 = vadd.f32 %v1487_v28, %v1486_v34 }
 0x6c0   :  { %v1475_v54 = vmul.f32 %v4862_v50, %v5505_v27  ;;  %v1570_v56 = vrot.slane %v1569_v48, 4  ;;  %v979_v50 = vpop.xlane.xlu1 %978 }
 0x6c1   :  { %v1489_v31 = vrot.slane %v1488_v52, 1  ;;  %v1661_v57 = vsel %vm1361_vm5, %v1477_v20, 0.0  ;;  %v976_v20 = vpop.xlane.xlu0 %975  ;;  %4871 = vrcp.f32 %v979_v50 }
 0x6c2   :  { %v4864_v61 = vpop.eup %4863  ;;  %v1571_v62 = vadd.f32 %v1570_v56, %v1569_v48  ;;  %v1660_v2 = vsel %vm1361_vm5, %v1475_v54, 0.0  ;;  %4873 = vrcp.f32 %v976_v20 }
 0x6c3   :  { %v4866_v4 = vpop.eup %4865  ;;  %v1481_v43 = vmul.f32 %v4864_v61, %v5519_v38  ;;  %v1490_v11 = vadd.f32 %v1489_v31, %v1488_v52  ;;  %v1662_v49 = vadd.f32 %v1661_v57, %v1660_v2 }
 0x6c4   :  { %v1479_v13 = vmul.f32 %v4866_v4, %v5513_v33  ;;  %v1572_v14 = vrot.slane %v1571_v62, 2 }
 0x6c5   :  { %v1491_v29 = vmul.f32 0.0625, %v1490_v11  ;;  %v1663_v15 = vrot.slane %v1662_v49, 4  ;;  %v1752_v27 = vsel %vm1361_vm5, %v1481_v43, 0.0 }
 0x6c6   :  { %v4868_v36 = vpop.eup %4867  ;;  %v1573_v35 = vadd.f32 %v1572_v14, %v1571_v62  ;;  %v1751_v16 = vsel %vm1361_vm5, %v1479_v13, 0.0 }
 0x6c7   :  { %v4870_v17 = vpop.eup %4869  ;;  %v995_v18 = vmul.f32 %v4868_v36, %v5540_v25  ;;  %1493 = vrot.lane.b32.xlu1 %v1491_v29, %s5021_s29  ;;  %v1664_v55 = vadd.f32 %v1663_v15, %v1662_v49  ;;  %v1753_v38 = vadd.f32 %v1752_v27, %v1751_v16  ;;  %v982_v15 = vpop.xlane.xlu0 %981 }
 0x6c8   :  { %v993_v8 = vmul.f32 %v4870_v17, %v5544_v63  ;;  %v1574_v24 = vrot.slane %v1573_v35, 1  ;;  %4875 = vrcp.f32 %v982_v15 }
 0x6c9   :  { %v1009_v33 = vsel %vm919_vm6, %v995_v18, 0.0  ;;  %v1665_v40 = vrot.slane %v1664_v55, 2  ;;  %v1754_v21 = vrot.slane %v1753_v38, 4 }
 0x6ca   :  { %v1008_v39 = vsel %vm919_vm6, %v993_v8, 0.0  ;;  %v1575_v23 = vadd.f32 %v1574_v24, %v1573_v35 }
 0x6cb   :  { %v1010_v51 = vadd.f32 %v1009_v33, %v1008_v39  ;;  %v1666_v1 = vadd.f32 %v1665_v40, %v1664_v55  ;;  %v1755_v12 = vadd.f32 %v1754_v21, %v1753_v38  ;;  %v4872_v61 = vpop.eup %4871 }
 0x6cc   :  { %v1576_v45 = vmul.f32 0.0625, %v1575_v23  ;;  %v4874_v62 = vpop.eup %4873  ;;  %v999_v2 = vmul.f32 %v4872_v61, %v5552_v30 }
 0x6cd   :  { %v1011_v26 = vrot.slane %v1010_v51, 4  ;;  %v1667_v25 = vrot.slane %v1666_v1, 1  ;;  %v1756_v10 = vrot.slane %v1755_v12, 2  ;;  %v997_v4 = vmul.f32 %v4874_v62, %v5546_v6 }
 0x6ce   :  { %1578 = vrot.lane.b32.xlu1 %v1576_v45, %s5021_s29  ;;  %v1093_v43 = vsel %vm919_vm6, %v999_v2, 0.0 }
 0x6cf   :  { %v1012_v34 = vadd.f32 %v1011_v26, %v1010_v51  ;;  %v1668_v28 = vadd.f32 %v1667_v25, %v1666_v1  ;;  %v1757_v63 = vadd.f32 %v1756_v10, %v1755_v12  ;;  %v1092_v11 = vsel %vm919_vm6, %v997_v4, 0.0 }
 0x6d0   :  { %v1094_v49 = vadd.f32 %v1093_v43, %v1092_v11 }
 0x6d1   :  { %v1013_v22 = vrot.slane %v1012_v34, 2  ;;  %v1669_v59 = vmul.f32 0.0625, %v1668_v28  ;;  %v1758_v19 = vrot.slane %v1757_v63, 1 }
 0x6d2   :  { %v1095_v13 = vrot.slane %v1094_v49, 4  ;;  %v4876_v24 = vpop.eup %4875 }
 0x6d3   :  { %v1014_v48 = vadd.f32 %v1013_v22, %v1012_v34  ;;  %1671 = vrot.lane.b32.xlu0 %v1669_v59, %s5021_s29  ;;  %v1759_v52 = vadd.f32 %v1758_v19, %v1757_v63  ;;  %v1001_v23 = vmul.f32 %v4876_v24, %v5558_v42  ;;  %v3853_v24 = vld [vmem:[%s6256_s0 + $0x48] sm:$0xff] }
 0x6d4   :  { %v1096_v14 = vadd.f32 %v1095_v13, %v1094_v49 }
 0x6d5   :  { %v1015_v54 = vrot.slane %v1014_v48, 1  ;;  %v1760_v56 = vmul.f32 0.0625, %v1759_v52  ;;  %v1183_v45 = vsel %vm919_vm6, %v1001_v23, 0.0 }
 0x6d6   :  { %v1097_v29 = vrot.slane %v1096_v14, 2 }
 0x6d7   :  { %v1016_v31 = vadd.f32 %v1015_v54, %v1014_v48  ;;  %1762 = vrot.lane.b32.xlu1 %v1760_v56, %s5021_s29 }
 0x6d8   :  { %v1098_v27 = vadd.f32 %v1097_v29, %v1096_v14 }
 0x6d9   :  { %v1018_v57 = vmul.f32 0.0625, %v1016_v31 }
 0x6da   :  { %v1099_v35 = vrot.slane %v1098_v27, 1 }
 0x6db   :  { %4236 = vmatmul.mubr.msk.f32.vlgmr.msra.gmra.mrb[14].mxu0 %vm919_vm6, %v1018_v57 }
 0x6dc   :  { %4242 = vmatprep.mubr.msk.f32.mxu0 %vm5022_vm7, %v5023_v46  ;;  %v1100_v55 = vadd.f32 %v1099_v35, %v1098_v27 }
 0x6de   :  { %v1101_v38 = vmul.f32 0.0625, %v1100_v55 }
 0x6fd   :  { %v988_v36 = vpop.xlane.xlu0 %987 }
 0x6fe   :  { %4877 = vrcp.f32 %v988_v36 }
 0x701   :  { %v4757_v16 = vpop.permute.xlu0 %4756 }
 0x702   :  { %v4759_v17 = vunpack.i.h.bf16 %v4757_v16  ;;  %v4758_v18 = vunpack.i.l.bf16 %v4757_v16 }
 0x704   :  { %v4575_v30 = vpack.c.bf16 %v4759_v17, %v4758_v18 }
 0x705   :  { %v985_v6 = vpop.xlane.xlu1 %984  ;;  %v4777_v29 = vpop.permute.xlu0 %4776 }
 0x706   :  { %4879 = vrcp.f32 %v985_v6  ;;  %4576 = vmatpush3.bf16.msra.mxu0 %v4575_v30  ;;  %v4779_v15 = vunpack.i.h.bf16 %v4777_v29  ;;  %v4778_v27 = vunpack.i.l.bf16 %v4777_v29 }
 0x707   :  { %4577 = vmatprep.subr.bf16.mxu0 %v5020_v47 }
 0x708   :  { %v4878_v39 = vpop.eup %4877  ;;  %v4590_v36 = vpack.c.bf16 %v4779_v15, %v4778_v27 }
 0x709   :  { %v991_v8 = vpop.xlane.xlu1 %990  ;;  %4243 = vmatmul.mubr.msk.f32.vlgmr.msra.gmra.mrb[16].mxu0 %vm919_vm6, %v1101_v38  ;;  %v1005_v26 = vmul.f32 %v4878_v39, %v5569_v0  ;;  %v4782_v35 = vpop.permute.xlu0 %4781  ;;  %v3852_v38 = vld [vmem:[%s6256_s0 + $0x40] sm:$0xff]  ;;  %v5694_v39 = vld [vmem:[#allocation2 + $0x48] sm:$0xff] }
 0x70a   :  { %4881 = vrcp.f32 %v991_v8  ;;  %4249 = vmatprep.mubr.msk.f32.mxu0 %vm5022_vm7, %v5023_v46  ;;  %v4784_v17 = vunpack.i.h.bf16 %v4782_v35  ;;  %v4783_v18 = vunpack.i.l.bf16 %v4782_v35 }
 0x70b   :  { %v1272_v42 = vsel %vm919_vm6, %v1005_v26, 0.0 }
 0x70c   :  { %v4593_v55 = vpack.c.bf16 %v4784_v17, %v4783_v18 }
 0x70d   :  { %v4762_v33 = vpop.permute.xlu1 %4761 }
 0x70e   :  { %v4764_v40 = vunpack.i.h.bf16 %v4762_v33  ;;  %v4763_v21 = vunpack.i.l.bf16 %v4762_v33  ;;  %v3854_v33 = vld [vmem:[%s6256_s0 + $0x50] sm:$0xff] }
 0x710   :  { %v4880_v51 = vpop.eup %4879  ;;  %v4578_v1 = vpack.c.bf16 %v4764_v40, %v4763_v21  ;;  %v3858_v40 = vld [vmem:[%s6256_s0 + $0x70] sm:$0xff]  ;;  %v3859_v21 = vld [vmem:[%s6256_s0 + $0x78] sm:$0xff] }
 0x711   :  { %v1003_v12 = vmul.f32 %v4880_v51, %v5573_v7  ;;  %v4767_v48 = vpop.permute.xlu1 %4766 }
 0x712   :  { %4579 = vmatpush3.bf16.msra.mxu0 %v4578_v1  ;;  %v4769_v56 = vunpack.i.h.bf16 %v4767_v48  ;;  %v4768_v31 = vunpack.i.l.bf16 %v4767_v48 }
 0x713   :  { %v1184_v25 = vsel %vm919_vm6, %v1003_v12, 0.0  ;;  %4580 = vmatprep.subr.bf16.mxu0 %v5020_v47 }
 0x714   :  { %v4882_v10 = vpop.eup %4881  ;;  %v1185_v34 = vadd.f32 %v1184_v25, %v1183_v45  ;;  %v4581_v4 = vpack.c.bf16 %v4769_v56, %v4768_v31 }
 0x715   :  { %v1007_v28 = vmul.f32 %v4882_v10, %v5577_v44  ;;  %v4772_v57 = vpop.permute.xlu1 %4771 }
 0x716   :  { %v1186_v63 = vrot.slane %v1185_v34, 4  ;;  %v4774_v43 = vunpack.i.h.bf16 %v4772_v57  ;;  %v4773_v11 = vunpack.i.l.bf16 %v4772_v57 }
 0x717   :  { %v1273_v22 = vsel %vm919_vm6, %v1007_v28, 0.0  ;;  %v63_v28 = vld [vmem:[#allocation2 + $0x8] sm:$0xff] }
 0x718   :  { %v1274_v59 = vadd.f32 %v1273_v22, %v1272_v42  ;;  %v1187_v7 = vadd.f32 %v1186_v63, %v1185_v34  ;;  %v4587_v14 = vpack.c.bf16 %v4774_v43, %v4773_v11  ;;  %v62_v34 = vld [vmem:[#allocation2] sm:$0xff]  ;;  %v64_v42 = vld [vmem:[#allocation2 + $0x10] sm:$0xff]  ;;  %v65_v22 = vld [vmem:[#allocation2 + $0x18] sm:$0xff] }
 0x719   :  { %v5703_v63 = vpack.c.bf16 %v63_v28, %v62_v34 }
 0x71a   :  { %v1275_v19 = vrot.slane %v1274_v59, 4  ;;  %v1188_v50 = vrot.slane %v1187_v7, 2 }
 0x71c   :  { %v1189_v20 = vadd.f32 %v1188_v50, %v1187_v7  ;;  %v1276_v0 = vadd.f32 %v1275_v19, %v1274_v59  ;;  %v5706_v59 = vpack.c.bf16 %v65_v22, %v64_v42  ;;  %v66_v7 = vld [vmem:[#allocation2 + $0x20] sm:$0xff]  ;;  %v67_v19 = vld [vmem:[#allocation2 + $0x28] sm:$0xff]  ;;  %v68_v50 = vld [vmem:[#allocation2 + $0x30] sm:$0xff] }
 0x71d   :  { %v5711_v48 = vpack.c.bf16 %v67_v19, %v66_v7  ;;  %v5767_v42 = vld [vmem:[#allocation2 + $0x50] sm:$0xff] }
 0x71e   :  { %v1190_v52 = vrot.slane %v1189_v20, 1  ;;  %v1277_v54 = vrot.slane %v1276_v0, 2 }
 0x720   :  { %v1191_v61 = vadd.f32 %v1190_v52, %v1189_v20  ;;  %v1278_v62 = vadd.f32 %v1277_v54, %v1276_v0  ;;  %v69_v20 = vld [vmem:[#allocation2 + $0x38] sm:$0xff] }
 0x721   :  { %v5715_v52 = vpack.c.bf16 %v69_v20, %v68_v50 }
 0x722   :  { %v1192_v44 = vmul.f32 0.0625, %v1191_v61  ;;  %v1279_v2 = vrot.slane %v1278_v62, 1 }
 0x724   :  { %4250 = vmatmul.mubr.msk.f32.vlgmr.msra.gmra.mrb[18].mxu0 %vm919_vm6, %v1192_v44  ;;  %v1280_v49 = vadd.f32 %v1279_v2, %v1278_v62 }
 0x725   :  { %4582 = vmatpush3.bf16.msra.mxu0 %v4581_v4  ;;  %4256 = vmatprep.mubr.msk.f32.mxu0 %vm5022_vm7, %v5023_v46  ;;  %v4952_v4 = vld [vmem:[%s6258_s2 + $0xb8] ss:$0 sm:$0xff] }
 0x726   :  { %4586 = vmatprep.subr.bf16.mxu0 %v5020_v47  ;;  %v1281_v13 = vmul.f32 0.0625, %v1280_v49 }
 0x728   :  { %4257 = vmatmul.mubr.msk.f32.vlgmr.msra.gmra.mrb[20].mxu0 %vm919_vm6, %v1281_v13 }
 0x729   :  { %4588 = vmatpush3.bf16.msra.mxu0 %v4587_v14  ;;  %4270 = vmatprep.mubr.msk.f32.mxu0 %vm5022_vm7, %v5023_v46 }
 0x72a   :  { %4592 = vmatprep.subr.bf16.mxu0 %v5020_v47 }
 0x739   :  { %v1494_v16 = vpop.permute.xlu1 %1493 }
 0x73a   :  { %4264 = vmatmul.mubr.msk.f32.vlgmr.msra.gmra.mrb[18].mxu1 %vm919_vm6, %v1494_v16 }
 0x73b   :  { %4591 = vmatpush3.bf16.msra.mxu1 %v4590_v36  ;;  %4277 = vmatprep.mubr.msk.f32.mxu1 %vm5022_vm7, %v5023_v46 }
 0x73c   :  { %4595 = vmatprep.subr.bf16.mxu1 %v5020_v47 }
 0x740   :  { %v1579_v30 = vpop.permute.xlu1 %1578 }
 0x741   :  { %4271 = vmatmul.mubr.msk.f32.vlgmr.msra.gmra.mrb[22].mxu0 %vm919_vm6, %v1579_v30 }
 0x742   :  { %4594 = vmatpush3.bf16.msra.mxu0 %v4593_v55  ;;  %4284 = vmatprep.mubr.msk.f32.mxu0 %vm5022_vm7, %v5023_v46 }
 0x743   :  { %4608 = vmatprep.subr.bf16.mxu0 %v5080_v3 }
 0x745   :  { %v1672_v6 = vpop.permute.xlu0 %1671 }
 0x746   :  { %4278 = vmatmul.mubr.msk.f32.vlgmr.msra.gmra.mrb[20].mxu1 %vm919_vm6, %v1672_v6 }
 0x747   :  { %4303 = vmatprep.mubr.msk.f32.mxu1 %vm5022_vm7, %v5023_v46  ;;  %4597 = vmatpush3.bf16.msra.mxu1 %v5703_v63 }
 0x748   :  { %4598 = vmatprep.subr.bf16.mxu1 %v5020_v47 }
 0x749   :  { %v1763_v8 = vpop.permute.xlu1 %1762 }
 0x74a   :  { %4285 = vmatmul.mubr.msk.f32.vlgmr.msra.gmra.mrb[24].mxu0 %vm919_vm6, %v1763_v8 }
 0x74b   :  { %4610 = vmatpush3.bf16.msra.mxu0 %v5080_v3  ;;  %4318 = vmatprep.mubr.msk.f32.mxu0 %vm85_vm0, %v3852_v38  ;;  %v3855_v3 = vld [vmem:[%s6256_s0 + $0x58] sm:$0xff] }
 0x74c   :  { %4612 = vmatprep.subr.bf16.mxu0 %v5085_v5  ;;  %4600 = vmatpush3.bf16.msra.mxu1 %v5706_v59 }
 0x74d   :  { %4601 = vmatprep.subr.bf16.mxu1 %v5020_v47 }
 0x74f   :  { %4614 = vmatpush3.bf16.msra.mxu0 %v5085_v5  ;;  %v3856_v5 = vld [vmem:[%s6256_s0 + $0x60] sm:$0xff] }
 0x750   :  { %4616 = vmatprep.subr.bf16.mxu0 %v5100_v9  ;;  %4603 = vmatpush3.bf16.msra.mxu1 %v5711_v48 }
 0x751   :  { %4604 = vmatprep.subr.bf16.mxu1 %v5020_v47 }
 0x753   :  { %4618 = vmatpush3.bf16.msra.mxu0 %v5100_v9  ;;  %v3857_v9 = vld [vmem:[%s6256_s0 + $0x68] sm:$0xff]  ;;  %s5027_s0 = smov 24  }
 0x754   :  { %4606 = vmatpush3.bf16.msra.mxu1 %v5715_v52 }
 0x755   :  { %4636 = vmatprep.subr.bf16.mxu1 %v5182_v53 }
 0x756   :  { %4319 = vmatmul.mubr.msk.f32.vlgmr.msra.gmra.mrb[26].mxu0 %vm85_vm0, %v3853_v24 }
 0x757   :  { %4321 = vmatprep.mubr.msk.f32.mxu0 %vm85_vm0, %v3854_v33 }
 0x75a   :  { %4322 = vmatmul.mubr.msk.f32.gmra.mrb[28].mxu0 %vm85_vm0, %v3855_v3 }
 0x75b   :  { %4324 = vmatprep.mubr.msk.f32.mxu0 %vm85_vm0, %v3856_v5 }
 0x75e   :  { %4325 = vmatmul.mubr.msk.f32.gmra.mrb[30].mxu0 %vm85_vm0, %v3857_v9 }
 0x75f   :  { %4327 = vmatprep.mubr.msk.f32.mxu0 %vm85_vm0, %v3858_v40 }
 0x762   :  { %4328 = vmatmul.mubr.msk.f32.gmra.mrb[32].mxu0 %vm85_vm0, %v3859_v21 }
 0x763   :  { %4346 = vmatprep.mubr.msk.f32.mxu0 %vm291_vm1, %v5694_v39 }
 0x7ae   :  { %v5698_v23 = vpop.f32.mrb[14].mxu0 }
 0x7af   :  { %v4237_v51 = vpop.f32.mrb[15].mxu0 }
 0x7dc   :  { %v1179_v1 = vpop.f32.mrb[16].mxu0 }
 0x7dd   :  { %1843 = vrot.lane.b32.xlu0 %v1179_v1, %s5019_s26  ;;  %v4244_v12 = vpop.f32.mrb[17].mxu0 }
 0x7f7   :  { %v1268_v45 = vpop.f32.mrb[18].mxu0 }
 0x7f8   :  { %1847 = vrot.lane.b32.xlu1 %v1268_v45, %s5026_s21  ;;  %v4251_v26 = vpop.f32.mrb[19].mxu0 }
 0x7fb   :  { %v1357_v25 = vpop.f32.mrb[20].mxu0 }
 0x7fc   :  { %1851 = vrot.lane.b32.xlu0 %v1357_v25, %s5027_s0  ;;  %v4258_v10 = vpop.f32.mrb[21].mxu0 }
 0x80d   :  { %v1563_v0 = vpop.f32.mrb[18].mxu1 }
 0x80e   :  { %v4265_v54 = vpop.f32.mrb[19].mxu1  ;;  %1855 = vrot.lane.b32.xlu1 %v1563_v0, %s5028_s22 }
 0x814   :  { %v1656_v56 = vpop.f32.mrb[22].mxu0 }
 0x815   :  { %1859 = vrot.lane.b32.xlu0 %v1656_v56, %s5029_s23  ;;  %v4272_v31 = vpop.f32.mrb[23].mxu0 }
 0x819   :  { %v1747_v57 = vpop.f32.mrb[20].mxu1 }
 0x81a   :  { %v4279_v61 = vpop.f32.mrb[21].mxu1  ;;  %1863 = vrot.lane.b32.xlu1 %v1747_v57, %s5030_s24 }
 0x81d   :  { %v1838_v62 = vpop.f32.mrb[24].mxu0 }
 0x81e   :  { %1867 = vrot.lane.b32.xlu0 %v1838_v62, %s5031_s25  ;;  %v4286_v44 = vpop.f32.mrb[25].mxu0  ;;  %v3870_v62 = vld [vmem:[%s6257_s1 + $0x40] sm:$0xff] }
 0x81f   :  { %v4954_v44 = vld [vmem:[%s6258_s2 + $0x50] sm:$0xff] }
 0x829   :  { %v4320_v2 = vpop.f32.mrb[26].mxu0 }
 0x82a   :  { %v5726_v43 = vadd.f32 %v4952_v4, %v4320_v2  ;;  %v2052_v11 = vpop.f32.mrb[27].mxu0  ;;  %v3871_v2 = vld [vmem:[%s6257_s1 + $0x48] sm:$0xff] }
 0x82b   :  { %v5728_v49 = vadd.f32 %v4952_v4, %v2052_v11  ;;  %v3875_v11 = vld [vmem:[%s6257_s1 + $0x68] sm:$0xff] }
 0x82c   :  { %v2092_v13 = vsel %vm215_vm2, %v5726_v43, 0.0 }
 0x82d   :  { %v2091_v14 = vsel %vm215_vm2, %v5728_v49, 0.0  ;;  %v4323_v29 = vpop.f32.mrb[28].mxu0  ;;  %v4619_v15 = vpack.c.bf16 %v5726_v43, %v5728_v49 }
 0x82e   :  { %v2093_v27 = vadd.f32 %v2092_v13, %v2091_v14  ;;  %v5736_v36 = vadd.f32 %v4952_v4, %v4323_v29  ;;  %v2062_v35 = vpop.f32.mrb[29].mxu0  ;;  %v3876_v13 = vld [vmem:[%s6257_s1 + $0x70] sm:$0xff]  ;;  %v3877_v14 = vld [vmem:[%s6257_s1 + $0x78] sm:$0xff] }
 0x82f   :  { %v5738_v16 = vadd.f32 %v4952_v4, %v2062_v35  ;;  %4620 = vmatprep.subr.bf16.mxu0 %v4619_v15 }
 0x830   :  { %4622 = vmatpush3.bf16.msra.mxu0 %v4619_v15  ;;  %v2096_v17 = vsel %vm215_vm2, %v5736_v36, 0.0 }
 0x831   :  { %v2094_v18 = vsel %vm215_vm2, %v5738_v16, 0.0  ;;  %v4326_v55 = vpop.f32.mrb[30].mxu0  ;;  %v4623_v30 = vpack.c.bf16 %v5736_v36, %v5738_v16 }
 0x832   :  { %v2095_v6 = vadd.f32 %v2094_v18, %v2093_v27  ;;  %v5746_v38 = vadd.f32 %v4952_v4, %v4326_v55  ;;  %v2072_v8 = vpop.f32.mrb[31].mxu0 }
 0x833   :  { %v5748_v24 = vadd.f32 %v4952_v4, %v2072_v8  ;;  %4624 = vmatprep.subr.bf16.mxu0 %v4623_v30 }
 0x834   :  { %v2097_v33 = vadd.f32 %v2096_v17, %v2095_v6  ;;  %4626 = vmatpush3.bf16.msra.mxu0 %v4623_v30  ;;  %v2100_v3 = vsel %vm215_vm2, %v5746_v38, 0.0 }
 0x835   :  { %v2098_v5 = vsel %vm215_vm2, %v5748_v24, 0.0  ;;  %v4329_v9 = vpop.f32.mrb[32].mxu0  ;;  %v4627_v40 = vpack.c.bf16 %v5746_v38, %v5748_v24 }
 0x836   :  { %v2099_v21 = vadd.f32 %v2098_v5, %v2097_v33  ;;  %v5756_v51 = vadd.f32 %v4952_v4, %v4329_v9  ;;  %v2082_v1 = vpop.f32.mrb[33].mxu0 }
 0x837   :  { %v5758_v12 = vadd.f32 %v4952_v4, %v2082_v1  ;;  %4628 = vmatprep.subr.bf16.mxu0 %v4627_v40  ;;  %v3872_v4 = vld [vmem:[%s6257_s1 + $0x50] sm:$0xff] }
 0x838   :  { %v2101_v45 = vadd.f32 %v2100_v3, %v2099_v21  ;;  %4630 = vmatpush3.bf16.msra.mxu0 %v4627_v40  ;;  %v2104_v25 = vsel %vm215_vm2, %v5756_v51, 0.0 }
 0x839   :  { %v2102_v26 = vsel %vm215_vm2, %v5758_v12, 0.0  ;;  %v4631_v10 = vpack.c.bf16 %v5756_v51, %v5758_v12 }
 0x83a   :  { %v2103_v34 = vadd.f32 %v2102_v26, %v2101_v45 }
 0x83b   :  { %4632 = vmatprep.subr.bf16.mxu0 %v4631_v10 }
 0x83c   :  { %v2105_v28 = vadd.f32 %v2104_v25, %v2103_v34  ;;  %4634 = vmatpush3.bf16.msra.mxu0 %v4631_v10 }
 0x83d   :  { %4660 = vmatprep.subr.bf16.mxu0 %v5318_v37 }
 0x83e   :  { %2106 = vadd.xlane.f32.xlu1 %v2105_v28 }
 0x83f   :  { %4347 = vmatmul.mubr.msk.f32.vlgmr.msra.gmra.mrb[34].mxu0 %vm291_vm1, %v5767_v42 }
 0x840   :  { %4662 = vmatpush3.bf16.msra.mxu0 %v5318_v37 }
 0x841   :  { %4664 = vmatprep.subr.bf16.mxu0 %v5328_v41 }
 0x844   :  { %4666 = vmatpush3.bf16.msra.mxu0 %v5328_v41 }
 0x84f   :  { %v1844_v22 = vpop.permute.xlu0 %1843 }
 0x850   :  { %v1871_v20 = vsel %vm1870_vm8, %v5698_v23, %v1844_v22 }
 0x86a   :  { %v1848_v7 = vpop.permute.xlu1 %1847 }
 0x86b   :  { %v1872_v0 = vsel %vm919_vm6, %v1871_v20, %v1848_v7 }
 0x86e   :  { %v1852_v19 = vpop.permute.xlu0 %1851 }
 0x86f   :  { %v1874_v56 = vsel %vm1873_vm9, %v1872_v0, %v1852_v19 }
 0x880   :  { %v1856_v50 = vpop.permute.xlu1 %1855 }
 0x881   :  { %v1875_v37 = vsel %vm215_vm2, %v1874_v56, %v1856_v50 }
 0x887   :  { %v1860_v54 = vpop.permute.xlu0 %1859 }
 0x888   :  { %v1876_v41 = vsel %vm397_vm3, %v1875_v37, %v1860_v54 }
 0x88c   :  { %v1864_v31 = vpop.permute.xlu1 %1863 }
 0x88d   :  { %v1877_v57 = vsel %vm85_vm0, %v1876_v41, %v1864_v31  ;;  %v4955_v41 = vld [vmem:[%s6258_s2 + $0xbb] ss:$0 sm:$0xff] }
 0x890   :  { %v1868_v61 = vpop.permute.xlu0 %1867 }
 0x891   :  { %v1879_v23 = vsel %vm1878_vm10, %v1877_v57, %v1868_v61 }
 0x892   :  { %4304 = vmatmul.mubr.msk.f32.vlgmr.msra.gmra.mrb[22].mxu1 %vm291_vm1, %v1879_v23 }
 0x893   :  { %4638 = vmatpush3.bf16.msra.mxu1 %v5182_v53  ;;  %4359 = vmatprep.mubr.msk.f32.mxu1 %vm397_vm3, %v3870_v62  ;;  %v3873_v53 = vld [vmem:[%s6257_s1 + $0x58] sm:$0xff] }
 0x894   :  { %4640 = vmatprep.subr.bf16.mxu1 %v5195_v60 }
 0x897   :  { %4642 = vmatpush3.bf16.msra.mxu1 %v5195_v60  ;;  %v3874_v60 = vld [vmem:[%s6257_s1 + $0x60] sm:$0xff] }
 0x898   :  { %4357 = vmatprep.subr.mxu1 %v4954_v44 }
 0x89b   :  { %4358 = vmatpush3.msra.mxu1 %v4954_v44 }
 0x89c   :  { %4360 = vmatmul.mubr.msk.f32.vlgmr.msra.gmra.mrb[24].mxu1 %vm397_vm3, %v3871_v2 }
 0x89d   :  { %4362 = vmatprep.mubr.msk.f32.mxu1 %vm397_vm3, %v3872_v4 }
 0x8a0   :  { %4363 = vmatmul.mubr.msk.f32.gmra.mrb[26].mxu1 %vm397_vm3, %v3873_v53 }
 0x8a1   :  { %4365 = vmatprep.mubr.msk.f32.mxu1 %vm397_vm3, %v3874_v60 }
 0x8a4   :  { %4366 = vmatmul.mubr.msk.f32.gmra.mrb[28].mxu1 %vm397_vm3, %v3875_v11 }
 0x8a5   :  { %4368 = vmatprep.mubr.msk.f32.mxu1 %vm397_vm3, %v3876_v13 }
 0x8a8   :  { %4369 = vmatmul.mubr.msk.f32.gmra.mrb[30].mxu1 %vm397_vm3, %v3877_v14 }
 0x8a9   :  { %4387 = vmatprep.mubr.msk.f32.mxu1 %vm291_vm1, %v5694_v39 }
 0x8cb   :  { %v2107_v29 = vpop.xlane.xlu1 %2106 }
 0x8cc   :  { %v2108_v15 = vrot.slane %v2107_v29, 4 }
 0x8ce   :  { %v2109_v27 = vadd.f32 %v2108_v15, %v2107_v29 }
 0x8d0   :  { %v2110_v35 = vrot.slane %v2109_v27, 2 }
 0x8d2   :  { %v2111_v17 = vadd.f32 %v2110_v35, %v2109_v27 }
 0x8d4   :  { %v2112_v18 = vrot.slane %v2111_v17, 1 }
 0x8d6   :  { %v2113_v55 = vadd.f32 %v2112_v18, %v2111_v17 }
 0x8d8   :  { %4727 = vpush %v2113_v55 }
 0x909   :  { %s4728_s6 = spop %4727 }
 0x90a   :  { %s2115_s7 = smul.f32 0.00048828125, %s4728_s6 }
 0x90c   :  { %v5823_v30 = vstv %s2115_s7 }
 0x90d   :  { %v2117_v6 = vsub.f32 %v5728_v49, %v5823_v30  ;;  %v2118_v8 = vsub.f32 %v5726_v43, %v5823_v30  ;;  %v2119_v39 = vsub.f32 %v5738_v16, %v5823_v30  ;;  %v2120_v33 = vsub.f32 %v5736_v36, %v5823_v30 }
 0x90e   :  { %v2121_v3 = vsub.f32 %v5748_v24, %v5823_v30  ;;  %v2122_v21 = vsub.f32 %v5746_v38, %v5823_v30  ;;  %v2123_v16 = vsub.f32 %v5758_v12, %v5823_v30  ;;  %v2124_v24 = vsub.f32 %v5756_v51, %v5823_v30 }
 0x90f   :  { %v2125_v5 = vmul.f32 %v2117_v6, %v2117_v6  ;;  %v2126_v9 = vmul.f32 %v2118_v8, %v2118_v8  ;;  %v2127_v40 = vmul.f32 %v2119_v39, %v2119_v39  ;;  %v2128_v1 = vmul.f32 %v2120_v33, %v2120_v33 }
 0x910   :  { %v2129_v26 = vmul.f32 %v2121_v3, %v2121_v3  ;;  %v2130_v10 = vmul.f32 %v2122_v21, %v2122_v21  ;;  %v2131_v28 = vmul.f32 %v2123_v16, %v2123_v16  ;;  %v2132_v19 = vmul.f32 %v2124_v24, %v2124_v24 }
 0x911   :  { %v2133_v49 = vsel %vm215_vm2, %v2125_v5, 0.0  ;;  %v2134_v43 = vsel %vm215_vm2, %v2126_v9, 0.0  ;;  %v2136_v36 = vsel %vm215_vm2, %v2127_v40, 0.0  ;;  %v2138_v34 = vsel %vm215_vm2, %v2128_v1, 0.0 }
 0x912   :  { %v2135_v45 = vadd.f32 %v2134_v43, %v2133_v49  ;;  %v2140_v22 = vsel %vm215_vm2, %v2129_v26, 0.0  ;;  %v2142_v50 = vsel %vm215_vm2, %v2130_v10, 0.0  ;;  %v2144_v12 = vsel %vm215_vm2, %v2131_v28, 0.0 }
 0x913   :  { %v2146_v54 = vsel %vm215_vm2, %v2132_v19, 0.0 }
 0x914   :  { %v2137_v25 = vadd.f32 %v2136_v36, %v2135_v45 }
 0x916   :  { %v2139_v38 = vadd.f32 %v2138_v34, %v2137_v25  ;;  %v4348_v34 = vpop.f32.mrb[34].mxu0 }
 0x917   :  { %v2232_v28 = vpop.f32.mrb[35].mxu0 }
 0x918   :  { %v2141_v7 = vadd.f32 %v2140_v22, %v2139_v38 }
 0x91a   :  { %v2143_v20 = vadd.f32 %v2142_v50, %v2141_v7 }
 0x91c   :  { %v2145_v0 = vadd.f32 %v2144_v12, %v2143_v20 }
 0x91e   :  { %v2147_v56 = vadd.f32 %v2146_v54, %v2145_v0 }
 0x920   :  { %2148 = vadd.xlane.f32.xlu0 %v2147_v56 }
 0x965   :  { %v5849_v51 = vpop.f32.mrb[22].mxu1 }
 0x966   :  { %v4305_v31 = vpop.f32.mrb[23].mxu1 }
 0x96f   :  { %v4361_v37 = vpop.f32.mrb[24].mxu1 }
 0x970   :  { %v5854_v57 = vadd.f32 %v4955_v41, %v4361_v37  ;;  %v2352_v61 = vpop.f32.mrb[25].mxu1 }
 0x971   :  { %v5856_v62 = vadd.f32 %v4955_v41, %v2352_v61 }
 0x972   :  { %v2392_v23 = vsel %vm215_vm2, %v5854_v57, 0.0 }
 0x973   :  { %v2391_v44 = vsel %vm215_vm2, %v5856_v62, 0.0  ;;  %v4364_v2 = vpop.f32.mrb[26].mxu1  ;;  %v4643_v4 = vpack.c.bf16 %v5854_v57, %v5856_v62 }
 0x974   :  { %v5864_v53 = vadd.f32 %v4955_v41, %v4364_v2  ;;  %v2362_v60 = vpop.f32.mrb[27].mxu1  ;;  %v2393_v13 = vadd.f32 %v2392_v23, %v2391_v44  ;;  %v4957_v2 = vld [vmem:[%s6258_s2 + $0xba] sm:$0x1] }
 0x975   :  { %v5866_v11 = vadd.f32 %v4955_v41, %v2362_v60  ;;  %4644 = vmatprep.subr.bf16.mxu1 %v4643_v4 }
 0x976   :  { %4646 = vmatpush3.bf16.msra.mxu1 %v4643_v4  ;;  %v2396_v18 = vsel %vm215_vm2, %v5864_v53, 0.0 }
 0x977   :  { %v2394_v14 = vsel %vm215_vm2, %v5866_v11, 0.0  ;;  %v4367_v29 = vpop.f32.mrb[28].mxu1  ;;  %v4647_v15 = vpack.c.bf16 %v5864_v53, %v5866_v11 }
 0x978   :  { %v2395_v27 = vadd.f32 %v2394_v14, %v2393_v13  ;;  %v5872_v35 = vadd.f32 %v4955_v41, %v4367_v29  ;;  %v2372_v17 = vpop.f32.mrb[29].mxu1 }
 0x979   :  { %v5876_v55 = vadd.f32 %v4955_v41, %v2372_v17  ;;  %4648 = vmatprep.subr.bf16.mxu1 %v4647_v15 }
 0x97a   :  { %v2397_v6 = vadd.f32 %v2396_v18, %v2395_v27  ;;  %4650 = vmatpush3.bf16.msra.mxu1 %v4647_v15  ;;  %v2400_v40 = vsel %vm215_vm2, %v5872_v35, 0.0 }
 0x97b   :  { %v2398_v8 = vsel %vm215_vm2, %v5876_v55, 0.0  ;;  %v4370_v39 = vpop.f32.mrb[30].mxu1  ;;  %v4651_v33 = vpack.c.bf16 %v5872_v35, %v5876_v55 }
 0x97c   :  { %v2399_v3 = vadd.f32 %v2398_v8, %v2397_v6  ;;  %v5882_v5 = vadd.f32 %v4955_v41, %v4370_v39  ;;  %v2382_v9 = vpop.f32.mrb[31].mxu1 }
 0x97d   :  { %v5886_v21 = vadd.f32 %v4955_v41, %v2382_v9  ;;  %4652 = vmatprep.subr.bf16.mxu1 %v4651_v33  ;;  %v4956_v41 = vld [vmem:[%s6258_s2 + $0xb9] sm:$0x1] }
 0x97e   :  { %4654 = vmatpush3.bf16.msra.mxu1 %v4651_v33  ;;  %v2401_v1 = vadd.f32 %v2400_v40, %v2399_v3  ;;  %v2404_v16 = vsel %vm215_vm2, %v5882_v5, 0.0 }
 0x97f   :  { %v4655_v49 = vpack.c.bf16 %v5882_v5, %v5886_v21  ;;  %v2402_v43 = vsel %vm215_vm2, %v5886_v21, 0.0 }
 0x980   :  { %v2403_v45 = vadd.f32 %v2402_v43, %v2401_v1 }
 0x981   :  { %4656 = vmatprep.subr.bf16.mxu1 %v4655_v49 }
 0x982   :  { %4658 = vmatpush3.bf16.msra.mxu1 %v4655_v49  ;;  %v2405_v26 = vadd.f32 %v2404_v16, %v2403_v45 }
 0x983   :  { %4679 = vmatprep.subr.bf16.mxu1 %v5020_v47 }
 0x984   :  { %2406 = vadd.xlane.f32.xlu0 %v2405_v26 }
 0x985   :  { %4388 = vmatmul.mubr.msk.f32.vlgmr.msra.gmra.mrb[32].mxu1 %vm291_vm1, %v5767_v42 }
 0x986   :  { %4428 = vmatprep.mubr.msk.f32.mxu1 %vm5022_vm7, %v5023_v46 }
 0x9ad   :  { %v2149_v36 = vpop.xlane.xlu0 %2148 }
 0x9ae   :  { %v2150_v25 = vrot.slane %v2149_v36, 4 }
 0x9b0   :  { %v2151_v24 = vadd.f32 %v2150_v25, %v2149_v36 }
 0x9b2   :  { %v2152_v10 = vrot.slane %v2151_v24, 2 }
 0x9b4   :  { %v2153_v38 = vadd.f32 %v2152_v10, %v2151_v24 }
 0x9b6   :  { %v2154_v22 = vrot.slane %v2153_v38, 1 }
 0x9b8   :  { %v2155_v7 = vadd.f32 %v2154_v22, %v2153_v38 }
 0x9ba   :  { %4729 = vpush %v2155_v7 }
 0x9eb   :  { %s4730_s9 = spop %4729 }
 0x9ec   :  { %s2157_s10 = smul.f32 0.00048828125, %s4730_s9 }
 0x9ee   :  { %s2158_s3 = sadd.f32 1e-05, %s2157_s10 }
 0x9f0   :  { %v2159_v19 = vstv %s2158_s3 }
 0x9f1   :  { %4883 = vrsqrt.f32 %v2159_v19 }
 0x9fb   :  { %v4884_v50 = vpop.eup %4883 }
 0x9fc   :  { %4731 = vpush %v4884_v50 }
 0xa11   :  { %v2407_v42 = vpop.xlane.xlu0 %2406 }
 0xa12   :  { %v2408_v20 = vrot.slane %v2407_v42, 4 }
 0xa14   :  { %v2409_v12 = vadd.f32 %v2408_v20, %v2407_v42 }
 0xa16   :  { %v2410_v0 = vrot.slane %v2409_v12, 2 }
 0xa18   :  { %v2411_v54 = vadd.f32 %v2410_v0, %v2409_v12 }
 0xa1a   :  { %v2412_v56 = vrot.slane %v2411_v54, 1 }
 0xa1c   :  { %v2413_v31 = vadd.f32 %v2412_v56, %v2411_v54 }
 0xa1e   :  { %4733 = vpush %v2413_v31 }
 0xa2d   :  { %s4732_s11 = spop %4731 }
 0xa2e   :  { %v2162_v37 = vstv %s4732_s11 }
 0xa2f   :  { %v2163_v61 = vmul.f32 %v4956_v41, %v2162_v37  ;;  %v4958_v37 = vld [vmem:[%s6258_s2 + $0xbe] ss:$0 sm:$0xff] }
 0xa31   :  { %v2164_v23 = vmul.f32 %v2163_v61, %v5823_v30  ;;  %v2244_v44 = vrot.slane %v2163_v61, %v5335_v58 }
 0xa33   :  { %v2165_v4 = vsub.f32 %v4957_v2, %v2164_v23  ;;  %v2246_v60 = vmul.f32 %v4348_v34, %v2244_v44  ;;  %v2245_v14 = vmul.f32 %v2244_v44, %v2232_v28 }
 0xa35   :  { %v2250_v13 = vrot.slane %v2165_v4, %v5335_v58 }
 0xa37   :  { %v2252_v29 = vadd.f32 %v2250_v13, %v2246_v60  ;;  %v2251_v15 = vadd.f32 %v2250_v13, %v2245_v14  ;;  %v4959_v14 = vld [vmem:[%s6258_s2 + $0xbc] sm:$0x1] }
 0xa39   :  { %v4667_v27 = vpack.c.bf16 %v2252_v29, %v2251_v15  ;;  %4398 = vmatprep.mubr.msk.f32.mxu0 %vm215_vm2, %v2251_v15 }
 0xa3a   :  { %4399 = vmatmul.mubr.msk.f32.vlgmr.msra.gmra.mrb[36].mxu0 %vm215_vm2, %v2252_v29 }
 0xa3b   :  { %4669 = vmatprep.subr.msk.bf16.mxu0 %vm5363_vm4, %v4667_v27 }
 0xa3c   :  { %4672 = vmatpush3.bf16.xpose.msk.msra.mxu0 %vm5363_vm4, %v4667_v27 }
 0xa4f   :  { %s4734_s16 = spop %4733 }
 0xa50   :  { %s2415_s17 = smul.f32 0.00048828125, %s4734_s16 }
 0xa52   :  { %v5914_v30 = vstv %s2415_s17 }
 0xa53   :  { %v2417_v17 = vsub.f32 %v5856_v62, %v5914_v30  ;;  %v2418_v18 = vsub.f32 %v5854_v57, %v5914_v30  ;;  %v2419_v6 = vsub.f32 %v5866_v11, %v5914_v30  ;;  %v2420_v8 = vsub.f32 %v5864_v53, %v5914_v30 }
 0xa54   :  { %v2421_v39 = vsub.f32 %v5876_v55, %v5914_v30  ;;  %v2422_v40 = vsub.f32 %v5872_v35, %v5914_v30  ;;  %v2423_v11 = vsub.f32 %v5886_v21, %v5914_v30  ;;  %v2424_v55 = vsub.f32 %v5882_v5, %v5914_v30 }
 0xa55   :  { %v2425_v33 = vmul.f32 %v2417_v17, %v2417_v17  ;;  %v2426_v3 = vmul.f32 %v2418_v18, %v2418_v18  ;;  %v2427_v9 = vmul.f32 %v2419_v6, %v2419_v6  ;;  %v2428_v1 = vmul.f32 %v2420_v8, %v2420_v8  ;;  %v4960_v17 = vld [vmem:[%s6258_s2 + $0xbd] sm:$0x1] }
 0xa56   :  { %v2429_v43 = vmul.f32 %v2421_v39, %v2421_v39  ;;  %v2430_v16 = vmul.f32 %v2422_v40, %v2422_v40  ;;  %v2431_v36 = vmul.f32 %v2423_v11, %v2423_v11  ;;  %v2432_v10 = vmul.f32 %v2424_v55, %v2424_v55  ;;  %v4963_v40 = vld [vmem:[%s6258_s2 + $0x88] sm:$0xff] }
 0xa57   :  { %v2433_v62 = vsel %vm215_vm2, %v2425_v33, 0.0  ;;  %v2434_v57 = vsel %vm215_vm2, %v2426_v3, 0.0  ;;  %v2436_v53 = vsel %vm215_vm2, %v2427_v9, 0.0  ;;  %v2438_v26 = vsel %vm215_vm2, %v2428_v1, 0.0  ;;  %v4965_v1 = vld [vmem:[%s6258_s2 + $0x98] sm:$0xff] }
 0xa58   :  { %v2435_v49 = vadd.f32 %v2434_v57, %v2433_v62  ;;  %v2440_v25 = vsel %vm215_vm2, %v2429_v43, 0.0  ;;  %v2442_v34 = vsel %vm215_vm2, %v2430_v16, 0.0  ;;  %v2444_v21 = vsel %vm215_vm2, %v2431_v36, 0.0  ;;  %v4389_v20 = vpop.f32.mrb[32].mxu1  ;;  %v4967_v62 = vld [vmem:[%s6258_s2 + $0xa8] sm:$0xff] }
 0xa59   :  { %v2446_v22 = vsel %vm215_vm2, %v2432_v10, 0.0  ;;  %v2532_v0 = vpop.f32.mrb[33].mxu1 }
 0xa5a   :  { %v2437_v45 = vadd.f32 %v2436_v53, %v2435_v49 }
 0xa5c   :  { %v2439_v35 = vadd.f32 %v2438_v26, %v2437_v45 }
 0xa5e   :  { %v2441_v24 = vadd.f32 %v2440_v25, %v2439_v35 }
 0xa60   :  { %v2443_v38 = vadd.f32 %v2442_v34, %v2441_v24 }
 0xa62   :  { %v2445_v28 = vadd.f32 %v2444_v21, %v2443_v38 }
 0xa64   :  { %v2447_v7 = vadd.f32 %v2446_v22, %v2445_v28 }
 0xa66   :  { %2448 = vadd.xlane.f32.xlu0 %v2447_v7 }
 0xaf3   :  { %v2449_v5 = vpop.xlane.xlu0 %2448 }
 0xaf4   :  { %v2450_v19 = vrot.slane %v2449_v5, 4 }
 0xaf6   :  { %v2451_v50 = vadd.f32 %v2450_v19, %v2449_v5 }
 0xaf8   :  { %v2452_v42 = vrot.slane %v2451_v50, 2 }
 0xafa   :  { %v2453_v12 = vadd.f32 %v2452_v42, %v2451_v50 }
 0xafc   :  { %v2454_v54 = vrot.slane %v2453_v12, 1 }
 0xafe   :  { %v2455_v56 = vadd.f32 %v2454_v54, %v2453_v12 }
 0xb00   :  { %4735 = vpush %v2455_v56 }
 0xb0d   :  { %v4400_v31 = vpop.f32.mrb[36].mxu0 }
 0xb0e   :  { %v2637_v41 = vadd.f32 %v4958_v37, %v4400_v31  ;;  %v2631_v61 = vpop.f32.mrb[37].mxu0 }
 0xb0f   :  { %v2632_v23 = vadd.f32 %v4958_v37, %v2631_v61 }
 0xb11   :  { %v4680_v44 = vpack.c.bf16 %v2637_v41, %v2632_v23  ;;  %v5943_v2 = vpack.i.bf16 %v2637_v41, %v2632_v23 }
 0xb13   :  { %4681 = vmatpush3.bf16.msra.mxu1 %v4680_v44 }
 0xb14   :  { %4682 = vmatprep.subr.bf16.mxu1 %v5020_v47 }
 0xb31   :  { %s4736_s20 = spop %4735 }
 0xb32   :  { %s2457_s27 = smul.f32 0.00048828125, %s4736_s20 }
 0xb34   :  { %s2458_s28 = sadd.f32 1e-05, %s2457_s27 }
 0xb36   :  { %v2459_v4 = vstv %s2458_s28 }
 0xb37   :  { %4885 = vrsqrt.f32 %v2459_v4 }
 0xb41   :  { %v4886_v60 = vpop.eup %4885 }
 0xb42   :  { %4737 = vpush %v4886_v60 }
 0xb73   :  { %s4738_s6 = spop %4737 }
 0xb74   :  { %v2462_v13 = vstv %s4738_s6 }
 0xb75   :  { %v2463_v29 = vmul.f32 %v4959_v14, %v2462_v13 }
 0xb77   :  { %v2464_v15 = vmul.f32 %v2463_v29, %v5914_v30  ;;  %v2544_v27 = vrot.slane %v2463_v29, %v5335_v58  ;;  %v4961_v30 = vld [vmem:[%s6258_s2 + $0x78] sm:$0xff] }
 0xb79   :  { %v2465_v18 = vsub.f32 %v4960_v17, %v2464_v15  ;;  %v2546_v6 = vmul.f32 %v4389_v20, %v2544_v27  ;;  %v2545_v39 = vmul.f32 %v2544_v27, %v2532_v0 }
 0xb7b   :  { %v2550_v8 = vrot.slane %v2465_v18, %v5335_v58  ;;  %v4962_v58 = vld [vmem:[%s6258_s2 + $0x80] sm:$0xff] }
 0xb7d   :  { %v2552_v33 = vadd.f32 %v2550_v8, %v2546_v6  ;;  %v2551_v3 = vadd.f32 %v2550_v8, %v2545_v39 }
 0xb7f   :  { %v4673_v9 = vpack.c.bf16 %v2552_v33, %v2551_v3  ;;  %4401 = vmatprep.mubr.msk.f32.mxu0 %vm215_vm2, %v2551_v3 }
 0xb80   :  { %4402 = vmatmul.mubr.msk.f32.gmra.mrb[38].mxu0 %vm215_vm2, %v2552_v33 }
 0xb81   :  { %4675 = vmatprep.subr.msk.bf16.mxu0 %vm5363_vm4, %v4673_v9  ;;  %4412 = vmatprep.mubr.msk.f32.mxu0 %vm215_vm2, %v4961_v30 }
 0xb82   :  { %4678 = vmatpush3.bf16.xpose.msk.msra.mxu0 %vm5363_vm4, %v4673_v9 }
 0xb83   :  { %4703 = vmatprep.subr.bf16.mxu0 %v5020_v47 }
 0xb89   :  { %4413 = vmatmul.mubr.msk.f32.vlgmr.msra.gmra.mrb[40].mxu0 %vm215_vm2, %v4962_v58 }
 0xb8a   :  { %4415 = vmatprep.mubr.msk.f32.mxu0 %vm215_vm2, %v4963_v40  ;;  %4705 = vmatpush3.bf16.msra.mxu0 %v5703_v63  ;;  %v4966_v63 = vld [vmem:[%s6258_s2 + $0xa0] sm:$0xff] }
 0xb8b   :  { %4706 = vmatprep.subr.bf16.mxu0 %v5020_v47 }
 0xb8d   :  { %4416 = vmatmul.mubr.msk.f32.gmra.mrb[42].mxu0 %vm215_vm2, %v4964_v32 }
 0xb8e   :  { %4418 = vmatprep.mubr.msk.f32.mxu0 %vm215_vm2, %v4965_v1  ;;  %4708 = vmatpush3.bf16.msra.mxu0 %v5706_v59  ;;  %v4968_v59 = vld [vmem:[%s6258_s2 + $0xb0] sm:$0xff]  ;;  %s5032_s2 = smov [#allocation5]  }
 0xb8f   :  { %4709 = vmatprep.subr.bf16.mxu0 %v5020_v47 }
 0xb91   :  { %4419 = vmatmul.mubr.msk.f32.gmra.mrb[44].mxu0 %vm215_vm2, %v4966_v63 }
 0xb92   :  { %4421 = vmatprep.mubr.msk.f32.mxu0 %vm215_vm2, %v4967_v62  ;;  %4711 = vmatpush3.bf16.msra.mxu0 %v5711_v48 }
 0xb93   :  { %4712 = vmatprep.subr.bf16.mxu0 %v5020_v47 }
 0xb95   :  { %4422 = vmatmul.mubr.msk.f32.gmra.mrb[46].mxu0 %vm215_vm2, %v4968_v59 }
 0xb96   :  { %4714 = vmatpush3.bf16.msra.mxu0 %v5715_v52  ;;  %4496 = vmatprep.mubr.msk.f32.mxu0 %vm5022_vm7, %v5023_v46 }
 0xc53   :  { %v4403_v57 = vpop.f32.mrb[38].mxu0 }
 0xc54   :  { %v6003_v49 = vadd.f32 %v4958_v37, %v4403_v57  ;;  %v2641_v11 = vpop.f32.mrb[39].mxu0 }
 0xc55   :  { %v6005_v43 = vadd.f32 %v4958_v37, %v2641_v11 }
 0xc57   :  { %v6009_v48 = vpack.i.bf16 %v6003_v49, %v6005_v43  ;;  %v4692_v53 = vpack.c.bf16 %v6003_v49, %v6005_v43 }
 0xc5c   :  { %v6013_v45 = vpop.f32.mrb[40].mxu0 }
 0xc5d   :  { %v6015_v55 = vpop.f32.mrb[41].mxu0  ;;  %v3198_v52 = vsel %vm1361_vm5, %v6013_v45, -inf  ;;  %v2758_v5 = vsel %vm919_vm6, %v6013_v45, -inf }
 0xc5e   :  { %3199 = vmax.xlane.f32.xlu0 %v3198_v52  ;;  %v3195_v16 = vsel %vm1361_vm5, %v6015_v55, -inf  ;;  %v2755_v19 = vsel %vm919_vm6, %v6015_v55, -inf }
 0xc5f   :  { %3196 = vmax.xlane.f32.xlu1 %v3195_v16 }
 0xc60   :  { %v6021_v26 = vpop.f32.mrb[42].mxu0 }
 0xc61   :  { %v6023_v35 = vpop.f32.mrb[43].mxu0  ;;  %v3204_v36 = vsel %vm1361_vm5, %v6021_v26, -inf  ;;  %v2764_v20 = vsel %vm919_vm6, %v6021_v26, -inf }
 0xc62   :  { %3205 = vmax.xlane.f32.xlu0 %v3204_v36  ;;  %v3201_v25 = vsel %vm1361_vm5, %v6023_v35, -inf  ;;  %v2761_v50 = vsel %vm919_vm6, %v6023_v35, -inf }
 0xc63   :  { %3202 = vmax.xlane.f32.xlu1 %v3201_v25 }
 0xc64   :  { %v6029_v24 = vpop.f32.mrb[44].mxu0 }
 0xc65   :  { %v6031_v10 = vpop.f32.mrb[45].mxu0  ;;  %v3210_v34 = vsel %vm1361_vm5, %v6029_v24, -inf  ;;  %v2770_v12 = vsel %vm919_vm6, %v6029_v24, -inf }
 0xc66   :  { %3211 = vmax.xlane.f32.xlu0 %v3210_v34  ;;  %v3207_v38 = vsel %vm1361_vm5, %v6031_v10, -inf  ;;  %v2767_v42 = vsel %vm919_vm6, %v6031_v10, -inf }
 0xc67   :  { %3208 = vmax.xlane.f32.xlu1 %v3207_v38 }
 0xc68   :  { %v6037_v21 = vpop.f32.mrb[46].mxu0 }
 0xc69   :  { %v6039_v28 = vpop.f32.mrb[47].mxu0  ;;  %v3216_v22 = vsel %vm1361_vm5, %v6037_v21, -inf  ;;  %v2776_v57 = vsel %vm919_vm6, %v6037_v21, -inf }
 0xc6a   :  { %3217 = vmax.xlane.f32.xlu0 %v3216_v22  ;;  %v3213_v7 = vsel %vm1361_vm5, %v6039_v28, -inf  ;;  %v2773_v11 = vsel %vm919_vm6, %v6039_v28, -inf }
 0xc6b   :  { %3214 = vmax.xlane.f32.xlu1 %v3213_v7 }
 0xc6e   :  { %2759 = vmax.xlane.f32.xlu0 %v2758_v5 }
 0xc6f   :  { %2756 = vmax.xlane.f32.xlu1 %v2755_v19 }
 0xc72   :  { %2762 = vmax.xlane.f32.xlu0 %v2761_v50 }
 0xc73   :  { %2768 = vmax.xlane.f32.xlu1 %v2767_v42 }
 0xc76   :  { %2765 = vmax.xlane.f32.xlu0 %v2764_v20 }
 0xc7a   :  { %2771 = vmax.xlane.f32.xlu0 %v2770_v12 }
 0xceb   :  { %v3200_v0 = vpop.xlane.xlu0 %3199 }
 0xcec   :  { %v3220_v54 = vsub.f32 %v6013_v45, %v3200_v0  ;;  %v3197_v56 = vpop.xlane.xlu1 %3196 }
 0xced   :  { %v3219_v31 = vsub.f32 %v6015_v55, %v3197_v56 }
 0xcee   :  { %v3229_v37 = vmul.f32 1.442695, %v3220_v54 }
 0xcef   :  { %v3227_v41 = vmul.f32 1.442695, %v3219_v31  ;;  %v3206_v61 = vpop.xlane.xlu0 %3205 }
 0xcf0   :  { %4887 = vpow2.f32 %v3229_v37  ;;  %v3222_v23 = vsub.f32 %v6021_v26, %v3206_v61  ;;  %v3203_v44 = vpop.xlane.xlu1 %3202 }
 0xcf1   :  { %4889 = vpow2.f32 %v3227_v41  ;;  %v3221_v4 = vsub.f32 %v6023_v35, %v3203_v44 }
 0xcf2   :  { %v3233_v60 = vmul.f32 1.442695, %v3222_v23 }
 0xcf3   :  { %v3212_v13 = vpop.xlane.xlu0 %3211  ;;  %v3231_v15 = vmul.f32 1.442695, %v3221_v4 }
 0xcf4   :  { %4891 = vpow2.f32 %v3233_v60  ;;  %v3224_v14 = vsub.f32 %v6029_v24, %v3212_v13  ;;  %v3209_v29 = vpop.xlane.xlu1 %3208 }
 0xcf5   :  { %v3223_v27 = vsub.f32 %v6031_v10, %v3209_v29 }
 0xcf6   :  { %v3237_v17 = vmul.f32 1.442695, %v3224_v14 }
 0xcf7   :  { %v3218_v18 = vpop.xlane.xlu0 %3217  ;;  %v3235_v39 = vmul.f32 1.442695, %v3223_v27 }
 0xcf8   :  { %4893 = vpow2.f32 %v3237_v17  ;;  %v3226_v6 = vsub.f32 %v6037_v21, %v3218_v18  ;;  %v3215_v8 = vpop.xlane.xlu1 %3214 }
 0xcf9   :  { %4895 = vpow2.f32 %v3231_v15  ;;  %v3225_v33 = vsub.f32 %v6039_v28, %v3215_v8 }
 0xcfa   :  { %v6065_v3 = vpop.eup %4887  ;;  %v3241_v9 = vmul.f32 1.442695, %v3226_v6 }
 0xcfb   :  { %v6067_v30 = vpop.eup %4889  ;;  %3253 = vrot.lane.b32.xlu0 %v6065_v3, %s5021_s29  ;;  %v3239_v58 = vmul.f32 1.442695, %v3225_v33  ;;  %v2760_v52 = vpop.xlane.xlu0 %2759 }
 0xcfc   :  { %4897 = vpow2.f32 %v3241_v9  ;;  %3251 = vrot.lane.b32.xlu1 %v6067_v30, %s5021_s29  ;;  %v2757_v25 = vpop.xlane.xlu1 %2756  ;;  %v2780_v38 = vsub.f32 %v6013_v45, %v2760_v52 }
 0xcfd   :  { %4899 = vpow2.f32 %v3235_v39  ;;  %v2779_v7 = vsub.f32 %v6015_v55, %v2757_v25 }
 0xcfe   :  { %v6073_v40 = vpop.eup %4891  ;;  %4901 = vpow2.f32 %v3239_v58  ;;  %v2789_v19 = vmul.f32 1.442695, %v2780_v38 }
 0xcff   :  { %v2763_v16 = vpop.xlane.xlu0 %2762  ;;  %v2787_v0 = vmul.f32 1.442695, %v2779_v7 }
 0xd00   :  { %3257 = vrot.lane.b32.xlu1 %v6073_v40, %s5021_s29  ;;  %v2769_v22 = vpop.xlane.xlu1 %2768  ;;  %v2781_v54 = vsub.f32 %v6023_v35, %v2763_v16  ;;  %4903 = vpow2.f32 %v2789_v19 }
 0xd01   :  { %4905 = vpow2.f32 %v2787_v0  ;;  %v2783_v41 = vsub.f32 %v6031_v10, %v2769_v22 }
 0xd02   :  { %v6077_v32 = vpop.eup %4893 }
 0xd03   :  { %v6079_v1 = vpop.eup %4895  ;;  %3261 = vrot.lane.b32.xlu0 %v6077_v32, %s5021_s29  ;;  %v2766_v36 = vpop.xlane.xlu0 %2765  ;;  %v2795_v4 = vmul.f32 1.442695, %v2783_v41 }
 0xd04   :  { %3255 = vrot.lane.b32.xlu1 %v6079_v1, %s5021_s29  ;;  %v2782_v50 = vsub.f32 %v6021_v26, %v2766_v36  ;;  %v2791_v26 = vmul.f32 1.442695, %v2781_v54 }
 0xd06   :  { %v6085_v63 = vpop.eup %4897  ;;  %v2793_v56 = vmul.f32 1.442695, %v2782_v50 }
 0xd07   :  { %v6087_v62 = vpop.eup %4899  ;;  %3265 = vrot.lane.b32.xlu0 %v6085_v63, %s5021_s29  ;;  %v2772_v34 = vpop.xlane.xlu0 %2771 }
 0xd08   :  { %3259 = vrot.lane.b32.xlu1 %v6087_v62, %s5021_s29  ;;  %v6093_v59 = vpop.eup %4901  ;;  %v2784_v45 = vsub.f32 %v6029_v24, %v2772_v34  ;;  %4907 = vpow2.f32 %v2793_v56 }
 0xd09   :  { %4909 = vpow2.f32 %v2791_v26 }
 0xd0a   :  { %v2797_v61 = vmul.f32 1.442695, %v2784_v45  ;;  %v6114_v29 = vpop.eup %4903 }
 0xd0b   :  { %v6116_v15 = vpop.eup %4905  ;;  %v2806_v27 = vsel %vm919_vm6, %v6114_v29, 0.0 }
 0xd0c   :  { %3263 = vrot.lane.b32.xlu1 %v6093_v59, %s5021_s29  ;;  %4911 = vpow2.f32 %v2797_v61  ;;  %v2803_v39 = vsel %vm919_vm6, %v6116_v15, 0.0 }
 0xd0d   :  { %4913 = vpow2.f32 %v2795_v4 }
 0xd12   :  { %v6121_v18 = vpop.eup %4907 }
 0xd13   :  { %v6123_v6 = vpop.eup %4909  ;;  %v2812_v8 = vsel %vm919_vm6, %v6121_v18, 0.0 }
 0xd14   :  { %v2809_v58 = vsel %vm919_vm6, %v6123_v6, 0.0 }
 0xd16   :  { %v6129_v33 = vpop.eup %4911 }
 0xd17   :  { %v2818_v9 = vsel %vm919_vm6, %v6129_v33, 0.0 }
 0xd26   :  { %2777 = vmax.xlane.f32.xlu0 %v2776_v57  ;;  %v6135_v57 = vpop.eup %4913 }
 0xd30   :  { %2774 = vmax.xlane.f32.xlu1 %v2773_v11  ;;  %v2815_v11 = vsel %vm919_vm6, %v6135_v57, 0.0 }
 0xd6d   :  { %v3254_v5 = vpop.permute.xlu0 %3253 }
 0xd6e   :  { %v3252_v42 = vpop.permute.xlu1 %3251  ;;  %v3278_v20 = vsel %vm919_vm6, %v3254_v5, 0.0 }
 0xd6f   :  { %3279 = vadd.xlane.f32.xlu0 %v3278_v20  ;;  %v3275_v12 = vsel %vm919_vm6, %v3252_v42, 0.0 }
 0xd70   :  { %3276 = vadd.xlane.f32.xlu1 %v3275_v12 }
 0xd72   :  { %v3258_v31 = vpop.permute.xlu1 %3257 }
 0xd73   :  { %v3284_v55 = vsel %vm919_vm6, %v3258_v31, 0.0 }
 0xd74   :  { %3285 = vadd.xlane.f32.xlu0 %v3284_v55 }
 0xd75   :  { %v3262_v37 = vpop.permute.xlu0 %3261 }
 0xd76   :  { %v3256_v23 = vpop.permute.xlu1 %3255  ;;  %v3290_v44 = vsel %vm919_vm6, %v3262_v37, 0.0 }
 0xd77   :  { %v3281_v35 = vsel %vm919_vm6, %v3256_v23, 0.0 }
 0xd78   :  { %3291 = vadd.xlane.f32.xlu0 %v3290_v44  ;;  %3282 = vadd.xlane.f32.xlu1 %v3281_v35 }
 0xd79   :  { %v3266_v24 = vpop.permute.xlu0 %3265 }
 0xd7a   :  { %v3260_v60 = vpop.permute.xlu1 %3259  ;;  %v3296_v13 = vsel %vm919_vm6, %v3266_v24, 0.0 }
 0xd7b   :  { %v3287_v14 = vsel %vm919_vm6, %v3260_v60, 0.0 }
 0xd7c   :  { %3297 = vadd.xlane.f32.xlu0 %v3296_v13  ;;  %3288 = vadd.xlane.f32.xlu1 %v3287_v14 }
 0xd7e   :  { %v3264_v10 = vpop.permute.xlu1 %3263 }
 0xd7f   :  { %v3293_v17 = vsel %vm919_vm6, %v3264_v10, 0.0 }
 0xd80   :  { %2807 = vadd.xlane.f32.xlu0 %v2806_v27  ;;  %3294 = vadd.xlane.f32.xlu1 %v3293_v17 }
 0xd84   :  { %2813 = vadd.xlane.f32.xlu0 %v2812_v8  ;;  %2804 = vadd.xlane.f32.xlu1 %v2803_v39 }
 0xd88   :  { %2819 = vadd.xlane.f32.xlu0 %v2818_v9  ;;  %2810 = vadd.xlane.f32.xlu1 %v2809_v58 }
 0xd8c   :  { %2816 = vadd.xlane.f32.xlu1 %v2815_v11 }
 0xdb3   :  { %v2778_v52 = vpop.xlane.xlu0 %2777 }
 0xdb4   :  { %v2786_v16 = vsub.f32 %v6037_v21, %v2778_v52 }
 0xdb6   :  { %v2801_v36 = vmul.f32 1.442695, %v2786_v16 }
 0xdb8   :  { %4915 = vpow2.f32 %v2801_v36 }
 0xdbd   :  { %v2775_v25 = vpop.xlane.xlu1 %2774 }
 0xdbe   :  { %v2785_v34 = vsub.f32 %v6039_v28, %v2775_v25 }
 0xdc0   :  { %v2799_v38 = vmul.f32 1.442695, %v2785_v34 }
 0xdc2   :  { %v6141_v22 = vpop.eup %4915  ;;  %4917 = vpow2.f32 %v2799_v38 }
 0xdc3   :  { %v2824_v7 = vsel %vm919_vm6, %v6141_v22, 0.0 }
 0xdc4   :  { %2825 = vadd.xlane.f32.xlu0 %v2824_v7 }
 0xdcc   :  { %v6145_v5 = vpop.eup %4917 }
 0xdcd   :  { %v2821_v19 = vsel %vm919_vm6, %v6145_v5, 0.0 }
 0xdce   :  { %2822 = vadd.xlane.f32.xlu1 %v2821_v19 }
 0xdda   :  { %4791 = vrot.lane.b32.xlu0 %v5943_v2, %s5021_s29 }
 0xdde   :  { %4806 = vrot.lane.b32.xlu0 %v6009_v48, %s5021_s29 }
 0xddf   :  { %4786 = vrot.lane.b32.xlu1 %v5943_v2, %s5024_s30 }
 0xde2   :  { %4811 = vrot.lane.b32.xlu0 %v6009_v48, %s5025_s5 }
 0xde3   :  { %4796 = vrot.lane.b32.xlu1 %v5943_v2, %s5025_s5 }
 0xde7   :  { %4801 = vrot.lane.b32.xlu1 %v6009_v48, %s5024_s30 }
 0xdfc   :  { %v3280_v21 = vpop.xlane.xlu0 %3279 }
 0xdfd   :  { %4919 = vrcp.f32 %v3280_v21  ;;  %v3277_v28 = vpop.xlane.xlu1 %3276 }
 0xdfe   :  { %4921 = vrcp.f32 %v3277_v28 }
 0xe01   :  { %v3286_v50 = vpop.xlane.xlu0 %3285 }
 0xe02   :  { %4923 = vrcp.f32 %v3286_v50 }
 0xe05   :  { %v3292_v42 = vpop.xlane.xlu0 %3291  ;;  %v3283_v20 = vpop.xlane.xlu1 %3282 }
 0xe06   :  { %4925 = vrcp.f32 %v3292_v42 }
 0xe07   :  { %v4920_v12 = vpop.eup %4919  ;;  %4927 = vrcp.f32 %v3283_v20 }
 0xe08   :  { %v4922_v0 = vpop.eup %4921  ;;  %v3302_v54 = vmul.f32 %v4920_v12, %v6065_v3 }
 0xe09   :  { %v3300_v56 = vmul.f32 %v4922_v0, %v6067_v30  ;;  %v3298_v2 = vpop.xlane.xlu0 %3297  ;;  %v3289_v45 = vpop.xlane.xlu1 %3288 }
 0xe0a   :  { %v3316_v48 = vsel %vm1361_vm5, %v3302_v54, 0.0  ;;  %4929 = vrcp.f32 %v3298_v2 }
 0xe0b   :  { %v3315_v31 = vsel %vm1361_vm5, %v3300_v56, 0.0  ;;  %4931 = vrcp.f32 %v3289_v45 }
 0xe0c   :  { %v3317_v55 = vadd.f32 %v3316_v48, %v3315_v31  ;;  %v4924_v26 = vpop.eup %4923 }
 0xe0d   :  { %v2808_v37 = vpop.xlane.xlu0 %2807  ;;  %v3295_v41 = vpop.xlane.xlu1 %3294  ;;  %v3306_v3 = vmul.f32 %v4924_v26, %v6073_v40 }
 0xe0e   :  { %4933 = vrcp.f32 %v2808_v37  ;;  %v3318_v61 = vrot.slane %v3317_v55, 4 }
 0xe0f   :  { %4935 = vrcp.f32 %v3295_v41  ;;  %v3401_v13 = vsel %vm1361_vm5, %v3306_v3, 0.0 }
 0xe10   :  { %v4926_v23 = vpop.eup %4925  ;;  %v3319_v44 = vadd.f32 %v3318_v61, %v3317_v55 }
 0xe11   :  { %v4928_v30 = vpop.eup %4927  ;;  %v2805_v35 = vpop.xlane.xlu1 %2804  ;;  %v3310_v14 = vmul.f32 %v4926_v23, %v6077_v32 }
 0xe12   :  { %v3304_v24 = vmul.f32 %v4928_v30, %v6079_v1  ;;  %v3320_v4 = vrot.slane %v3319_v44, 2  ;;  %4937 = vrcp.f32 %v2805_v35 }
 0xe13   :  { %v3494_v11 = vsel %vm1361_vm5, %v3310_v14, 0.0 }
 0xe14   :  { %v4930_v60 = vpop.eup %4929  ;;  %v3400_v10 = vsel %vm1361_vm5, %v3304_v24, 0.0  ;;  %v3321_v27 = vadd.f32 %v3320_v4, %v3319_v44 }
 0xe15   :  { %v4932_v17 = vpop.eup %4931  ;;  %v3402_v8 = vadd.f32 %v3401_v13, %v3400_v10  ;;  %v3314_v1 = vmul.f32 %v4930_v60, %v6085_v63  ;;  %v2811_v10 = vpop.xlane.xlu1 %2810 }
 0xe16   :  { %v3308_v39 = vmul.f32 %v4932_v17, %v6087_v62  ;;  %v3322_v40 = vrot.slane %v3321_v27, 1  ;;  %4939 = vrcp.f32 %v2811_v10 }
 0xe17   :  { %v3403_v9 = vrot.slane %v3402_v8, 4  ;;  %v3585_v62 = vsel %vm1361_vm5, %v3314_v1, 0.0 }
 0xe18   :  { %v4934_v58 = vpop.eup %4933  ;;  %v3493_v52 = vsel %vm1361_vm5, %v3308_v39, 0.0  ;;  %v3323_v16 = vadd.f32 %v3322_v40, %v3321_v27  ;;  %v2814_v27 = vpop.xlane.xlu0 %2813 }
 0xe19   :  { %v4936_v36 = vpop.eup %4935  ;;  %v3404_v25 = vadd.f32 %v3403_v9, %v3402_v8  ;;  %v3495_v32 = vadd.f32 %v3494_v11, %v3493_v52  ;;  %v2830_v21 = vmul.f32 %v4934_v58, %v6114_v29  ;;  %v2817_v17 = vpop.xlane.xlu1 %2816  ;;  %4941 = vrcp.f32 %v2814_v27 }
 0xe1a   :  { %v3312_v34 = vmul.f32 %v4936_v36, %v6093_v59  ;;  %v3324_v38 = vmul.f32 0.0625, %v3323_v16  ;;  %4943 = vrcp.f32 %v2817_v17 }
 0xe1b   :  { %v3405_v7 = vrot.slane %v3404_v25, 2  ;;  %v3496_v19 = vrot.slane %v3495_v32, 4  ;;  %v2844_v56 = vsel %vm919_vm6, %v2830_v21, 0.0 }
 0xe1c   :  { %v3584_v28 = vsel %vm1361_vm5, %v3312_v34, 0.0  ;;  %3326 = vrot.lane.b32.xlu1 %v3324_v38, %s5021_s29  ;;  %v4938_v63 = vpop.eup %4937  ;;  %v2820_v8 = vpop.xlane.xlu0 %2819 }
 0xe1d   :  { %v3406_v50 = vadd.f32 %v3405_v7, %v3404_v25  ;;  %v3497_v42 = vadd.f32 %v3496_v19, %v3495_v32  ;;  %v3586_v20 = vadd.f32 %v3585_v62, %v3584_v28  ;;  %v2828_v12 = vmul.f32 %v4938_v63, %v6116_v15 }
 0xe1e   :  { %4945 = vrcp.f32 %v2820_v8 }
 0xe1f   :  { %v3407_v0 = vrot.slane %v3406_v50, 1  ;;  %v3498_v54 = vrot.slane %v3497_v42, 2  ;;  %v3587_v59 = vrot.slane %v3586_v20, 4  ;;  %v2843_v2 = vsel %vm919_vm6, %v2828_v12, 0.0 }
 0xe20   :  { %v2845_v45 = vadd.f32 %v2844_v56, %v2843_v2  ;;  %v4940_v39 = vpop.eup %4939 }
 0xe21   :  { %v3408_v48 = vadd.f32 %v3407_v0, %v3406_v50  ;;  %v3499_v29 = vadd.f32 %v3498_v54, %v3497_v42  ;;  %v3588_v31 = vadd.f32 %v3587_v59, %v3586_v20  ;;  %v2832_v9 = vmul.f32 %v4940_v39, %v6123_v6 }
 0xe22   :  { %v2846_v55 = vrot.slane %v2845_v45, 4 }
 0xe23   :  { %v3409_v26 = vmul.f32 0.0625, %v3408_v48  ;;  %v3500_v37 = vrot.slane %v3499_v29, 1  ;;  %v3589_v41 = vrot.slane %v3588_v31, 2  ;;  %v4942_v40 = vpop.eup %4941  ;;  %v2926_v52 = vsel %vm919_vm6, %v2832_v9, 0.0 }
 0xe24   :  { %v2847_v23 = vadd.f32 %v2846_v55, %v2845_v45  ;;  %v4944_v58 = vpop.eup %4943  ;;  %v2834_v11 = vmul.f32 %v4942_v40, %v6121_v18 }
 0xe25   :  { %3411 = vrot.lane.b32.xlu1 %v3409_v26, %s5021_s29  ;;  %v3501_v61 = vadd.f32 %v3500_v37, %v3499_v29  ;;  %v3590_v15 = vadd.f32 %v3589_v41, %v3588_v31  ;;  %v2836_v16 = vmul.f32 %v4944_v58, %v6135_v57 }
 0xe26   :  { %v2848_v44 = vrot.slane %v2847_v23, 2  ;;  %v2927_v36 = vsel %vm919_vm6, %v2834_v11, 0.0 }
 0xe27   :  { %v3502_v3 = vmul.f32 0.0625, %v3501_v61  ;;  %v3591_v30 = vrot.slane %v3590_v15, 1  ;;  %v2928_v32 = vadd.f32 %v2927_v36, %v2926_v52  ;;  %v3017_v34 = vsel %vm919_vm6, %v2836_v16, 0.0 }
 0xe28   :  { %v2849_v35 = vadd.f32 %v2848_v44, %v2847_v23  ;;  %v4946_v1 = vpop.eup %4945 }
 0xe29   :  { %3504 = vrot.lane.b32.xlu1 %v3502_v3, %s5021_s29  ;;  %v3592_v24 = vadd.f32 %v3591_v30, %v3590_v15  ;;  %v2838_v25 = vmul.f32 %v4946_v1, %v6129_v33  ;;  %v2929_v7 = vrot.slane %v2928_v32, 4 }
 0xe2a   :  { %v2850_v4 = vrot.slane %v2849_v35, 1 }
 0xe2b   :  { %v3593_v60 = vmul.f32 0.0625, %v3592_v24  ;;  %v3018_v38 = vsel %vm919_vm6, %v2838_v25, 0.0  ;;  %v2930_v62 = vadd.f32 %v2929_v7, %v2928_v32 }
 0xe2c   :  { %v2851_v13 = vadd.f32 %v2850_v4, %v2849_v35  ;;  %v3019_v19 = vadd.f32 %v3018_v38, %v3017_v34 }
 0xe2d   :  { %3595 = vrot.lane.b32.xlu0 %v3593_v60, %s5021_s29  ;;  %v2931_v18 = vrot.slane %v2930_v62, 2 }
 0xe2e   :  { %v2852_v14 = vmul.f32 0.0625, %v2851_v13  ;;  %v3020_v6 = vrot.slane %v3019_v19, 4 }
 0xe2f   :  { %v2932_v63 = vadd.f32 %v2931_v18, %v2930_v62 }
 0xe30   :  { %4429 = vmatmul.mubr.msk.f32.vlgmr.msra.gmra.mrb[34].mxu1 %vm919_vm6, %v2852_v14  ;;  %v3021_v28 = vadd.f32 %v3020_v6, %v3019_v19 }
 0xe31   :  { %4435 = vmatprep.mubr.msk.f32.mxu1 %vm5022_vm7, %v5023_v46  ;;  %v2933_v42 = vrot.slane %v2932_v63, 1 }
 0xe32   :  { %v3022_v50 = vrot.slane %v3021_v28, 2 }
 0xe33   :  { %v2934_v59 = vadd.f32 %v2933_v42, %v2932_v63 }
 0xe34   :  { %v3023_v20 = vadd.f32 %v3022_v50, %v3021_v28 }
 0xe35   :  { %v2935_v26 = vmul.f32 0.0625, %v2934_v59 }
 0xe36   :  { %v3024_v56 = vrot.slane %v3023_v20, 1 }
 0xe38   :  { %v3025_v37 = vadd.f32 %v3024_v56, %v3023_v20 }
 0xe3a   :  { %v3026_v30 = vmul.f32 0.0625, %v3025_v37 }
 0xe51   :  { %v2826_v21 = vpop.xlane.xlu0 %2825 }
 0xe52   :  { %4947 = vrcp.f32 %v2826_v21 }
 0xe55   :  { %v4792_v33 = vpop.permute.xlu0 %4791 }
 0xe56   :  { %v4794_v45 = vunpack.i.h.bf16 %v4792_v33  ;;  %v4793_v48 = vunpack.i.l.bf16 %v4792_v33 }
 0xe58   :  { %v4686_v61 = vpack.c.bf16 %v4794_v45, %v4793_v48 }
 0xe59   :  { %v4807_v40 = vpop.permute.xlu0 %4806 }
 0xe5a   :  { %v4809_v49 = vunpack.i.h.bf16 %v4807_v40  ;;  %v4808_v43 = vunpack.i.l.bf16 %v4807_v40 }
 0xe5b   :  { %v2823_v57 = vpop.xlane.xlu1 %2822 }
 0xe5c   :  { %4949 = vrcp.f32 %v2823_v57  ;;  %v4948_v2 = vpop.eup %4947  ;;  %v4698_v11 = vpack.c.bf16 %v4809_v49, %v4808_v43 }
 0xe5d   :  { %v2842_v55 = vmul.f32 %v4948_v2, %v6141_v22 }
 0xe5f   :  { %v4787_v12 = vpop.permute.xlu1 %4786  ;;  %v3107_v44 = vsel %vm919_vm6, %v2842_v55, 0.0 }
 0xe60   :  { %v4789_v0 = vunpack.i.h.bf16 %v4787_v12  ;;  %v4788_v54 = vunpack.i.l.bf16 %v4787_v12 }
 0xe62   :  { %v4683_v29 = vpack.c.bf16 %v4789_v0, %v4788_v54 }
 0xe63   :  { %v4797_v31 = vpop.permute.xlu1 %4796 }
 0xe64   :  { %4684 = vmatpush3.bf16.msra.mxu1 %v4683_v29  ;;  %v4799_v23 = vunpack.i.h.bf16 %v4797_v31  ;;  %v4798_v15 = vunpack.i.l.bf16 %v4797_v31 }
 0xe65   :  { %4685 = vmatprep.subr.bf16.mxu1 %v5020_v47 }
 0xe66   :  { %v4950_v41 = vpop.eup %4949  ;;  %v4689_v24 = vpack.c.bf16 %v4799_v23, %v4798_v15 }
 0xe67   :  { %v2840_v3 = vmul.f32 %v4950_v41, %v6145_v5  ;;  %4436 = vmatmul.mubr.msk.f32.vlgmr.msra.gmra.mrb[36].mxu1 %vm919_vm6, %v2935_v26  ;;  %v4802_v17 = vpop.permute.xlu1 %4801  ;;  %v70_v41 = vld [vmem:[#allocation2 + $0x40] sm:$0x1] }
 0xe68   :  { %4687 = vmatpush3.bf16.msra.mxu1 %v4686_v61  ;;  %4442 = vmatprep.mubr.msk.f32.mxu1 %vm5022_vm7, %v5023_v46  ;;  %v4804_v8 = vunpack.i.h.bf16 %v4802_v17  ;;  %v4803_v39 = vunpack.i.l.bf16 %v4802_v17 }
 0xe69   :  { %v3106_v22 = vsel %vm919_vm6, %v2840_v3, 0.0  ;;  %4688 = vmatprep.subr.bf16.mxu1 %v5020_v47  ;;  %v1950_v3 = vadd.f32 %v5849_v51, %v70_v41 }
 0xe6a   :  { %v3108_v35 = vadd.f32 %v3107_v44, %v3106_v22  ;;  %v4695_v9 = vpack.c.bf16 %v4804_v8, %v4803_v39 }
 0xe6b   :  { %4443 = vmatmul.mubr.msk.f32.vlgmr.msra.gmra.mrb[38].mxu1 %vm919_vm6, %v3026_v30 }
 0xe6c   :  { %v3109_v4 = vrot.slane %v3108_v35, 4  ;;  %4690 = vmatpush3.bf16.msra.mxu1 %v4689_v24  ;;  %4449 = vmatprep.mubr.msk.f32.mxu1 %vm5022_vm7, %v5023_v46 }
 0xe6d   :  { %4691 = vmatprep.subr.bf16.mxu1 %v5020_v47 }
 0xe6e   :  { %v3110_v5 = vadd.f32 %v3109_v4, %v3108_v35 }
 0xe70   :  { %v3111_v60 = vrot.slane %v3110_v5, 2 }
 0xe72   :  { %v3112_v13 = vadd.f32 %v3111_v60, %v3110_v5 }
 0xe74   :  { %v3113_v14 = vrot.slane %v3112_v13, 1 }
 0xe76   :  { %v3114_v10 = vadd.f32 %v3113_v14, %v3112_v13 }
 0xe78   :  { %v3115_v27 = vmul.f32 0.0625, %v3114_v10 }
 0xe7a   :  { %4450 = vmatmul.mubr.msk.f32.vlgmr.msra.gmra.mrb[40].mxu1 %vm919_vm6, %v3115_v27 }
 0xe7b   :  { %4693 = vmatpush3.bf16.msra.mxu1 %v4692_v53  ;;  %4456 = vmatprep.mubr.msk.f32.mxu1 %vm5022_vm7, %v5023_v46  ;;  %v4812_v53 = vpop.permute.xlu0 %4811 }
 0xe7c   :  { %4694 = vmatprep.subr.bf16.mxu1 %v5020_v47  ;;  %v4814_v1 = vunpack.i.h.bf16 %v4812_v53  ;;  %v4813_v52 = vunpack.i.l.bf16 %v4812_v53 }
 0xe7e   :  { %v4701_v36 = vpack.c.bf16 %v4814_v1, %v4813_v52 }
 0xe8e   :  { %v3327_v58 = vpop.permute.xlu1 %3326 }
 0xe8f   :  { %4457 = vmatmul.mubr.msk.f32.vlgmr.msra.gmra.mrb[42].mxu1 %vm919_vm6, %v3327_v58 }
 0xe90   :  { %4696 = vmatpush3.bf16.msra.mxu1 %v4695_v9  ;;  %4463 = vmatprep.mubr.msk.f32.mxu1 %vm5022_vm7, %v5023_v46 }
 0xe91   :  { %4697 = vmatprep.subr.bf16.mxu1 %v5020_v47 }
 0xe97   :  { %v3412_v16 = vpop.permute.xlu1 %3411 }
 0xe98   :  { %4464 = vmatmul.mubr.msk.f32.vlgmr.msra.gmra.mrb[44].mxu1 %vm919_vm6, %v3412_v16 }
 0xe99   :  { %4699 = vmatpush3.bf16.msra.mxu1 %v4698_v11  ;;  %4470 = vmatprep.mubr.msk.f32.mxu1 %vm5022_vm7, %v5023_v46 }
 0xe9a   :  { %4700 = vmatprep.subr.bf16.mxu1 %v5020_v47 }
 0xe9b   :  { %v3505_v25 = vpop.permute.xlu1 %3504 }
 0xe9c   :  { %4471 = vmatmul.mubr.msk.f32.vlgmr.msra.gmra.mrb[46].mxu1 %vm919_vm6, %v3505_v25 }
 0xe9d   :  { %4702 = vmatpush3.bf16.msra.mxu1 %v4701_v36  ;;  %4477 = vmatprep.mubr.msk.f32.mxu1 %vm5022_vm7, %v5023_v46 }
 0xe9f   :  { %v3596_v32 = vpop.permute.xlu0 %3595 }
 0xea0   :  { %4478 = vmatmul.mubr.msk.f32.vlgmr.msra.gmra.mrb[48].mxu1 %vm919_vm6, %v3596_v32 }
 0xf03   :  { %v2922_v34 = vpop.f32.mrb[34].mxu1 }
 0xf04   :  { %v4430_v38 = vpop.f32.mrb[35].mxu1 }
 0xf3a   :  { %v3013_v7 = vpop.f32.mrb[36].mxu1 }
 0xf3b   :  { %v4437_v19 = vpop.f32.mrb[37].mxu1  ;;  %3676 = vrot.lane.b32.xlu1 %v3013_v7, %s5019_s26  ;;  %s3795_s26 = sshll.u32 %s5032_s2, 4  ;;  %s3796_s26 = int_to_ptr.vmem [resolvable:$true] %s3795_s26 }
 0xf3c   :  { %s4991_s29 = scalar_lea.vmem %s3796_s26, 32  ;;  %p4996_p9 = scmp.lt.s32.totalorder %s3796_s26, %s3796_s26 }
 0xf3d   :  { %p4992_p8 = scmp.ne.s32.totalorder %s3796_s26, %s4991_s29  ;;  %p4997_p10 = scmp.lt.s32.totalorder %s4991_s29, %s4991_s29 }
 0xf3e   :  { %v3102_v6 = vpop.f32.mrb[38].mxu1 }
 0xf3f   :  { %v4444_v62 = vpop.f32.mrb[39].mxu1  ;;  %3680 = vrot.lane.b32.xlu0 %v3102_v6, %s5026_s21  ;;  %p4998_p11 = por %p4997_p10, %p4996_p9 }
 0xf41   :  { %p4999_p12 = pnand %p4998_p11, %p4992_p8 }
 0xf4d   :  { %v3191_v47 = vpop.f32.mrb[40].mxu1 }
 0xf4e   :  { %v4451_v21 = vpop.f32.mrb[41].mxu1  ;;  %3684 = vrot.lane.b32.xlu1 %v3191_v47, %s5027_s0 }
 0xf62   :  { %v3396_v18 = vpop.f32.mrb[42].mxu1 }
 0xf63   :  { %3688 = vrot.lane.b32.xlu0 %v3396_v18, %s5028_s22  ;;  %v4458_v46 = vpop.f32.mrb[43].mxu1 }
 0xf6b   :  { %v3489_v28 = vpop.f32.mrb[44].mxu1 }
 0xf6c   :  { %3692 = vrot.lane.b32.xlu1 %v3489_v28, %s5029_s23  ;;  %v4465_v63 = vpop.f32.mrb[45].mxu1 }
 0xf6f   :  { %v3580_v50 = vpop.f32.mrb[46].mxu1 }
 0xf70   :  { %3696 = vrot.lane.b32.xlu0 %v3580_v50, %s5030_s24  ;;  %v4472_v57 = vpop.f32.mrb[47].mxu1 }
 0xf73   :  { %v3671_v42 = vpop.f32.mrb[48].mxu1 }
 0xf74   :  { %3700 = vrot.lane.b32.xlu1 %v3671_v42, %s5031_s25  ;;  %v4479_v20 = vpop.f32.mrb[49].mxu1 }
 0xfad   :  { %v3677_v33 = vpop.permute.xlu1 %3676 }
 0xfae   :  { %v3703_v59 = vsel %vm1870_vm8, %v2922_v34, %v3677_v33 }
 0xfb1   :  { %v3681_v12 = vpop.permute.xlu0 %3680 }
 0xfb2   :  { %v3704_v56 = vsel %vm919_vm6, %v3703_v59, %v3681_v12 }
 0xfc0   :  { %v3685_v0 = vpop.permute.xlu1 %3684 }
 0xfc1   :  { %v3705_v45 = vsel %vm1873_vm9, %v3704_v56, %v3685_v0 }
 0xfd5   :  { %v3689_v54 = vpop.permute.xlu0 %3688 }
 0xfd6   :  { %v3706_v29 = vsel %vm215_vm2, %v3705_v45, %v3689_v54 }
 0xfde   :  { %v3693_v2 = vpop.permute.xlu1 %3692 }
 0xfdf   :  { %v3707_v31 = vsel %vm397_vm3, %v3706_v29, %v3693_v2 }
 0xfe2   :  { %v3697_v48 = vpop.permute.xlu0 %3696 }
 0xfe3   :  { %v3708_v55 = vsel %vm85_vm0, %v3707_v31, %v3697_v48 }
 0xfe6   :  { %v3701_v26 = vpop.permute.xlu1 %3700 }
 0xfe7   :  { %v3709_v37 = vsel %vm1878_vm10, %v3708_v55, %v3701_v26 }
 0xfe8   :  { %4497 = vmatmul.mubr.msk.f32.vlgmr.msra.gmra.mrb[48].mxu0 %vm291_vm1, %v3709_v37 }
0x10bb   :  { %v3779_v61 = vpop.f32.mrb[48].mxu0 }
0x10bc   :  { %v3780_v23 = vadd.f32 %v3779_v61, %v70_v41  ;;  %v4498_v15 = vpop.f32.mrb[49].mxu0 }
0x10be   :  { %v3784_v44 = vrot.slane %v3780_v23, 7 }
0x10c0   :  { %v3787_v22 = vsel %vm3786_vm11, %v1950_v3, %v3784_v44 }
0x10c1   :  { %3788 = vst [vmem:[#allocation5] sm:$0x3] %v3787_v22 }
0x10c2   :  { %5002 = shalt.err (!%p4999_p12)
}
0x10c3   :  { %s5003_s21 = scalar_lea.hbm %s6260_s4, 32 }
0x10c4   :  { %p5004_p13 = scmp.ne.s32.totalorder %s6260_s4, %s5003_s21  ;;  %p5007_p0 = scmp.lt.u32.totalorder %s5003_s21, %s6260_s4 }
0x10c6   :  { %p5009_p1 = pnand %p5007_p0, %p5004_p13 }
0x10c8   :  { %5012 = shalt.err (!%p5009_p1)
}
0x10c9   :  { %3798 = dma.vmem_to_hbm [thread:$0]  %s3796_s26, 32, %s6260_s4, [#allocation4]  }
0x10ca   :  { %5015 = dma.done.wait [#allocation4], 32  }
0x10cb   :  { %5016 = vsyncadd [#allocation4], 4294967264 }
0x10cc   :  { %3802 = vsyncpa [#allocation3], 1 }
0x10cd   :  { %3803 = vsyncpa [#allocation4], 1 }

</bundles_post_ra>
